<compile_context>
chip_gen: v7x
topology: tpu7x:2x2x1
jax: 0.10.0
libtpu: 0.0.40
codegen_flags: <defaults>
</compile_context>

<pallas_src>
import jax
import jax.numpy as jnp
from jax.experimental import pallas as pl
from jax.experimental.pallas import tpu as pltpu

BN_EPS = 1e-3
OUT_C = 768  # 4 branches x 192 channels


# ----------------------------------------------------------------------------
# Kernel
# ----------------------------------------------------------------------------
def inception_c_kernel(x_ref, wcat_ref, b11_ref, b71_ref, bd1_ref, bp_ref,
                       w72_ref, b72_ref, w73_ref, b73_ref,
                       wd2_ref, bd2_ref, wd3_ref, bd3_ref,
                       wd4_ref, bd4_ref, wd5_ref, bd5_ref,
                       out_ref):
    f32 = jnp.float32
    B, H, W, Cin = x_ref.shape
    M = B * H * W
    c192 = 192
    c7 = b71_ref.shape[-1]

    wcat = wcat_ref[...]
    cd = wcat.dtype  # compute dtype at the MXU inputs (f32 or bf16)

    # --- fused stage-1 1x1 matmul: [branch1x1 | 7x7_1 | 7x7dbl_1 | pool] -----
    x2d = x_ref[...].astype(cd).reshape(M, Cin)
    fused = jnp.dot(x2d, wcat, preferred_element_type=f32)       # (M, 384+2*c7)
    fused = fused.reshape(B, H, W, 2 * c192 + 2 * c7)

    b1 = jnp.maximum(fused[:, :, :, :c192]
                     + b11_ref[...].reshape(1, 1, 1, c192), 0.0)
    b7 = jnp.maximum(fused[:, :, :, c192:c192 + c7]
                     + b71_ref[...].reshape(1, 1, 1, c7), 0.0)
    bd = jnp.maximum(fused[:, :, :, c192 + c7:c192 + 2 * c7]
                     + bd1_ref[...].reshape(1, 1, 1, c7), 0.0)
    bp_pre = fused[:, :, :, c192 + 2 * c7:]                      # raw, (B,H,W,192)

    # --- 7-tap conv ((1,7) when axis=2, (7,1) when axis=1), SAME pad 3 -------
    # Pad the input once, accumulate 7 tap matmuls in 2D; center tap (k=3)
    # seeds the accumulator together with the bias (no zeros broadcast).
    def conv_tap7(a4d, w_ref, b_ref, axis):
        Cc = a4d.shape[-1]
        cout = w_ref.shape[-1]
        L = a4d.shape[axis]
        pad_shape = list(a4d.shape)
        pad_shape[axis] = 3
        zpad = jnp.zeros(pad_shape, a4d.dtype)
        apad = jnp.concatenate([zpad, a4d, zpad], axis=axis)     # L+6 along axis

        acc = jnp.dot(a4d.reshape(M, Cc).astype(cd), w_ref[3],
                      preferred_element_type=f32) + b_ref[...]   # (M, cout)
        for k in (0, 1, 2, 4, 5, 6):                             # static unroll
            win = jax.lax.slice_in_dim(apad, k, k + L, axis=axis)
            acc = acc + jnp.dot(win.reshape(M, Cc).astype(cd), w_ref[k],
                                preferred_element_type=f32)
        return jnp.maximum(acc, 0.0).reshape(B, H, W, cout)

    # --- branch 7x7: (1,7) along W -> (7,1) along H ---------------------------
    b7 = conv_tap7(b7, w72_ref, b72_ref, axis=2)
    b7 = conv_tap7(b7, w73_ref, b73_ref, axis=1)                 # -> 192

    # --- branch 7x7 double: (7,1) -> (1,7) -> (7,1) -> (1,7) ------------------
    bd = conv_tap7(bd, wd2_ref, bd2_ref, axis=1)
    bd = conv_tap7(bd, wd3_ref, bd3_ref, axis=2)
    bd = conv_tap7(bd, wd4_ref, bd4_ref, axis=1)
    bd = conv_tap7(bd, wd5_ref, bd5_ref, axis=2)                 # -> 192

    # --- branch pool (commuted): separable 3x3/9 sum over 192 channels -------
    zh = jnp.zeros((B, 1, W, c192), f32)
    ph = jnp.concatenate([zh, bp_pre, zh], axis=1)               # (B,H+2,W,192)
    sh = (jax.lax.slice_in_dim(ph, 0, H, axis=1) + bp_pre
          + jax.lax.slice_in_dim(ph, 2, H + 2, axis=1))
    zw = jnp.zeros((B, H, 1, c192), f32)
    pw = jnp.concatenate([zw, sh, zw], axis=2)                   # (B,H,W+2,192)
    pooled = (jax.lax.slice_in_dim(pw, 0, W, axis=2) + sh
              + jax.lax.slice_in_dim(pw, 2, W + 2, axis=2)) * (1.0 / 9.0)
    bp = jnp.maximum(pooled + bp_ref[...].reshape(1, 1, 1, c192), 0.0)

    # --- lane-dense stores directly into the concatenated output block -------
    od = out_ref.dtype
    out_ref[:, :, :, 0:192] = b1.astype(od)
    out_ref[:, :, :, 192:384] = b7.astype(od)
    out_ref[:, :, :, 384:576] = bd.astype(od)
    out_ref[:, :, :, 576:768] = bp.astype(od)


# ----------------------------------------------------------------------------
# Wrapper (layout plumbing + BN folding + pallas_call)
# ----------------------------------------------------------------------------
def _fold_bn(p):
    s = p["gamma"] / jnp.sqrt(p["var"] + BN_EPS)
    w = p["w"] * s[:, None, None, None]                 # scale output channels
    b = p["beta"] - p["mean"] * s
    return w, b


def _w_1x1(w):   # (Cout, Cin, 1, 1) -> (Cin, Cout)
    return jnp.transpose(w[:, :, 0, 0], (1, 0))


def _w_1x7(w):   # (Cout, Cin, 1, 7) -> (7, Cin, Cout)  (tap index along W)
    return jnp.transpose(w[:, :, 0, :], (2, 1, 0))


def _w_7x1(w):   # (Cout, Cin, 7, 1) -> (7, Cin, Cout)  (tap index along H)
    return jnp.transpose(w[:, :, :, 0], (2, 1, 0))


def _default_vmem_limit():
    try:
        cap = int(pltpu.get_tpu_info().vmem_capacity_bytes)
    except Exception:
        cap = 64 * 1024 * 1024       # conservative (v7x-class) fallback
    # ~75% of physical, never above 96 MiB (v5e/v6e), ~48 MiB on 64 MiB v7x.
    return min(cap * 3 // 4, 96 * 1024 * 1024)


def inception_c_forward(x, params, *, compute_dtype=jnp.float32, block_n=None,
                        vmem_limit_bytes=None):
    N, Cin, H, W = x.shape
    c7 = params["branch7x7_1"]["w"].shape[0]

    x_nhwc = jnp.transpose(x, (0, 2, 3, 1))             # channels-last (lane = C)
    if compute_dtype != jnp.float32:
        # After the pool commute x is only consumed by matmuls -> safe to cast.
        x_nhwc = x_nhwc.astype(compute_dtype)

    def prep(name, reshape_fn):
        w, b = _fold_bn(params[name])
        return reshape_fn(w), b.reshape(1, -1).astype(jnp.float32)

    w11, b11 = prep("branch1x1", _w_1x1)
    w71, b71 = prep("branch7x7_1", _w_1x1)
    wd1, bd1 = prep("branch7x7dbl_1", _w_1x1)
    wp, bp = prep("branch_pool", _w_1x1)
    # Fused stage-1 weight: [branch1x1 | 7x7_1 | 7x7dbl_1 | branch_pool(commuted)]
    wcat = jnp.concatenate([w11, w71, wd1, wp], axis=1).astype(compute_dtype)

    w72, b72 = prep("branch7x7_2", _w_1x7)
    w73, b73 = prep("branch7x7_3", _w_7x1)
    wd2, bd2 = prep("branch7x7dbl_2", _w_7x1)
    wd3, bd3 = prep("branch7x7dbl_3", _w_1x7)
    wd4, bd4 = prep("branch7x7dbl_4", _w_7x1)
    wd5, bd5 = prep("branch7x7dbl_5", _w_1x7)
    w72, w73, wd2, wd3, wd4, wd5 = [a.astype(compute_dtype)
                                    for a in (w72, w73, wd2, wd3, wd4, wd5)]

    weight_args = (wcat, b11, b71, bd1, bp,
                   w72, b72, w73, b73,
                   wd2, bd2, wd3, bd3, wd4, bd4, wd5, bd5)
    wbytes = int(sum(a.size * a.dtype.itemsize for a in weight_args))

    if vmem_limit_bytes is None:
        vmem_limit_bytes = _default_vmem_limit()
    vmem_limit_bytes = int(vmem_limit_bytes)

    x_bytes = jnp.dtype(compute_dtype).itemsize

    # Batch tile: divisor of N, >=2 grid steps whenever N>=2 (megacore on v7x),
    # target M = bn*H*W >= 512 rows, footprint within the VMEM budget minus
    # resident weights and headroom.
    def pick_block_n():
        per_sample = H * W * (
            2 * Cin * x_bytes                     # input block, double-buffered
            + 2 * OUT_C * 4                       # output block, double-buffered
            + (2 * OUT_C + 4 * c7 + 2 * 192) * 4  # live f32 intermediates (rough)
        )
        budget = vmem_limit_bytes - wbytes - (4 << 20)
        cap = max(1, N // 2)
        best = 1
        for cand in range(1, cap + 1):
            if N % cand == 0 and cand * per_sample <= budget:
                best = cand
                if cand * H * W >= 512:
                    break
        return best

    bn = block_n if block_n is not None else pick_block_n()
    assert N % bn == 0

    # Cost estimate so XLA can overlap the surrounding layout transposes.
    M = N * H * W
    cfused = int(wcat.shape[1])
    flops = 2 * M * Cin * cfused + 2 * M * 7 * (4 * c7 * c7 + 2 * c7 * 192)
    bytes_accessed = int(x_nhwc.size) * x_bytes + M * OUT_C * 4 + wbytes
    cost = pl.CostEstimate(flops=int(flops), transcendentals=0,
                           bytes_accessed=int(bytes_accessed))

    def const_spec(a):
        zeros = (0,) * a.ndim
        return pl.BlockSpec(a.shape, lambda i, _z=zeros: _z)

    in_specs = [pl.BlockSpec((bn, H, W, Cin), lambda i: (i, 0, 0, 0))]
    in_specs += [const_spec(a) for a in weight_args]

    out_nhwc = pl.pallas_call(
        inception_c_kernel,
        out_shape=jax.ShapeDtypeStruct((N, H, W, OUT_C), jnp.float32),
        grid=(N // bn,),
        in_specs=in_specs,
        out_specs=pl.BlockSpec((bn, H, W, OUT_C), lambda i: (i, 0, 0, 0)),
        compiler_params=pltpu.CompilerParams(
            dimension_semantics=("parallel",),
            vmem_limit_bytes=vmem_limit_bytes),
        cost_estimate=cost,
    )(x_nhwc, *weight_args)

    return jnp.transpose(out_nhwc, (0, 3, 1, 2))         # back to NCHW


# ----------------------------------------------------------------------------
# Parameters & pure-JAX reference (PyTorch eval-mode semantics)
# ----------------------------------------------------------------------------
def init_params(key, in_channels, channels_7x7):
    c7 = channels_7x7
    specs = {
        "branch1x1":      (192, in_channels, 1, 1),
        "branch7x7_1":    (c7, in_channels, 1, 1),
        "branch7x7_2":    (c7, c7, 1, 7),
        "branch7x7_3":    (192, c7, 7, 1),
        "branch7x7dbl_1": (c7, in_channels, 1, 1),
        "branch7x7dbl_2": (c7, c7, 7, 1),
        "branch7x7dbl_3": (c7, c7, 1, 7),
        "branch7x7dbl_4": (c7, c7, 7, 1),
        "branch7x7dbl_5": (192, c7, 1, 7),
        "branch_pool":    (192, in_channels, 1, 1),
    }
    params = {}
    keys = jax.random.split(key, len(specs))
    for k, (name, shape) in zip(keys, specs.items()):
        kw, kg, kb, km, kv = jax.random.split(k, 5)
        fan_in = shape[1] * shape[2] * shape[3]
        params[name] = {
            "w": jax.random.normal(kw, shape, jnp.float32) / jnp.sqrt(fan_in),
            "gamma": jax.random.uniform(kg, (shape[0],), jnp.float32, 0.5, 1.5),
            "beta": 0.05 * jax.random.normal(kb, (shape[0],), jnp.float32),
            "mean": 0.05 * jax.random.normal(km, (shape[0],), jnp.float32),
            "var": jax.random.uniform(kv, (shape[0],), jnp.float32, 0.5, 1.5),
        }
    return params


def reference_forward(x, params):
    def basic_conv(inp, p, padding):
        y = jax.lax.conv_general_dilated(
            inp, p["w"], (1, 1), padding,
            dimension_numbers=("NCHW", "OIHW", "NCHW"),
            precision=jax.lax.Precision.HIGHEST)
        s = p["gamma"] / jnp.sqrt(p["var"] + BN_EPS)
        t = p["beta"] - p["mean"] * s
        y = y * s[None, :, None, None] + t[None, :, None, None]
        return jnp.maximum(y, 0.0)

    b1 = basic_conv(x, params["branch1x1"], "VALID")
    b7 = basic_conv(x, params["branch7x7_1"], "VALID")
    b7 = basic_conv(b7, params["branch7x7_2"], [(0, 0), (3, 3)])
    b7 = basic_conv(b7, params["branch7x7_3"], [(3, 3), (0, 0)])
    bd = basic_conv(x, params["branch7x7dbl_1"], "VALID")
    bd = basic_conv(bd, params["branch7x7dbl_2"], [(3, 3), (0, 0)])
    bd = basic_conv(bd, params["branch7x7dbl_3"], [(0, 0), (3, 3)])
    bd = basic_conv(bd, params["branch7x7dbl_4"], [(3, 3), (0, 0)])
    bd = basic_conv(bd, params["branch7x7dbl_5"], [(0, 0), (3, 3)])
    pool = jax.lax.reduce_window(
        x, 0.0, jax.lax.add, (1, 1, 3, 3), (1, 1, 1, 1),
        [(0, 0), (0, 0), (1, 1), (1, 1)]) / 9.0  # count_include_pad=True
    bp = basic_conv(pool, params["branch_pool"], "VALID")
    return jnp.concatenate([b1, b7, bd, bp], axis=1)


# ----------------------------------------------------------------------------
if __name__ == "__main__":
    N, IN_CH, H, W = 2, 16, 8, 8
    C7 = 32

    key = jax.random.PRNGKey(0)
    kx, kp = jax.random.split(key)
    x = jax.random.normal(kx, (N, IN_CH, H, W), jnp.float32)
    params = init_params(kp, IN_CH, C7)

    ref = jax.block_until_ready(reference_forward(x, params))

    # f32 path: tight tolerance (only MXU f32 rounding + linear-op reassociation
    # from the fused stage-1 matmul and the pool/1x1 commutation).
    out = jax.block_until_ready(inception_c_forward(x, params))
    assert out.shape == ref.shape
    if not bool(jnp.allclose(out, ref, rtol=1e-3, atol=2e-4)):
        err = float(jnp.max(jnp.abs(out - ref)))
        raise AssertionError(f"f32 Pallas kernel mismatch, max abs err={err}")

    # bf16 fast-MXU path (weights + activations at dot inputs in bf16, f32
    # accumulation): looser tolerance for bf16's ~2^-8 relative precision
    # compounding through the 5-conv-deep branch; the f32 path is the tight gate.
    out_bf16 = jax.block_until_ready(
        inception_c_forward(x, params, compute_dtype=jnp.bfloat16))
    if not bool(jnp.allclose(out_bf16, ref, rtol=4e-2, atol=2e-2)):
        err = float(jnp.max(jnp.abs(out_bf16 - ref)))
        raise AssertionError(f"bf16 Pallas kernel mismatch, max abs err={err}")

    print("KERNEL_OK")
</pallas_src>

<mosaic_0001>
module attributes {stable_mosaic.version = 11 : i64} {
  func.func @inception_c_kernel(%arg0: i32, %arg1: memref<1x8x8x16xf32, #tpu.memory_space<vmem>>, %arg2: memref<16x448xf32, #tpu.memory_space<vmem>>, %arg3: memref<1x192xf32, #tpu.memory_space<vmem>>, %arg4: memref<1x32xf32, #tpu.memory_space<vmem>>, %arg5: memref<1x32xf32, #tpu.memory_space<vmem>>, %arg6: memref<1x192xf32, #tpu.memory_space<vmem>>, %arg7: memref<7x32x32xf32, #tpu.memory_space<vmem>>, %arg8: memref<1x32xf32, #tpu.memory_space<vmem>>, %arg9: memref<7x32x192xf32, #tpu.memory_space<vmem>>, %arg10: memref<1x192xf32, #tpu.memory_space<vmem>>, %arg11: memref<7x32x32xf32, #tpu.memory_space<vmem>>, %arg12: memref<1x32xf32, #tpu.memory_space<vmem>>, %arg13: memref<7x32x32xf32, #tpu.memory_space<vmem>>, %arg14: memref<1x32xf32, #tpu.memory_space<vmem>>, %arg15: memref<7x32x32xf32, #tpu.memory_space<vmem>>, %arg16: memref<1x32xf32, #tpu.memory_space<vmem>>, %arg17: memref<7x32x192xf32, #tpu.memory_space<vmem>>, %arg18: memref<1x192xf32, #tpu.memory_space<vmem>>, %arg19: memref<1x8x8x768xf32, #tpu.memory_space<vmem>>) attributes {dimension_semantics = [#tpu.dimension_semantics<parallel>], iteration_bounds = array<i64: 2>, scalar_prefetch = 0 : i64, scratch_operands = 0 : i64, tpu.core_type = #tpu.core_type<tc>, window_params = [{transform_indices = @transform_0, window_bounds = array<i64: 1, 8, 8, 16>}, {pipeline_mode = #tpu.pipeline_mode<synchronous>, transform_indices = @transform_1, window_bounds = array<i64: 16, 448>}, {pipeline_mode = #tpu.pipeline_mode<synchronous>, transform_indices = @transform_2, window_bounds = array<i64: 1, 192>}, {pipeline_mode = #tpu.pipeline_mode<synchronous>, transform_indices = @transform_3, window_bounds = array<i64: 1, 32>}, {pipeline_mode = #tpu.pipeline_mode<synchronous>, transform_indices = @transform_4, window_bounds = array<i64: 1, 32>}, {pipeline_mode = #tpu.pipeline_mode<synchronous>, transform_indices = @transform_5, window_bounds = array<i64: 1, 192>}, {pipeline_mode = #tpu.pipeline_mode<synchronous>, transform_indices = @transform_6, window_bounds = array<i64: 7, 32, 32>}, {pipeline_mode = #tpu.pipeline_mode<synchronous>, transform_indices = @transform_7, window_bounds = array<i64: 1, 32>}, {pipeline_mode = #tpu.pipeline_mode<synchronous>, transform_indices = @transform_8, window_bounds = array<i64: 7, 32, 192>}, {pipeline_mode = #tpu.pipeline_mode<synchronous>, transform_indices = @transform_9, window_bounds = array<i64: 1, 192>}, {pipeline_mode = #tpu.pipeline_mode<synchronous>, transform_indices = @transform_10, window_bounds = array<i64: 7, 32, 32>}, {pipeline_mode = #tpu.pipeline_mode<synchronous>, transform_indices = @transform_11, window_bounds = array<i64: 1, 32>}, {pipeline_mode = #tpu.pipeline_mode<synchronous>, transform_indices = @transform_12, window_bounds = array<i64: 7, 32, 32>}, {pipeline_mode = #tpu.pipeline_mode<synchronous>, transform_indices = @transform_13, window_bounds = array<i64: 1, 32>}, {pipeline_mode = #tpu.pipeline_mode<synchronous>, transform_indices = @transform_14, window_bounds = array<i64: 7, 32, 32>}, {pipeline_mode = #tpu.pipeline_mode<synchronous>, transform_indices = @transform_15, window_bounds = array<i64: 1, 32>}, {pipeline_mode = #tpu.pipeline_mode<synchronous>, transform_indices = @transform_16, window_bounds = array<i64: 7, 32, 192>}, {pipeline_mode = #tpu.pipeline_mode<synchronous>, transform_indices = @transform_17, window_bounds = array<i64: 1, 192>}, {transform_indices = @transform_18, window_bounds = array<i64: 1, 8, 8, 768>}]} {
    %c0 = arith.constant 0 : index
    %c0_0 = arith.constant 0 : index
    %0 = vector.load %arg2[%c0, %c0_0] : memref<16x448xf32, #tpu.memory_space<vmem>>, vector<16x448xf32>
    %c0_1 = arith.constant 0 : index
    %c0_2 = arith.constant 0 : index
    %c0_3 = arith.constant 0 : index
    %c0_4 = arith.constant 0 : index
    %1 = vector.load %arg1[%c0_1, %c0_2, %c0_3, %c0_4] : memref<1x8x8x16xf32, #tpu.memory_space<vmem>>, vector<1x8x8x16xf32>
    %2 = vector.shape_cast %1 : vector<1x8x8x16xf32> to vector<64x16xf32>
    %cst = arith.constant dense<0.000000e+00> : vector<64x448xf32>
    %3 = tpu.matmul %2, %0, %cst {dimension_numbers = #tpu.dot_dimension_numbers<[1], [0], [0], [1], [0, 0, 1, 1], [], []>} : vector<64x16xf32>, vector<16x448xf32>, vector<64x448xf32> -> vector<64x448xf32>
    %4 = vector.shape_cast %3 : vector<64x448xf32> to vector<1x8x8x448xf32>
    %5 = vector.extract_strided_slice %4 {offsets = [0, 0, 0, 0], sizes = [1, 8, 8, 192], strides = [1, 1, 1, 1]} : vector<1x8x8x448xf32> to vector<1x8x8x192xf32>
    %c0_5 = arith.constant 0 : index
    %c0_6 = arith.constant 0 : index
    %6 = vector.load %arg3[%c0_5, %c0_6] : memref<1x192xf32, #tpu.memory_space<vmem>>, vector<1x192xf32>
    %7 = vector.shape_cast %6 : vector<1x192xf32> to vector<1x1x1x192xf32>
    %8 = vector.broadcast %7 : vector<1x1x1x192xf32> to vector<1x8x8x192xf32>
    %9 = arith.addf %5, %8 : vector<1x8x8x192xf32>
    %cst_7 = arith.constant 0.000000e+00 : f32
    %10 = vector.broadcast %cst_7 : f32 to vector<1x8x8x192xf32>
    %11 = arith.maximumf %9, %10 : vector<1x8x8x192xf32>
    %12 = vector.extract_strided_slice %4 {offsets = [0, 0, 0, 192], sizes = [1, 8, 8, 32], strides = [1, 1, 1, 1]} : vector<1x8x8x448xf32> to vector<1x8x8x32xf32>
    %c0_8 = arith.constant 0 : index
    %c0_9 = arith.constant 0 : index
    %13 = vector.load %arg4[%c0_8, %c0_9] : memref<1x32xf32, #tpu.memory_space<vmem>>, vector<1x32xf32>
    %14 = vector.shape_cast %13 : vector<1x32xf32> to vector<1x1x1x32xf32>
    %15 = vector.broadcast %14 : vector<1x1x1x32xf32> to vector<1x8x8x32xf32>
    %16 = arith.addf %12, %15 : vector<1x8x8x32xf32>
    %cst_10 = arith.constant 0.000000e+00 : f32
    %17 = vector.broadcast %cst_10 : f32 to vector<1x8x8x32xf32>
    %18 = arith.maximumf %16, %17 : vector<1x8x8x32xf32>
    %19 = vector.extract_strided_slice %4 {offsets = [0, 0, 0, 224], sizes = [1, 8, 8, 32], strides = [1, 1, 1, 1]} : vector<1x8x8x448xf32> to vector<1x8x8x32xf32>
    %c0_11 = arith.constant 0 : index
    %c0_12 = arith.constant 0 : index
    %20 = vector.load %arg5[%c0_11, %c0_12] : memref<1x32xf32, #tpu.memory_space<vmem>>, vector<1x32xf32>
    %21 = vector.shape_cast %20 : vector<1x32xf32> to vector<1x1x1x32xf32>
    %22 = vector.broadcast %21 : vector<1x1x1x32xf32> to vector<1x8x8x32xf32>
    %23 = arith.addf %19, %22 : vector<1x8x8x32xf32>
    %cst_13 = arith.constant 0.000000e+00 : f32
    %24 = vector.broadcast %cst_13 : f32 to vector<1x8x8x32xf32>
    %25 = arith.maximumf %23, %24 : vector<1x8x8x32xf32>
    %26 = vector.extract_strided_slice %4 {offsets = [0, 0, 0, 256], sizes = [1, 8, 8, 192], strides = [1, 1, 1, 1]} : vector<1x8x8x448xf32> to vector<1x8x8x192xf32>
    %cst_14 = arith.constant 0.000000e+00 : f32
    %27 = vector.broadcast %cst_14 : f32 to vector<1x8x3x32xf32>
    %28 = tpu.concatenate %27, %18, %27 in 2 : vector<1x8x3x32xf32>, vector<1x8x8x32xf32>, vector<1x8x3x32xf32> -> vector<1x8x14x32xf32>
    %29 = vector.shape_cast %18 : vector<1x8x8x32xf32> to vector<64x32xf32>
    %c3 = arith.constant 3 : index
    %c0_15 = arith.constant 0 : index
    %c0_16 = arith.constant 0 : index
    %30 = vector.load %arg7[%c3, %c0_15, %c0_16] : memref<7x32x32xf32, #tpu.memory_space<vmem>>, vector<1x32x32xf32>
    %31 = vector.shape_cast %30 : vector<1x32x32xf32> to vector<32x32xf32>
    %cst_17 = arith.constant dense<0.000000e+00> : vector<64x32xf32>
    %32 = tpu.matmul %29, %31, %cst_17 {dimension_numbers = #tpu.dot_dimension_numbers<[1], [0], [0], [1], [0, 0, 1, 1], [], []>} : vector<64x32xf32>, vector<32x32xf32>, vector<64x32xf32> -> vector<64x32xf32>
    %c0_18 = arith.constant 0 : index
    %c0_19 = arith.constant 0 : index
    %33 = vector.load %arg8[%c0_18, %c0_19] : memref<1x32xf32, #tpu.memory_space<vmem>>, vector<1x32xf32>
    %34 = vector.broadcast %33 : vector<1x32xf32> to vector<64x32xf32>
    %35 = arith.addf %32, %34 : vector<64x32xf32>
    %36 = vector.extract_strided_slice %28 {offsets = [0, 0, 0, 0], sizes = [1, 8, 8, 32], strides = [1, 1, 1, 1]} : vector<1x8x14x32xf32> to vector<1x8x8x32xf32>
    %37 = vector.shape_cast %36 : vector<1x8x8x32xf32> to vector<64x32xf32>
    %c0_20 = arith.constant 0 : index
    %c0_21 = arith.constant 0 : index
    %c0_22 = arith.constant 0 : index
    %38 = vector.load %arg7[%c0_20, %c0_21, %c0_22] : memref<7x32x32xf32, #tpu.memory_space<vmem>>, vector<1x32x32xf32>
    %39 = vector.shape_cast %38 : vector<1x32x32xf32> to vector<32x32xf32>
    %cst_23 = arith.constant dense<0.000000e+00> : vector<64x32xf32>
    %40 = tpu.matmul %37, %39, %cst_23 {dimension_numbers = #tpu.dot_dimension_numbers<[1], [0], [0], [1], [0, 0, 1, 1], [], []>} : vector<64x32xf32>, vector<32x32xf32>, vector<64x32xf32> -> vector<64x32xf32>
    %41 = arith.addf %35, %40 : vector<64x32xf32>
    %42 = vector.extract_strided_slice %28 {offsets = [0, 0, 1, 0], sizes = [1, 8, 8, 32], strides = [1, 1, 1, 1]} : vector<1x8x14x32xf32> to vector<1x8x8x32xf32>
    %43 = vector.shape_cast %42 : vector<1x8x8x32xf32> to vector<64x32xf32>
    %c1 = arith.constant 1 : index
    %c0_24 = arith.constant 0 : index
    %c0_25 = arith.constant 0 : index
    %44 = vector.load %arg7[%c1, %c0_24, %c0_25] : memref<7x32x32xf32, #tpu.memory_space<vmem>>, vector<1x32x32xf32>
    %45 = vector.shape_cast %44 : vector<1x32x32xf32> to vector<32x32xf32>
    %cst_26 = arith.constant dense<0.000000e+00> : vector<64x32xf32>
    %46 = tpu.matmul %43, %45, %cst_26 {dimension_numbers = #tpu.dot_dimension_numbers<[1], [0], [0], [1], [0, 0, 1, 1], [], []>} : vector<64x32xf32>, vector<32x32xf32>, vector<64x32xf32> -> vector<64x32xf32>
    %47 = arith.addf %41, %46 : vector<64x32xf32>
    %48 = vector.extract_strided_slice %28 {offsets = [0, 0, 2, 0], sizes = [1, 8, 8, 32], strides = [1, 1, 1, 1]} : vector<1x8x14x32xf32> to vector<1x8x8x32xf32>
    %49 = vector.shape_cast %48 : vector<1x8x8x32xf32> to vector<64x32xf32>
    %c2 = arith.constant 2 : index
    %c0_27 = arith.constant 0 : index
    %c0_28 = arith.constant 0 : index
    %50 = vector.load %arg7[%c2, %c0_27, %c0_28] : memref<7x32x32xf32, #tpu.memory_space<vmem>>, vector<1x32x32xf32>
    %51 = vector.shape_cast %50 : vector<1x32x32xf32> to vector<32x32xf32>
    %cst_29 = arith.constant dense<0.000000e+00> : vector<64x32xf32>
    %52 = tpu.matmul %49, %51, %cst_29 {dimension_numbers = #tpu.dot_dimension_numbers<[1], [0], [0], [1], [0, 0, 1, 1], [], []>} : vector<64x32xf32>, vector<32x32xf32>, vector<64x32xf32> -> vector<64x32xf32>
    %53 = arith.addf %47, %52 : vector<64x32xf32>
    %54 = vector.extract_strided_slice %28 {offsets = [0, 0, 4, 0], sizes = [1, 8, 8, 32], strides = [1, 1, 1, 1]} : vector<1x8x14x32xf32> to vector<1x8x8x32xf32>
    %55 = vector.shape_cast %54 : vector<1x8x8x32xf32> to vector<64x32xf32>
    %c4 = arith.constant 4 : index
    %c0_30 = arith.constant 0 : index
    %c0_31 = arith.constant 0 : index
    %56 = vector.load %arg7[%c4, %c0_30, %c0_31] : memref<7x32x32xf32, #tpu.memory_space<vmem>>, vector<1x32x32xf32>
    %57 = vector.shape_cast %56 : vector<1x32x32xf32> to vector<32x32xf32>
    %cst_32 = arith.constant dense<0.000000e+00> : vector<64x32xf32>
    %58 = tpu.matmul %55, %57, %cst_32 {dimension_numbers = #tpu.dot_dimension_numbers<[1], [0], [0], [1], [0, 0, 1, 1], [], []>} : vector<64x32xf32>, vector<32x32xf32>, vector<64x32xf32> -> vector<64x32xf32>
    %59 = arith.addf %53, %58 : vector<64x32xf32>
    %60 = vector.extract_strided_slice %28 {offsets = [0, 0, 5, 0], sizes = [1, 8, 8, 32], strides = [1, 1, 1, 1]} : vector<1x8x14x32xf32> to vector<1x8x8x32xf32>
    %61 = vector.shape_cast %60 : vector<1x8x8x32xf32> to vector<64x32xf32>
    %c5 = arith.constant 5 : index
    %c0_33 = arith.constant 0 : index
    %c0_34 = arith.constant 0 : index
    %62 = vector.load %arg7[%c5, %c0_33, %c0_34] : memref<7x32x32xf32, #tpu.memory_space<vmem>>, vector<1x32x32xf32>
    %63 = vector.shape_cast %62 : vector<1x32x32xf32> to vector<32x32xf32>
    %cst_35 = arith.constant dense<0.000000e+00> : vector<64x32xf32>
    %64 = tpu.matmul %61, %63, %cst_35 {dimension_numbers = #tpu.dot_dimension_numbers<[1], [0], [0], [1], [0, 0, 1, 1], [], []>} : vector<64x32xf32>, vector<32x32xf32>, vector<64x32xf32> -> vector<64x32xf32>
    %65 = arith.addf %59, %64 : vector<64x32xf32>
    %66 = vector.extract_strided_slice %28 {offsets = [0, 0, 6, 0], sizes = [1, 8, 8, 32], strides = [1, 1, 1, 1]} : vector<1x8x14x32xf32> to vector<1x8x8x32xf32>
    %67 = vector.shape_cast %66 : vector<1x8x8x32xf32> to vector<64x32xf32>
    %c6 = arith.constant 6 : index
    %c0_36 = arith.constant 0 : index
    %c0_37 = arith.constant 0 : index
    %68 = vector.load %arg7[%c6, %c0_36, %c0_37] : memref<7x32x32xf32, #tpu.memory_space<vmem>>, vector<1x32x32xf32>
    %69 = vector.shape_cast %68 : vector<1x32x32xf32> to vector<32x32xf32>
    %cst_38 = arith.constant dense<0.000000e+00> : vector<64x32xf32>
    %70 = tpu.matmul %67, %69, %cst_38 {dimension_numbers = #tpu.dot_dimension_numbers<[1], [0], [0], [1], [0, 0, 1, 1], [], []>} : vector<64x32xf32>, vector<32x32xf32>, vector<64x32xf32> -> vector<64x32xf32>
    %71 = arith.addf %65, %70 : vector<64x32xf32>
    %cst_39 = arith.constant 0.000000e+00 : f32
    %72 = vector.broadcast %cst_39 : f32 to vector<64x32xf32>
    %73 = arith.maximumf %71, %72 : vector<64x32xf32>
    %74 = vector.shape_cast %73 : vector<64x32xf32> to vector<1x8x8x32xf32>
    %cst_40 = arith.constant 0.000000e+00 : f32
    %75 = vector.broadcast %cst_40 : f32 to vector<1x3x8x32xf32>
    %76 = tpu.concatenate %75, %74, %75 in 1 : vector<1x3x8x32xf32>, vector<1x8x8x32xf32>, vector<1x3x8x32xf32> -> vector<1x14x8x32xf32>
    %77 = vector.shape_cast %74 : vector<1x8x8x32xf32> to vector<64x32xf32>
    %c3_41 = arith.constant 3 : index
    %c0_42 = arith.constant 0 : index
    %c0_43 = arith.constant 0 : index
    %78 = vector.load %arg9[%c3_41, %c0_42, %c0_43] : memref<7x32x192xf32, #tpu.memory_space<vmem>>, vector<1x32x192xf32>
    %79 = vector.shape_cast %78 : vector<1x32x192xf32> to vector<32x192xf32>
    %cst_44 = arith.constant dense<0.000000e+00> : vector<64x192xf32>
    %80 = tpu.matmul %77, %79, %cst_44 {dimension_numbers = #tpu.dot_dimension_numbers<[1], [0], [0], [1], [0, 0, 1, 1], [], []>} : vector<64x32xf32>, vector<32x192xf32>, vector<64x192xf32> -> vector<64x192xf32>
    %c0_45 = arith.constant 0 : index
    %c0_46 = arith.constant 0 : index
    %81 = vector.load %arg10[%c0_45, %c0_46] : memref<1x192xf32, #tpu.memory_space<vmem>>, vector<1x192xf32>
    %82 = vector.broadcast %81 : vector<1x192xf32> to vector<64x192xf32>
    %83 = arith.addf %80, %82 : vector<64x192xf32>
    %84 = vector.extract_strided_slice %76 {offsets = [0, 0, 0, 0], sizes = [1, 8, 8, 32], strides = [1, 1, 1, 1]} : vector<1x14x8x32xf32> to vector<1x8x8x32xf32>
    %85 = vector.shape_cast %84 : vector<1x8x8x32xf32> to vector<64x32xf32>
    %c0_47 = arith.constant 0 : index
    %c0_48 = arith.constant 0 : index
    %c0_49 = arith.constant 0 : index
    %86 = vector.load %arg9[%c0_47, %c0_48, %c0_49] : memref<7x32x192xf32, #tpu.memory_space<vmem>>, vector<1x32x192xf32>
    %87 = vector.shape_cast %86 : vector<1x32x192xf32> to vector<32x192xf32>
    %cst_50 = arith.constant dense<0.000000e+00> : vector<64x192xf32>
    %88 = tpu.matmul %85, %87, %cst_50 {dimension_numbers = #tpu.dot_dimension_numbers<[1], [0], [0], [1], [0, 0, 1, 1], [], []>} : vector<64x32xf32>, vector<32x192xf32>, vector<64x192xf32> -> vector<64x192xf32>
    %89 = arith.addf %83, %88 : vector<64x192xf32>
    %90 = vector.extract_strided_slice %76 {offsets = [0, 1, 0, 0], sizes = [1, 8, 8, 32], strides = [1, 1, 1, 1]} : vector<1x14x8x32xf32> to vector<1x8x8x32xf32>
    %91 = vector.shape_cast %90 : vector<1x8x8x32xf32> to vector<64x32xf32>
    %c1_51 = arith.constant 1 : index
    %c0_52 = arith.constant 0 : index
    %c0_53 = arith.constant 0 : index
    %92 = vector.load %arg9[%c1_51, %c0_52, %c0_53] : memref<7x32x192xf32, #tpu.memory_space<vmem>>, vector<1x32x192xf32>
    %93 = vector.shape_cast %92 : vector<1x32x192xf32> to vector<32x192xf32>
    %cst_54 = arith.constant dense<0.000000e+00> : vector<64x192xf32>
    %94 = tpu.matmul %91, %93, %cst_54 {dimension_numbers = #tpu.dot_dimension_numbers<[1], [0], [0], [1], [0, 0, 1, 1], [], []>} : vector<64x32xf32>, vector<32x192xf32>, vector<64x192xf32> -> vector<64x192xf32>
    %95 = arith.addf %89, %94 : vector<64x192xf32>
    %96 = vector.extract_strided_slice %76 {offsets = [0, 2, 0, 0], sizes = [1, 8, 8, 32], strides = [1, 1, 1, 1]} : vector<1x14x8x32xf32> to vector<1x8x8x32xf32>
    %97 = vector.shape_cast %96 : vector<1x8x8x32xf32> to vector<64x32xf32>
    %c2_55 = arith.constant 2 : index
    %c0_56 = arith.constant 0 : index
    %c0_57 = arith.constant 0 : index
    %98 = vector.load %arg9[%c2_55, %c0_56, %c0_57] : memref<7x32x192xf32, #tpu.memory_space<vmem>>, vector<1x32x192xf32>
    %99 = vector.shape_cast %98 : vector<1x32x192xf32> to vector<32x192xf32>
    %cst_58 = arith.constant dense<0.000000e+00> : vector<64x192xf32>
    %100 = tpu.matmul %97, %99, %cst_58 {dimension_numbers = #tpu.dot_dimension_numbers<[1], [0], [0], [1], [0, 0, 1, 1], [], []>} : vector<64x32xf32>, vector<32x192xf32>, vector<64x192xf32> -> vector<64x192xf32>
    %101 = arith.addf %95, %100 : vector<64x192xf32>
    %102 = vector.extract_strided_slice %76 {offsets = [0, 4, 0, 0], sizes = [1, 8, 8, 32], strides = [1, 1, 1, 1]} : vector<1x14x8x32xf32> to vector<1x8x8x32xf32>
    %103 = vector.shape_cast %102 : vector<1x8x8x32xf32> to vector<64x32xf32>
    %c4_59 = arith.constant 4 : index
    %c0_60 = arith.constant 0 : index
    %c0_61 = arith.constant 0 : index
    %104 = vector.load %arg9[%c4_59, %c0_60, %c0_61] : memref<7x32x192xf32, #tpu.memory_space<vmem>>, vector<1x32x192xf32>
    %105 = vector.shape_cast %104 : vector<1x32x192xf32> to vector<32x192xf32>
    %cst_62 = arith.constant dense<0.000000e+00> : vector<64x192xf32>
    %106 = tpu.matmul %103, %105, %cst_62 {dimension_numbers = #tpu.dot_dimension_numbers<[1], [0], [0], [1], [0, 0, 1, 1], [], []>} : vector<64x32xf32>, vector<32x192xf32>, vector<64x192xf32> -> vector<64x192xf32>
    %107 = arith.addf %101, %106 : vector<64x192xf32>
    %108 = vector.extract_strided_slice %76 {offsets = [0, 5, 0, 0], sizes = [1, 8, 8, 32], strides = [1, 1, 1, 1]} : vector<1x14x8x32xf32> to vector<1x8x8x32xf32>
    %109 = vector.shape_cast %108 : vector<1x8x8x32xf32> to vector<64x32xf32>
    %c5_63 = arith.constant 5 : index
    %c0_64 = arith.constant 0 : index
    %c0_65 = arith.constant 0 : index
    %110 = vector.load %arg9[%c5_63, %c0_64, %c0_65] : memref<7x32x192xf32, #tpu.memory_space<vmem>>, vector<1x32x192xf32>
    %111 = vector.shape_cast %110 : vector<1x32x192xf32> to vector<32x192xf32>
    %cst_66 = arith.constant dense<0.000000e+00> : vector<64x192xf32>
    %112 = tpu.matmul %109, %111, %cst_66 {dimension_numbers = #tpu.dot_dimension_numbers<[1], [0], [0], [1], [0, 0, 1, 1], [], []>} : vector<64x32xf32>, vector<32x192xf32>, vector<64x192xf32> -> vector<64x192xf32>
    %113 = arith.addf %107, %112 : vector<64x192xf32>
    %114 = vector.extract_strided_slice %76 {offsets = [0, 6, 0, 0], sizes = [1, 8, 8, 32], strides = [1, 1, 1, 1]} : vector<1x14x8x32xf32> to vector<1x8x8x32xf32>
    %115 = vector.shape_cast %114 : vector<1x8x8x32xf32> to vector<64x32xf32>
    %c6_67 = arith.constant 6 : index
    %c0_68 = arith.constant 0 : index
    %c0_69 = arith.constant 0 : index
    %116 = vector.load %arg9[%c6_67, %c0_68, %c0_69] : memref<7x32x192xf32, #tpu.memory_space<vmem>>, vector<1x32x192xf32>
    %117 = vector.shape_cast %116 : vector<1x32x192xf32> to vector<32x192xf32>
    %cst_70 = arith.constant dense<0.000000e+00> : vector<64x192xf32>
    %118 = tpu.matmul %115, %117, %cst_70 {dimension_numbers = #tpu.dot_dimension_numbers<[1], [0], [0], [1], [0, 0, 1, 1], [], []>} : vector<64x32xf32>, vector<32x192xf32>, vector<64x192xf32> -> vector<64x192xf32>
    %119 = arith.addf %113, %118 : vector<64x192xf32>
    %cst_71 = arith.constant 0.000000e+00 : f32
    %120 = vector.broadcast %cst_71 : f32 to vector<64x192xf32>
    %121 = arith.maximumf %119, %120 : vector<64x192xf32>
    %122 = vector.shape_cast %121 : vector<64x192xf32> to vector<1x8x8x192xf32>
    %cst_72 = arith.constant 0.000000e+00 : f32
    %123 = vector.broadcast %cst_72 : f32 to vector<1x3x8x32xf32>
    %124 = tpu.concatenate %123, %25, %123 in 1 : vector<1x3x8x32xf32>, vector<1x8x8x32xf32>, vector<1x3x8x32xf32> -> vector<1x14x8x32xf32>
    %125 = vector.shape_cast %25 : vector<1x8x8x32xf32> to vector<64x32xf32>
    %c3_73 = arith.constant 3 : index
    %c0_74 = arith.constant 0 : index
    %c0_75 = arith.constant 0 : index
    %126 = vector.load %arg11[%c3_73, %c0_74, %c0_75] : memref<7x32x32xf32, #tpu.memory_space<vmem>>, vector<1x32x32xf32>
    %127 = vector.shape_cast %126 : vector<1x32x32xf32> to vector<32x32xf32>
    %cst_76 = arith.constant dense<0.000000e+00> : vector<64x32xf32>
    %128 = tpu.matmul %125, %127, %cst_76 {dimension_numbers = #tpu.dot_dimension_numbers<[1], [0], [0], [1], [0, 0, 1, 1], [], []>} : vector<64x32xf32>, vector<32x32xf32>, vector<64x32xf32> -> vector<64x32xf32>
    %c0_77 = arith.constant 0 : index
    %c0_78 = arith.constant 0 : index
    %129 = vector.load %arg12[%c0_77, %c0_78] : memref<1x32xf32, #tpu.memory_space<vmem>>, vector<1x32xf32>
    %130 = vector.broadcast %129 : vector<1x32xf32> to vector<64x32xf32>
    %131 = arith.addf %128, %130 : vector<64x32xf32>
    %132 = vector.extract_strided_slice %124 {offsets = [0, 0, 0, 0], sizes = [1, 8, 8, 32], strides = [1, 1, 1, 1]} : vector<1x14x8x32xf32> to vector<1x8x8x32xf32>
    %133 = vector.shape_cast %132 : vector<1x8x8x32xf32> to vector<64x32xf32>
    %c0_79 = arith.constant 0 : index
    %c0_80 = arith.constant 0 : index
    %c0_81 = arith.constant 0 : index
    %134 = vector.load %arg11[%c0_79, %c0_80, %c0_81] : memref<7x32x32xf32, #tpu.memory_space<vmem>>, vector<1x32x32xf32>
    %135 = vector.shape_cast %134 : vector<1x32x32xf32> to vector<32x32xf32>
    %cst_82 = arith.constant dense<0.000000e+00> : vector<64x32xf32>
    %136 = tpu.matmul %133, %135, %cst_82 {dimension_numbers = #tpu.dot_dimension_numbers<[1], [0], [0], [1], [0, 0, 1, 1], [], []>} : vector<64x32xf32>, vector<32x32xf32>, vector<64x32xf32> -> vector<64x32xf32>
    %137 = arith.addf %131, %136 : vector<64x32xf32>
    %138 = vector.extract_strided_slice %124 {offsets = [0, 1, 0, 0], sizes = [1, 8, 8, 32], strides = [1, 1, 1, 1]} : vector<1x14x8x32xf32> to vector<1x8x8x32xf32>
    %139 = vector.shape_cast %138 : vector<1x8x8x32xf32> to vector<64x32xf32>
    %c1_83 = arith.constant 1 : index
    %c0_84 = arith.constant 0 : index
    %c0_85 = arith.constant 0 : index
    %140 = vector.load %arg11[%c1_83, %c0_84, %c0_85] : memref<7x32x32xf32, #tpu.memory_space<vmem>>, vector<1x32x32xf32>
    %141 = vector.shape_cast %140 : vector<1x32x32xf32> to vector<32x32xf32>
    %cst_86 = arith.constant dense<0.000000e+00> : vector<64x32xf32>
    %142 = tpu.matmul %139, %141, %cst_86 {dimension_numbers = #tpu.dot_dimension_numbers<[1], [0], [0], [1], [0, 0, 1, 1], [], []>} : vector<64x32xf32>, vector<32x32xf32>, vector<64x32xf32> -> vector<64x32xf32>
    %143 = arith.addf %137, %142 : vector<64x32xf32>
    %144 = vector.extract_strided_slice %124 {offsets = [0, 2, 0, 0], sizes = [1, 8, 8, 32], strides = [1, 1, 1, 1]} : vector<1x14x8x32xf32> to vector<1x8x8x32xf32>
    %145 = vector.shape_cast %144 : vector<1x8x8x32xf32> to vector<64x32xf32>
    %c2_87 = arith.constant 2 : index
    %c0_88 = arith.constant 0 : index
    %c0_89 = arith.constant 0 : index
    %146 = vector.load %arg11[%c2_87, %c0_88, %c0_89] : memref<7x32x32xf32, #tpu.memory_space<vmem>>, vector<1x32x32xf32>
    %147 = vector.shape_cast %146 : vector<1x32x32xf32> to vector<32x32xf32>
    %cst_90 = arith.constant dense<0.000000e+00> : vector<64x32xf32>
    %148 = tpu.matmul %145, %147, %cst_90 {dimension_numbers = #tpu.dot_dimension_numbers<[1], [0], [0], [1], [0, 0, 1, 1], [], []>} : vector<64x32xf32>, vector<32x32xf32>, vector<64x32xf32> -> vector<64x32xf32>
    %149 = arith.addf %143, %148 : vector<64x32xf32>
    %150 = vector.extract_strided_slice %124 {offsets = [0, 4, 0, 0], sizes = [1, 8, 8, 32], strides = [1, 1, 1, 1]} : vector<1x14x8x32xf32> to vector<1x8x8x32xf32>
    %151 = vector.shape_cast %150 : vector<1x8x8x32xf32> to vector<64x32xf32>
    %c4_91 = arith.constant 4 : index
    %c0_92 = arith.constant 0 : index
    %c0_93 = arith.constant 0 : index
    %152 = vector.load %arg11[%c4_91, %c0_92, %c0_93] : memref<7x32x32xf32, #tpu.memory_space<vmem>>, vector<1x32x32xf32>
    %153 = vector.shape_cast %152 : vector<1x32x32xf32> to vector<32x32xf32>
    %cst_94 = arith.constant dense<0.000000e+00> : vector<64x32xf32>
    %154 = tpu.matmul %151, %153, %cst_94 {dimension_numbers = #tpu.dot_dimension_numbers<[1], [0], [0], [1], [0, 0, 1, 1], [], []>} : vector<64x32xf32>, vector<32x32xf32>, vector<64x32xf32> -> vector<64x32xf32>
    %155 = arith.addf %149, %154 : vector<64x32xf32>
    %156 = vector.extract_strided_slice %124 {offsets = [0, 5, 0, 0], sizes = [1, 8, 8, 32], strides = [1, 1, 1, 1]} : vector<1x14x8x32xf32> to vector<1x8x8x32xf32>
    %157 = vector.shape_cast %156 : vector<1x8x8x32xf32> to vector<64x32xf32>
    %c5_95 = arith.constant 5 : index
    %c0_96 = arith.constant 0 : index
    %c0_97 = arith.constant 0 : index
    %158 = vector.load %arg11[%c5_95, %c0_96, %c0_97] : memref<7x32x32xf32, #tpu.memory_space<vmem>>, vector<1x32x32xf32>
    %159 = vector.shape_cast %158 : vector<1x32x32xf32> to vector<32x32xf32>
    %cst_98 = arith.constant dense<0.000000e+00> : vector<64x32xf32>
    %160 = tpu.matmul %157, %159, %cst_98 {dimension_numbers = #tpu.dot_dimension_numbers<[1], [0], [0], [1], [0, 0, 1, 1], [], []>} : vector<64x32xf32>, vector<32x32xf32>, vector<64x32xf32> -> vector<64x32xf32>
    %161 = arith.addf %155, %160 : vector<64x32xf32>
    %162 = vector.extract_strided_slice %124 {offsets = [0, 6, 0, 0], sizes = [1, 8, 8, 32], strides = [1, 1, 1, 1]} : vector<1x14x8x32xf32> to vector<1x8x8x32xf32>
    %163 = vector.shape_cast %162 : vector<1x8x8x32xf32> to vector<64x32xf32>
    %c6_99 = arith.constant 6 : index
    %c0_100 = arith.constant 0 : index
    %c0_101 = arith.constant 0 : index
    %164 = vector.load %arg11[%c6_99, %c0_100, %c0_101] : memref<7x32x32xf32, #tpu.memory_space<vmem>>, vector<1x32x32xf32>
    %165 = vector.shape_cast %164 : vector<1x32x32xf32> to vector<32x32xf32>
    %cst_102 = arith.constant dense<0.000000e+00> : vector<64x32xf32>
    %166 = tpu.matmul %163, %165, %cst_102 {dimension_numbers = #tpu.dot_dimension_numbers<[1], [0], [0], [1], [0, 0, 1, 1], [], []>} : vector<64x32xf32>, vector<32x32xf32>, vector<64x32xf32> -> vector<64x32xf32>
    %167 = arith.addf %161, %166 : vector<64x32xf32>
    %cst_103 = arith.constant 0.000000e+00 : f32
    %168 = vector.broadcast %cst_103 : f32 to vector<64x32xf32>
    %169 = arith.maximumf %167, %168 : vector<64x32xf32>
    %170 = vector.shape_cast %169 : vector<64x32xf32> to vector<1x8x8x32xf32>
    %cst_104 = arith.constant 0.000000e+00 : f32
    %171 = vector.broadcast %cst_104 : f32 to vector<1x8x3x32xf32>
    %172 = tpu.concatenate %171, %170, %171 in 2 : vector<1x8x3x32xf32>, vector<1x8x8x32xf32>, vector<1x8x3x32xf32> -> vector<1x8x14x32xf32>
    %173 = vector.shape_cast %170 : vector<1x8x8x32xf32> to vector<64x32xf32>
    %c3_105 = arith.constant 3 : index
    %c0_106 = arith.constant 0 : index
    %c0_107 = arith.constant 0 : index
    %174 = vector.load %arg13[%c3_105, %c0_106, %c0_107] : memref<7x32x32xf32, #tpu.memory_space<vmem>>, vector<1x32x32xf32>
    %175 = vector.shape_cast %174 : vector<1x32x32xf32> to vector<32x32xf32>
    %cst_108 = arith.constant dense<0.000000e+00> : vector<64x32xf32>
    %176 = tpu.matmul %173, %175, %cst_108 {dimension_numbers = #tpu.dot_dimension_numbers<[1], [0], [0], [1], [0, 0, 1, 1], [], []>} : vector<64x32xf32>, vector<32x32xf32>, vector<64x32xf32> -> vector<64x32xf32>
    %c0_109 = arith.constant 0 : index
    %c0_110 = arith.constant 0 : index
    %177 = vector.load %arg14[%c0_109, %c0_110] : memref<1x32xf32, #tpu.memory_space<vmem>>, vector<1x32xf32>
    %178 = vector.broadcast %177 : vector<1x32xf32> to vector<64x32xf32>
    %179 = arith.addf %176, %178 : vector<64x32xf32>
    %180 = vector.extract_strided_slice %172 {offsets = [0, 0, 0, 0], sizes = [1, 8, 8, 32], strides = [1, 1, 1, 1]} : vector<1x8x14x32xf32> to vector<1x8x8x32xf32>
    %181 = vector.shape_cast %180 : vector<1x8x8x32xf32> to vector<64x32xf32>
    %c0_111 = arith.constant 0 : index
    %c0_112 = arith.constant 0 : index
    %c0_113 = arith.constant 0 : index
    %182 = vector.load %arg13[%c0_111, %c0_112, %c0_113] : memref<7x32x32xf32, #tpu.memory_space<vmem>>, vector<1x32x32xf32>
    %183 = vector.shape_cast %182 : vector<1x32x32xf32> to vector<32x32xf32>
    %cst_114 = arith.constant dense<0.000000e+00> : vector<64x32xf32>
    %184 = tpu.matmul %181, %183, %cst_114 {dimension_numbers = #tpu.dot_dimension_numbers<[1], [0], [0], [1], [0, 0, 1, 1], [], []>} : vector<64x32xf32>, vector<32x32xf32>, vector<64x32xf32> -> vector<64x32xf32>
    %185 = arith.addf %179, %184 : vector<64x32xf32>
    %186 = vector.extract_strided_slice %172 {offsets = [0, 0, 1, 0], sizes = [1, 8, 8, 32], strides = [1, 1, 1, 1]} : vector<1x8x14x32xf32> to vector<1x8x8x32xf32>
    %187 = vector.shape_cast %186 : vector<1x8x8x32xf32> to vector<64x32xf32>
    %c1_115 = arith.constant 1 : index
    %c0_116 = arith.constant 0 : index
    %c0_117 = arith.constant 0 : index
    %188 = vector.load %arg13[%c1_115, %c0_116, %c0_117] : memref<7x32x32xf32, #tpu.memory_space<vmem>>, vector<1x32x32xf32>
    %189 = vector.shape_cast %188 : vector<1x32x32xf32> to vector<32x32xf32>
    %cst_118 = arith.constant dense<0.000000e+00> : vector<64x32xf32>
    %190 = tpu.matmul %187, %189, %cst_118 {dimension_numbers = #tpu.dot_dimension_numbers<[1], [0], [0], [1], [0, 0, 1, 1], [], []>} : vector<64x32xf32>, vector<32x32xf32>, vector<64x32xf32> -> vector<64x32xf32>
    %191 = arith.addf %185, %190 : vector<64x32xf32>
    %192 = vector.extract_strided_slice %172 {offsets = [0, 0, 2, 0], sizes = [1, 8, 8, 32], strides = [1, 1, 1, 1]} : vector<1x8x14x32xf32> to vector<1x8x8x32xf32>
    %193 = vector.shape_cast %192 : vector<1x8x8x32xf32> to vector<64x32xf32>
    %c2_119 = arith.constant 2 : index
    %c0_120 = arith.constant 0 : index
    %c0_121 = arith.constant 0 : index
    %194 = vector.load %arg13[%c2_119, %c0_120, %c0_121] : memref<7x32x32xf32, #tpu.memory_space<vmem>>, vector<1x32x32xf32>
    %195 = vector.shape_cast %194 : vector<1x32x32xf32> to vector<32x32xf32>
    %cst_122 = arith.constant dense<0.000000e+00> : vector<64x32xf32>
    %196 = tpu.matmul %193, %195, %cst_122 {dimension_numbers = #tpu.dot_dimension_numbers<[1], [0], [0], [1], [0, 0, 1, 1], [], []>} : vector<64x32xf32>, vector<32x32xf32>, vector<64x32xf32> -> vector<64x32xf32>
    %197 = arith.addf %191, %196 : vector<64x32xf32>
    %198 = vector.extract_strided_slice %172 {offsets = [0, 0, 4, 0], sizes = [1, 8, 8, 32], strides = [1, 1, 1, 1]} : vector<1x8x14x32xf32> to vector<1x8x8x32xf32>
    %199 = vector.shape_cast %198 : vector<1x8x8x32xf32> to vector<64x32xf32>
    %c4_123 = arith.constant 4 : index
    %c0_124 = arith.constant 0 : index
    %c0_125 = arith.constant 0 : index
    %200 = vector.load %arg13[%c4_123, %c0_124, %c0_125] : memref<7x32x32xf32, #tpu.memory_space<vmem>>, vector<1x32x32xf32>
    %201 = vector.shape_cast %200 : vector<1x32x32xf32> to vector<32x32xf32>
    %cst_126 = arith.constant dense<0.000000e+00> : vector<64x32xf32>
    %202 = tpu.matmul %199, %201, %cst_126 {dimension_numbers = #tpu.dot_dimension_numbers<[1], [0], [0], [1], [0, 0, 1, 1], [], []>} : vector<64x32xf32>, vector<32x32xf32>, vector<64x32xf32> -> vector<64x32xf32>
    %203 = arith.addf %197, %202 : vector<64x32xf32>
    %204 = vector.extract_strided_slice %172 {offsets = [0, 0, 5, 0], sizes = [1, 8, 8, 32], strides = [1, 1, 1, 1]} : vector<1x8x14x32xf32> to vector<1x8x8x32xf32>
    %205 = vector.shape_cast %204 : vector<1x8x8x32xf32> to vector<64x32xf32>
    %c5_127 = arith.constant 5 : index
    %c0_128 = arith.constant 0 : index
    %c0_129 = arith.constant 0 : index
    %206 = vector.load %arg13[%c5_127, %c0_128, %c0_129] : memref<7x32x32xf32, #tpu.memory_space<vmem>>, vector<1x32x32xf32>
    %207 = vector.shape_cast %206 : vector<1x32x32xf32> to vector<32x32xf32>
    %cst_130 = arith.constant dense<0.000000e+00> : vector<64x32xf32>
    %208 = tpu.matmul %205, %207, %cst_130 {dimension_numbers = #tpu.dot_dimension_numbers<[1], [0], [0], [1], [0, 0, 1, 1], [], []>} : vector<64x32xf32>, vector<32x32xf32>, vector<64x32xf32> -> vector<64x32xf32>
    %209 = arith.addf %203, %208 : vector<64x32xf32>
    %210 = vector.extract_strided_slice %172 {offsets = [0, 0, 6, 0], sizes = [1, 8, 8, 32], strides = [1, 1, 1, 1]} : vector<1x8x14x32xf32> to vector<1x8x8x32xf32>
    %211 = vector.shape_cast %210 : vector<1x8x8x32xf32> to vector<64x32xf32>
    %c6_131 = arith.constant 6 : index
    %c0_132 = arith.constant 0 : index
    %c0_133 = arith.constant 0 : index
    %212 = vector.load %arg13[%c6_131, %c0_132, %c0_133] : memref<7x32x32xf32, #tpu.memory_space<vmem>>, vector<1x32x32xf32>
    %213 = vector.shape_cast %212 : vector<1x32x32xf32> to vector<32x32xf32>
    %cst_134 = arith.constant dense<0.000000e+00> : vector<64x32xf32>
    %214 = tpu.matmul %211, %213, %cst_134 {dimension_numbers = #tpu.dot_dimension_numbers<[1], [0], [0], [1], [0, 0, 1, 1], [], []>} : vector<64x32xf32>, vector<32x32xf32>, vector<64x32xf32> -> vector<64x32xf32>
    %215 = arith.addf %209, %214 : vector<64x32xf32>
    %cst_135 = arith.constant 0.000000e+00 : f32
    %216 = vector.broadcast %cst_135 : f32 to vector<64x32xf32>
    %217 = arith.maximumf %215, %216 : vector<64x32xf32>
    %218 = vector.shape_cast %217 : vector<64x32xf32> to vector<1x8x8x32xf32>
    %cst_136 = arith.constant 0.000000e+00 : f32
    %219 = vector.broadcast %cst_136 : f32 to vector<1x3x8x32xf32>
    %220 = tpu.concatenate %219, %218, %219 in 1 : vector<1x3x8x32xf32>, vector<1x8x8x32xf32>, vector<1x3x8x32xf32> -> vector<1x14x8x32xf32>
    %221 = vector.shape_cast %218 : vector<1x8x8x32xf32> to vector<64x32xf32>
    %c3_137 = arith.constant 3 : index
    %c0_138 = arith.constant 0 : index
    %c0_139 = arith.constant 0 : index
    %222 = vector.load %arg15[%c3_137, %c0_138, %c0_139] : memref<7x32x32xf32, #tpu.memory_space<vmem>>, vector<1x32x32xf32>
    %223 = vector.shape_cast %222 : vector<1x32x32xf32> to vector<32x32xf32>
    %cst_140 = arith.constant dense<0.000000e+00> : vector<64x32xf32>
    %224 = tpu.matmul %221, %223, %cst_140 {dimension_numbers = #tpu.dot_dimension_numbers<[1], [0], [0], [1], [0, 0, 1, 1], [], []>} : vector<64x32xf32>, vector<32x32xf32>, vector<64x32xf32> -> vector<64x32xf32>
    %c0_141 = arith.constant 0 : index
    %c0_142 = arith.constant 0 : index
    %225 = vector.load %arg16[%c0_141, %c0_142] : memref<1x32xf32, #tpu.memory_space<vmem>>, vector<1x32xf32>
    %226 = vector.broadcast %225 : vector<1x32xf32> to vector<64x32xf32>
    %227 = arith.addf %224, %226 : vector<64x32xf32>
    %228 = vector.extract_strided_slice %220 {offsets = [0, 0, 0, 0], sizes = [1, 8, 8, 32], strides = [1, 1, 1, 1]} : vector<1x14x8x32xf32> to vector<1x8x8x32xf32>
    %229 = vector.shape_cast %228 : vector<1x8x8x32xf32> to vector<64x32xf32>
    %c0_143 = arith.constant 0 : index
    %c0_144 = arith.constant 0 : index
    %c0_145 = arith.constant 0 : index
    %230 = vector.load %arg15[%c0_143, %c0_144, %c0_145] : memref<7x32x32xf32, #tpu.memory_space<vmem>>, vector<1x32x32xf32>
    %231 = vector.shape_cast %230 : vector<1x32x32xf32> to vector<32x32xf32>
    %cst_146 = arith.constant dense<0.000000e+00> : vector<64x32xf32>
    %232 = tpu.matmul %229, %231, %cst_146 {dimension_numbers = #tpu.dot_dimension_numbers<[1], [0], [0], [1], [0, 0, 1, 1], [], []>} : vector<64x32xf32>, vector<32x32xf32>, vector<64x32xf32> -> vector<64x32xf32>
    %233 = arith.addf %227, %232 : vector<64x32xf32>
    %234 = vector.extract_strided_slice %220 {offsets = [0, 1, 0, 0], sizes = [1, 8, 8, 32], strides = [1, 1, 1, 1]} : vector<1x14x8x32xf32> to vector<1x8x8x32xf32>
    %235 = vector.shape_cast %234 : vector<1x8x8x32xf32> to vector<64x32xf32>
    %c1_147 = arith.constant 1 : index
    %c0_148 = arith.constant 0 : index
    %c0_149 = arith.constant 0 : index
    %236 = vector.load %arg15[%c1_147, %c0_148, %c0_149] : memref<7x32x32xf32, #tpu.memory_space<vmem>>, vector<1x32x32xf32>
    %237 = vector.shape_cast %236 : vector<1x32x32xf32> to vector<32x32xf32>
    %cst_150 = arith.constant dense<0.000000e+00> : vector<64x32xf32>
    %238 = tpu.matmul %235, %237, %cst_150 {dimension_numbers = #tpu.dot_dimension_numbers<[1], [0], [0], [1], [0, 0, 1, 1], [], []>} : vector<64x32xf32>, vector<32x32xf32>, vector<64x32xf32> -> vector<64x32xf32>
    %239 = arith.addf %233, %238 : vector<64x32xf32>
    %240 = vector.extract_strided_slice %220 {offsets = [0, 2, 0, 0], sizes = [1, 8, 8, 32], strides = [1, 1, 1, 1]} : vector<1x14x8x32xf32> to vector<1x8x8x32xf32>
    %241 = vector.shape_cast %240 : vector<1x8x8x32xf32> to vector<64x32xf32>
    %c2_151 = arith.constant 2 : index
    %c0_152 = arith.constant 0 : index
    %c0_153 = arith.constant 0 : index
    %242 = vector.load %arg15[%c2_151, %c0_152, %c0_153] : memref<7x32x32xf32, #tpu.memory_space<vmem>>, vector<1x32x32xf32>
    %243 = vector.shape_cast %242 : vector<1x32x32xf32> to vector<32x32xf32>
    %cst_154 = arith.constant dense<0.000000e+00> : vector<64x32xf32>
    %244 = tpu.matmul %241, %243, %cst_154 {dimension_numbers = #tpu.dot_dimension_numbers<[1], [0], [0], [1], [0, 0, 1, 1], [], []>} : vector<64x32xf32>, vector<32x32xf32>, vector<64x32xf32> -> vector<64x32xf32>
    %245 = arith.addf %239, %244 : vector<64x32xf32>
    %246 = vector.extract_strided_slice %220 {offsets = [0, 4, 0, 0], sizes = [1, 8, 8, 32], strides = [1, 1, 1, 1]} : vector<1x14x8x32xf32> to vector<1x8x8x32xf32>
    %247 = vector.shape_cast %246 : vector<1x8x8x32xf32> to vector<64x32xf32>
    %c4_155 = arith.constant 4 : index
    %c0_156 = arith.constant 0 : index
    %c0_157 = arith.constant 0 : index
    %248 = vector.load %arg15[%c4_155, %c0_156, %c0_157] : memref<7x32x32xf32, #tpu.memory_space<vmem>>, vector<1x32x32xf32>
    %249 = vector.shape_cast %248 : vector<1x32x32xf32> to vector<32x32xf32>
    %cst_158 = arith.constant dense<0.000000e+00> : vector<64x32xf32>
    %250 = tpu.matmul %247, %249, %cst_158 {dimension_numbers = #tpu.dot_dimension_numbers<[1], [0], [0], [1], [0, 0, 1, 1], [], []>} : vector<64x32xf32>, vector<32x32xf32>, vector<64x32xf32> -> vector<64x32xf32>
    %251 = arith.addf %245, %250 : vector<64x32xf32>
    %252 = vector.extract_strided_slice %220 {offsets = [0, 5, 0, 0], sizes = [1, 8, 8, 32], strides = [1, 1, 1, 1]} : vector<1x14x8x32xf32> to vector<1x8x8x32xf32>
    %253 = vector.shape_cast %252 : vector<1x8x8x32xf32> to vector<64x32xf32>
    %c5_159 = arith.constant 5 : index
    %c0_160 = arith.constant 0 : index
    %c0_161 = arith.constant 0 : index
    %254 = vector.load %arg15[%c5_159, %c0_160, %c0_161] : memref<7x32x32xf32, #tpu.memory_space<vmem>>, vector<1x32x32xf32>
    %255 = vector.shape_cast %254 : vector<1x32x32xf32> to vector<32x32xf32>
    %cst_162 = arith.constant dense<0.000000e+00> : vector<64x32xf32>
    %256 = tpu.matmul %253, %255, %cst_162 {dimension_numbers = #tpu.dot_dimension_numbers<[1], [0], [0], [1], [0, 0, 1, 1], [], []>} : vector<64x32xf32>, vector<32x32xf32>, vector<64x32xf32> -> vector<64x32xf32>
    %257 = arith.addf %251, %256 : vector<64x32xf32>
    %258 = vector.extract_strided_slice %220 {offsets = [0, 6, 0, 0], sizes = [1, 8, 8, 32], strides = [1, 1, 1, 1]} : vector<1x14x8x32xf32> to vector<1x8x8x32xf32>
    %259 = vector.shape_cast %258 : vector<1x8x8x32xf32> to vector<64x32xf32>
    %c6_163 = arith.constant 6 : index
    %c0_164 = arith.constant 0 : index
    %c0_165 = arith.constant 0 : index
    %260 = vector.load %arg15[%c6_163, %c0_164, %c0_165] : memref<7x32x32xf32, #tpu.memory_space<vmem>>, vector<1x32x32xf32>
    %261 = vector.shape_cast %260 : vector<1x32x32xf32> to vector<32x32xf32>
    %cst_166 = arith.constant dense<0.000000e+00> : vector<64x32xf32>
    %262 = tpu.matmul %259, %261, %cst_166 {dimension_numbers = #tpu.dot_dimension_numbers<[1], [0], [0], [1], [0, 0, 1, 1], [], []>} : vector<64x32xf32>, vector<32x32xf32>, vector<64x32xf32> -> vector<64x32xf32>
    %263 = arith.addf %257, %262 : vector<64x32xf32>
    %cst_167 = arith.constant 0.000000e+00 : f32
    %264 = vector.broadcast %cst_167 : f32 to vector<64x32xf32>
    %265 = arith.maximumf %263, %264 : vector<64x32xf32>
    %266 = vector.shape_cast %265 : vector<64x32xf32> to vector<1x8x8x32xf32>
    %cst_168 = arith.constant 0.000000e+00 : f32
    %267 = vector.broadcast %cst_168 : f32 to vector<1x8x3x32xf32>
    %268 = tpu.concatenate %267, %266, %267 in 2 : vector<1x8x3x32xf32>, vector<1x8x8x32xf32>, vector<1x8x3x32xf32> -> vector<1x8x14x32xf32>
    %269 = vector.shape_cast %266 : vector<1x8x8x32xf32> to vector<64x32xf32>
    %c3_169 = arith.constant 3 : index
    %c0_170 = arith.constant 0 : index
    %c0_171 = arith.constant 0 : index
    %270 = vector.load %arg17[%c3_169, %c0_170, %c0_171] : memref<7x32x192xf32, #tpu.memory_space<vmem>>, vector<1x32x192xf32>
    %271 = vector.shape_cast %270 : vector<1x32x192xf32> to vector<32x192xf32>
    %cst_172 = arith.constant dense<0.000000e+00> : vector<64x192xf32>
    %272 = tpu.matmul %269, %271, %cst_172 {dimension_numbers = #tpu.dot_dimension_numbers<[1], [0], [0], [1], [0, 0, 1, 1], [], []>} : vector<64x32xf32>, vector<32x192xf32>, vector<64x192xf32> -> vector<64x192xf32>
    %c0_173 = arith.constant 0 : index
    %c0_174 = arith.constant 0 : index
    %273 = vector.load %arg18[%c0_173, %c0_174] : memref<1x192xf32, #tpu.memory_space<vmem>>, vector<1x192xf32>
    %274 = vector.broadcast %273 : vector<1x192xf32> to vector<64x192xf32>
    %275 = arith.addf %272, %274 : vector<64x192xf32>
    %276 = vector.extract_strided_slice %268 {offsets = [0, 0, 0, 0], sizes = [1, 8, 8, 32], strides = [1, 1, 1, 1]} : vector<1x8x14x32xf32> to vector<1x8x8x32xf32>
    %277 = vector.shape_cast %276 : vector<1x8x8x32xf32> to vector<64x32xf32>
    %c0_175 = arith.constant 0 : index
    %c0_176 = arith.constant 0 : index
    %c0_177 = arith.constant 0 : index
    %278 = vector.load %arg17[%c0_175, %c0_176, %c0_177] : memref<7x32x192xf32, #tpu.memory_space<vmem>>, vector<1x32x192xf32>
    %279 = vector.shape_cast %278 : vector<1x32x192xf32> to vector<32x192xf32>
    %cst_178 = arith.constant dense<0.000000e+00> : vector<64x192xf32>
    %280 = tpu.matmul %277, %279, %cst_178 {dimension_numbers = #tpu.dot_dimension_numbers<[1], [0], [0], [1], [0, 0, 1, 1], [], []>} : vector<64x32xf32>, vector<32x192xf32>, vector<64x192xf32> -> vector<64x192xf32>
    %281 = arith.addf %275, %280 : vector<64x192xf32>
    %282 = vector.extract_strided_slice %268 {offsets = [0, 0, 1, 0], sizes = [1, 8, 8, 32], strides = [1, 1, 1, 1]} : vector<1x8x14x32xf32> to vector<1x8x8x32xf32>
    %283 = vector.shape_cast %282 : vector<1x8x8x32xf32> to vector<64x32xf32>
    %c1_179 = arith.constant 1 : index
    %c0_180 = arith.constant 0 : index
    %c0_181 = arith.constant 0 : index
    %284 = vector.load %arg17[%c1_179, %c0_180, %c0_181] : memref<7x32x192xf32, #tpu.memory_space<vmem>>, vector<1x32x192xf32>
    %285 = vector.shape_cast %284 : vector<1x32x192xf32> to vector<32x192xf32>
    %cst_182 = arith.constant dense<0.000000e+00> : vector<64x192xf32>
    %286 = tpu.matmul %283, %285, %cst_182 {dimension_numbers = #tpu.dot_dimension_numbers<[1], [0], [0], [1], [0, 0, 1, 1], [], []>} : vector<64x32xf32>, vector<32x192xf32>, vector<64x192xf32> -> vector<64x192xf32>
    %287 = arith.addf %281, %286 : vector<64x192xf32>
    %288 = vector.extract_strided_slice %268 {offsets = [0, 0, 2, 0], sizes = [1, 8, 8, 32], strides = [1, 1, 1, 1]} : vector<1x8x14x32xf32> to vector<1x8x8x32xf32>
    %289 = vector.shape_cast %288 : vector<1x8x8x32xf32> to vector<64x32xf32>
    %c2_183 = arith.constant 2 : index
    %c0_184 = arith.constant 0 : index
    %c0_185 = arith.constant 0 : index
    %290 = vector.load %arg17[%c2_183, %c0_184, %c0_185] : memref<7x32x192xf32, #tpu.memory_space<vmem>>, vector<1x32x192xf32>
    %291 = vector.shape_cast %290 : vector<1x32x192xf32> to vector<32x192xf32>
    %cst_186 = arith.constant dense<0.000000e+00> : vector<64x192xf32>
    %292 = tpu.matmul %289, %291, %cst_186 {dimension_numbers = #tpu.dot_dimension_numbers<[1], [0], [0], [1], [0, 0, 1, 1], [], []>} : vector<64x32xf32>, vector<32x192xf32>, vector<64x192xf32> -> vector<64x192xf32>
    %293 = arith.addf %287, %292 : vector<64x192xf32>
    %294 = vector.extract_strided_slice %268 {offsets = [0, 0, 4, 0], sizes = [1, 8, 8, 32], strides = [1, 1, 1, 1]} : vector<1x8x14x32xf32> to vector<1x8x8x32xf32>
    %295 = vector.shape_cast %294 : vector<1x8x8x32xf32> to vector<64x32xf32>
    %c4_187 = arith.constant 4 : index
    %c0_188 = arith.constant 0 : index
    %c0_189 = arith.constant 0 : index
    %296 = vector.load %arg17[%c4_187, %c0_188, %c0_189] : memref<7x32x192xf32, #tpu.memory_space<vmem>>, vector<1x32x192xf32>
    %297 = vector.shape_cast %296 : vector<1x32x192xf32> to vector<32x192xf32>
    %cst_190 = arith.constant dense<0.000000e+00> : vector<64x192xf32>
    %298 = tpu.matmul %295, %297, %cst_190 {dimension_numbers = #tpu.dot_dimension_numbers<[1], [0], [0], [1], [0, 0, 1, 1], [], []>} : vector<64x32xf32>, vector<32x192xf32>, vector<64x192xf32> -> vector<64x192xf32>
    %299 = arith.addf %293, %298 : vector<64x192xf32>
    %300 = vector.extract_strided_slice %268 {offsets = [0, 0, 5, 0], sizes = [1, 8, 8, 32], strides = [1, 1, 1, 1]} : vector<1x8x14x32xf32> to vector<1x8x8x32xf32>
    %301 = vector.shape_cast %300 : vector<1x8x8x32xf32> to vector<64x32xf32>
    %c5_191 = arith.constant 5 : index
    %c0_192 = arith.constant 0 : index
    %c0_193 = arith.constant 0 : index
    %302 = vector.load %arg17[%c5_191, %c0_192, %c0_193] : memref<7x32x192xf32, #tpu.memory_space<vmem>>, vector<1x32x192xf32>
    %303 = vector.shape_cast %302 : vector<1x32x192xf32> to vector<32x192xf32>
    %cst_194 = arith.constant dense<0.000000e+00> : vector<64x192xf32>
    %304 = tpu.matmul %301, %303, %cst_194 {dimension_numbers = #tpu.dot_dimension_numbers<[1], [0], [0], [1], [0, 0, 1, 1], [], []>} : vector<64x32xf32>, vector<32x192xf32>, vector<64x192xf32> -> vector<64x192xf32>
    %305 = arith.addf %299, %304 : vector<64x192xf32>
    %306 = vector.extract_strided_slice %268 {offsets = [0, 0, 6, 0], sizes = [1, 8, 8, 32], strides = [1, 1, 1, 1]} : vector<1x8x14x32xf32> to vector<1x8x8x32xf32>
    %307 = vector.shape_cast %306 : vector<1x8x8x32xf32> to vector<64x32xf32>
    %c6_195 = arith.constant 6 : index
    %c0_196 = arith.constant 0 : index
    %c0_197 = arith.constant 0 : index
    %308 = vector.load %arg17[%c6_195, %c0_196, %c0_197] : memref<7x32x192xf32, #tpu.memory_space<vmem>>, vector<1x32x192xf32>
    %309 = vector.shape_cast %308 : vector<1x32x192xf32> to vector<32x192xf32>
    %cst_198 = arith.constant dense<0.000000e+00> : vector<64x192xf32>
    %310 = tpu.matmul %307, %309, %cst_198 {dimension_numbers = #tpu.dot_dimension_numbers<[1], [0], [0], [1], [0, 0, 1, 1], [], []>} : vector<64x32xf32>, vector<32x192xf32>, vector<64x192xf32> -> vector<64x192xf32>
    %311 = arith.addf %305, %310 : vector<64x192xf32>
    %cst_199 = arith.constant 0.000000e+00 : f32
    %312 = vector.broadcast %cst_199 : f32 to vector<64x192xf32>
    %313 = arith.maximumf %311, %312 : vector<64x192xf32>
    %314 = vector.shape_cast %313 : vector<64x192xf32> to vector<1x8x8x192xf32>
    %cst_200 = arith.constant 0.000000e+00 : f32
    %315 = vector.broadcast %cst_200 : f32 to vector<1x1x8x192xf32>
    %316 = tpu.concatenate %315, %26, %315 in 1 : vector<1x1x8x192xf32>, vector<1x8x8x192xf32>, vector<1x1x8x192xf32> -> vector<1x10x8x192xf32>
    %317 = vector.extract_strided_slice %316 {offsets = [0, 0, 0, 0], sizes = [1, 8, 8, 192], strides = [1, 1, 1, 1]} : vector<1x10x8x192xf32> to vector<1x8x8x192xf32>
    %318 = arith.addf %317, %26 : vector<1x8x8x192xf32>
    %319 = vector.extract_strided_slice %316 {offsets = [0, 2, 0, 0], sizes = [1, 8, 8, 192], strides = [1, 1, 1, 1]} : vector<1x10x8x192xf32> to vector<1x8x8x192xf32>
    %320 = arith.addf %318, %319 : vector<1x8x8x192xf32>
    %cst_201 = arith.constant 0.000000e+00 : f32
    %321 = vector.broadcast %cst_201 : f32 to vector<1x8x1x192xf32>
    %322 = tpu.concatenate %321, %320, %321 in 2 : vector<1x8x1x192xf32>, vector<1x8x8x192xf32>, vector<1x8x1x192xf32> -> vector<1x8x10x192xf32>
    %323 = vector.extract_strided_slice %322 {offsets = [0, 0, 0, 0], sizes = [1, 8, 8, 192], strides = [1, 1, 1, 1]} : vector<1x8x10x192xf32> to vector<1x8x8x192xf32>
    %324 = arith.addf %323, %320 : vector<1x8x8x192xf32>
    %325 = vector.extract_strided_slice %322 {offsets = [0, 0, 2, 0], sizes = [1, 8, 8, 192], strides = [1, 1, 1, 1]} : vector<1x8x10x192xf32> to vector<1x8x8x192xf32>
    %326 = arith.addf %324, %325 : vector<1x8x8x192xf32>
    %cst_202 = arith.constant 0.111111112 : f32
    %327 = vector.broadcast %cst_202 : f32 to vector<1x8x8x192xf32>
    %328 = arith.mulf %326, %327 : vector<1x8x8x192xf32>
    %c0_203 = arith.constant 0 : index
    %c0_204 = arith.constant 0 : index
    %329 = vector.load %arg6[%c0_203, %c0_204] : memref<1x192xf32, #tpu.memory_space<vmem>>, vector<1x192xf32>
    %330 = vector.shape_cast %329 : vector<1x192xf32> to vector<1x1x1x192xf32>
    %331 = vector.broadcast %330 : vector<1x1x1x192xf32> to vector<1x8x8x192xf32>
    %332 = arith.addf %328, %331 : vector<1x8x8x192xf32>
    %cst_205 = arith.constant 0.000000e+00 : f32
    %333 = vector.broadcast %cst_205 : f32 to vector<1x8x8x192xf32>
    %334 = arith.maximumf %332, %333 : vector<1x8x8x192xf32>
    %c0_206 = arith.constant 0 : index
    %c0_207 = arith.constant 0 : index
    %c0_208 = arith.constant 0 : index
    %c0_209 = arith.constant 0 : index
    %335 = vector.load %arg19[%c0_206, %c0_207, %c0_208, %c0_209] : memref<1x8x8x768xf32, #tpu.memory_space<vmem>>, vector<1x8x8x192xf32>
    tpu.vector_store %arg19[%c0_206, %c0_207, %c0_208, %c0_209], %11 {strides = array<i32>} : memref<1x8x8x768xf32, #tpu.memory_space<vmem>>, vector<1x8x8x192xf32>,
    %c0_210 = arith.constant 0 : index
    %c0_211 = arith.constant 0 : index
    %c0_212 = arith.constant 0 : index
    %c192 = arith.constant 192 : index
    %336 = vector.load %arg19[%c0_210, %c0_211, %c0_212, %c192] : memref<1x8x8x768xf32, #tpu.memory_space<vmem>>, vector<1x8x8x192xf32>
    tpu.vector_store %arg19[%c0_210, %c0_211, %c0_212, %c192], %122 {strides = array<i32>} : memref<1x8x8x768xf32, #tpu.memory_space<vmem>>, vector<1x8x8x192xf32>,
    %c0_213 = arith.constant 0 : index
    %c0_214 = arith.constant 0 : index
    %c0_215 = arith.constant 0 : index
    %c384 = arith.constant 384 : index
    %337 = vector.load %arg19[%c0_213, %c0_214, %c0_215, %c384] : memref<1x8x8x768xf32, #tpu.memory_space<vmem>>, vector<1x8x8x192xf32>
    tpu.vector_store %arg19[%c0_213, %c0_214, %c0_215, %c384], %314 {strides = array<i32>} : memref<1x8x8x768xf32, #tpu.memory_space<vmem>>, vector<1x8x8x192xf32>,
    %c0_216 = arith.constant 0 : index
    %c0_217 = arith.constant 0 : index
    %c0_218 = arith.constant 0 : index
    %c576 = arith.constant 576 : index
    %338 = vector.load %arg19[%c0_216, %c0_217, %c0_218, %c576] : memref<1x8x8x768xf32, #tpu.memory_space<vmem>>, vector<1x8x8x192xf32>
    tpu.vector_store %arg19[%c0_216, %c0_217, %c0_218, %c576], %334 {strides = array<i32>} : memref<1x8x8x768xf32, #tpu.memory_space<vmem>>, vector<1x8x8x192xf32>,
    return
  }
  func.func @transform_0(%arg0: i32) -> (i32, i32, i32, i32) {
    %c0_i32 = arith.constant 0 : i32
    %c0_i32_0 = arith.constant 0 : i32
    %c0_i32_1 = arith.constant 0 : i32
    %c0_i32_2 = arith.constant 0 : i32
    return %arg0, %c0_i32, %c0_i32_0, %c0_i32_1 : i32, i32, i32, i32
  }
  func.func @transform_1(%arg0: i32) -> (i32, i32) {
    %c0_i32 = arith.constant 0 : i32
    %c0_i32_0 = arith.constant 0 : i32
    %c0_i32_1 = arith.constant 0 : i32
    return %c0_i32, %c0_i32_0 : i32, i32
  }
  func.func @transform_2(%arg0: i32) -> (i32, i32) {
    %c0_i32 = arith.constant 0 : i32
    %c0_i32_0 = arith.constant 0 : i32
    %c0_i32_1 = arith.constant 0 : i32
    return %c0_i32, %c0_i32_0 : i32, i32
  }
  func.func @transform_3(%arg0: i32) -> (i32, i32) {
    %c0_i32 = arith.constant 0 : i32
    %c0_i32_0 = arith.constant 0 : i32
    %c0_i32_1 = arith.constant 0 : i32
    return %c0_i32, %c0_i32_0 : i32, i32
  }
  func.func @transform_4(%arg0: i32) -> (i32, i32) {
    %c0_i32 = arith.constant 0 : i32
    %c0_i32_0 = arith.constant 0 : i32
    %c0_i32_1 = arith.constant 0 : i32
    return %c0_i32, %c0_i32_0 : i32, i32
  }
  func.func @transform_5(%arg0: i32) -> (i32, i32) {
    %c0_i32 = arith.constant 0 : i32
    %c0_i32_0 = arith.constant 0 : i32
    %c0_i32_1 = arith.constant 0 : i32
    return %c0_i32, %c0_i32_0 : i32, i32
  }
  func.func @transform_6(%arg0: i32) -> (i32, i32, i32) {
    %c0_i32 = arith.constant 0 : i32
    %c0_i32_0 = arith.constant 0 : i32
    %c0_i32_1 = arith.constant 0 : i32
    %c0_i32_2 = arith.constant 0 : i32
    return %c0_i32, %c0_i32_0, %c0_i32_1 : i32, i32, i32
  }
  func.func @transform_7(%arg0: i32) -> (i32, i32) {
    %c0_i32 = arith.constant 0 : i32
    %c0_i32_0 = arith.constant 0 : i32
    %c0_i32_1 = arith.constant 0 : i32
    return %c0_i32, %c0_i32_0 : i32, i32
  }
  func.func @transform_8(%arg0: i32) -> (i32, i32, i32) {
    %c0_i32 = arith.constant 0 : i32
    %c0_i32_0 = arith.constant 0 : i32
    %c0_i32_1 = arith.constant 0 : i32
    %c0_i32_2 = arith.constant 0 : i32
    return %c0_i32, %c0_i32_0, %c0_i32_1 : i32, i32, i32
  }
  func.func @transform_9(%arg0: i32) -> (i32, i32) {
    %c0_i32 = arith.constant 0 : i32
    %c0_i32_0 = arith.constant 0 : i32
    %c0_i32_1 = arith.constant 0 : i32
    return %c0_i32, %c0_i32_0 : i32, i32
  }
  func.func @transform_10(%arg0: i32) -> (i32, i32, i32) {
    %c0_i32 = arith.constant 0 : i32
    %c0_i32_0 = arith.constant 0 : i32
    %c0_i32_1 = arith.constant 0 : i32
    %c0_i32_2 = arith.constant 0 : i32
    return %c0_i32, %c0_i32_0, %c0_i32_1 : i32, i32, i32
  }
  func.func @transform_11(%arg0: i32) -> (i32, i32) {
    %c0_i32 = arith.constant 0 : i32
    %c0_i32_0 = arith.constant 0 : i32
    %c0_i32_1 = arith.constant 0 : i32
    return %c0_i32, %c0_i32_0 : i32, i32
  }
  func.func @transform_12(%arg0: i32) -> (i32, i32, i32) {
    %c0_i32 = arith.constant 0 : i32
    %c0_i32_0 = arith.constant 0 : i32
    %c0_i32_1 = arith.constant 0 : i32
    %c0_i32_2 = arith.constant 0 : i32
    return %c0_i32, %c0_i32_0, %c0_i32_1 : i32, i32, i32
  }
  func.func @transform_13(%arg0: i32) -> (i32, i32) {
    %c0_i32 = arith.constant 0 : i32
    %c0_i32_0 = arith.constant 0 : i32
    %c0_i32_1 = arith.constant 0 : i32
    return %c0_i32, %c0_i32_0 : i32, i32
  }
  func.func @transform_14(%arg0: i32) -> (i32, i32, i32) {
    %c0_i32 = arith.constant 0 : i32
    %c0_i32_0 = arith.constant 0 : i32
    %c0_i32_1 = arith.constant 0 : i32
    %c0_i32_2 = arith.constant 0 : i32
    return %c0_i32, %c0_i32_0, %c0_i32_1 : i32, i32, i32
  }
  func.func @transform_15(%arg0: i32) -> (i32, i32) {
    %c0_i32 = arith.constant 0 : i32
    %c0_i32_0 = arith.constant 0 : i32
    %c0_i32_1 = arith.constant 0 : i32
    return %c0_i32, %c0_i32_0 : i32, i32
  }
  func.func @transform_16(%arg0: i32) -> (i32, i32, i32) {
    %c0_i32 = arith.constant 0 : i32
    %c0_i32_0 = arith.constant 0 : i32
    %c0_i32_1 = arith.constant 0 : i32
    %c0_i32_2 = arith.constant 0 : i32
    return %c0_i32, %c0_i32_0, %c0_i32_1 : i32, i32, i32
  }
  func.func @transform_17(%arg0: i32) -> (i32, i32) {
    %c0_i32 = arith.constant 0 : i32
    %c0_i32_0 = arith.constant 0 : i32
    %c0_i32_1 = arith.constant 0 : i32
    return %c0_i32, %c0_i32_0 : i32, i32
  }
  func.func @transform_18(%arg0: i32) -> (i32, i32, i32, i32) {
    %c0_i32 = arith.constant 0 : i32
    %c0_i32_0 = arith.constant 0 : i32
    %c0_i32_1 = arith.constant 0 : i32
    %c0_i32_2 = arith.constant 0 : i32
    return %arg0, %c0_i32, %c0_i32_0, %c0_i32_1 : i32, i32, i32, i32
  }
}

</mosaic_0001>

<bundles_post_ra>
// kernel: tpu_custom_call.1
= control target key start
LH: loop header
LB: loop body
LE: loop exit
PB: predicated region body
PF: predicated region fallthrough
CT: control target
= control target key end

     0   :  { %s13133_s0 = inlined_call_operand.hbm [shape: f32[2,8,8,16], index: 0, kind: input, shape index: {}]   ;;  %s13134_s1 = inlined_call_operand.hbm [shape: f32[16,448], index: 1, kind: input, shape index: {}]   ;;  %s13135_s2 = inlined_call_operand.vmem [shape: f32[1,192], index: 2, kind: input, shape index: {}]   ;;  %s13136_s3 = inlined_call_operand.vmem [shape: f32[1,32], index: 3, kind: input, shape index: {}]   ;;  %s13137_s4 = inlined_call_operand.vmem [shape: f32[1,32], index: 4, kind: input, shape index: {}]   ;;  %s13138_s5 = inlined_call_operand.vmem [shape: f32[1,192], index: 5, kind: input, shape index: {}]   ;;  %s13139_s6 = inlined_call_operand.hbm [shape: f32[7,32,32], index: 6, kind: input, shape index: {}]   ;;  %s13140_s7 = inlined_call_operand.vmem [shape: f32[1,32], index: 7, kind: input, shape index: {}]   ;;  %s13141_s8 = inlined_call_operand.hbm [shape: f32[7,32,192], index: 8, kind: input, shape index: {}]   ;;  %s13142_s9 = inlined_call_operand.vmem [shape: f32[1,192], index: 9, kind: input, shape index: {}]   ;;  %s13143_s10 = inlined_call_operand.hbm [shape: f32[7,32,32], index: 10, kind: input, shape index: {}]   ;;  %s13144_s11 = inlined_call_operand.vmem [shape: f32[1,32], index: 11, kind: input, shape index: {}]   ;;  %s13145_s12 = inlined_call_operand.hbm [shape: f32[7,32,32], index: 12, kind: input, shape index: {}]   ;;  %s13146_s13 = inlined_call_operand.vmem [shape: f32[1,32], index: 13, kind: input, shape index: {}]   ;;  %s13147_s14 = inlined_call_operand.hbm [shape: f32[7,32,32], index: 14, kind: input, shape index: {}]   ;;  %s13148_s15 = inlined_call_operand.vmem [shape: f32[1,32], index: 15, kind: input, shape index: {}]   ;;  %s13149_s16 = inlined_call_operand.hbm [shape: f32[7,32,192], index: 16, kind: input, shape index: {}]   ;;  %s13150_s17 = inlined_call_operand.vmem [shape: f32[1,192], index: 17, kind: input, shape index: {}]   ;;  %s13151_s18 = inlined_call_operand.hbm [shape: f32[2,8,8,768], index: 18, kind: output, shape index: {}]  }
   0x1   :  { %13195 = sst [smem:[#allocation53_spill]] %s13133_s0 }
   0x2   :  { %13196 = sst [smem:[#allocation54_spill]] %s13134_s1 }
   0x3   :  { %13197 = sst [smem:[#allocation55_spill]] %s13135_s2 }
   0x4   :  { %13198 = sst [smem:[#allocation56_spill]] %s13138_s5 }
   0x5   :  { %13199 = sst [smem:[#allocation57_spill]] %s13139_s6 }
   0x6   :  { %13200 = sst [smem:[#allocation58_spill]] %s13142_s9 }
   0x7   :  { %13201 = sst [smem:[#allocation59_spill]] %s13144_s11 }
   0x8   :  { %13202 = sst [smem:[#allocation60_spill]] %s13146_s13 }
   0x9   :  { %13203 = sst [smem:[#allocation61_spill]] %s13148_s15 }
   0xa   :  { %13204 = sst [smem:[#allocation62_spill]] %s13150_s17 }
   0xb   :  { %13205 = sst [smem:[#allocation63_spill]] %s13151_s18 }
   0xc   :  { %23 = vsyncpa [#allocation3], 0 }
   0xd   :  { %25 = vsyncpa [#allocation3 + $0x1], 0 }
   0xe   :  { %26 = vsyncpa [#allocation6], 0 }
   0xf   :  { %27 = vsyncpa [#allocation9], 0 }
  0x10   :  { %28 = vsyncpa [#allocation12], 0 }
  0x11   :  { %29 = vsyncpa [#allocation15], 0 }
  0x12   :  { %30 = vsyncpa [#allocation4], 0 }
  0x13   :  { %32 = vsyncpa [#allocation4 + $0x1], 0  ;;  %s10592_s27 = smov 0   ;;  %s10594_s28 = smov 0  }
  0x14   :  { %s10596_s29 = smov 0   ;;  %s10598_s30 = smov 0  }
  0x15 LB: > { %s10476_s0 = smov [#allocation5]   ;;  %s10613_s1 = sadd.s32 4294967295, %s10474_s30   ;;  %s10474_s30 = sphi %s10598_s30, %s13330_s30   ;;  %s10470_s29 = sphi %s10596_s29, %s13329_s29   ;;  %s10466_s28 = sphi %s10594_s28, %s13328_s28   ;;  %s10462_s27 = sphi %s10592_s27, %s13327_s27  }
  0x16   : > { %s464_s19 = sshll.u32 %s10476_s0, 4  ;;  %p7998_p0 = scmp.ge.s32.totalorder %s10474_s30, 1  ;;  %s10618_s19 = int_to_ptr.vmem [resolvable:$true] %s464_s19 }
  0x17   : > { %p13156_p1 = scmp.eq.s32.totalorder %s10613_s1, 0  ;;  %p452_p2 = scmp.lt.s32.totalorder %s10474_s30, 3 }
  0x18   : > { %s10477_s21 = smov [#allocation8]   ;;  %s13208_s25 = sld [smem:[#allocation54_spill]] }
  0x19   : > { %p10620_p3 = pnand %p7998_p0, %p452_p2  ;;  %s505_s22 = sshll.u32 %s10477_s21, 4  ;;  %s10633_s22 = int_to_ptr.vmem [resolvable:$true] %s505_s22 }
  0x1b   : > { %s13206_s20 = scalar_select %p10620_p3, 1, 0 }
  0x1c   : > { %p10069_p5 = pneg %p10620_p3 }
  0x1e   : > { %p10629_p6 = pnand %p10069_p5, %p13156_p1  ;;  %s10166_s26 = scalar_lea.hbm %s13208_s25, 1024 }
  0x1f   : > { %p10167_p7 = scmp.ne.s32.totalorder %s13208_s25, %s10166_s26  ;;  %p10173_p11 = scmp.lt.u32.totalorder %s10166_s26, %s13208_s25 }
  0x20   : > { %p10643_p8 = pneg %p10629_p6 }
  0x22   : > { %p10169_p9 = pnand %p10643_p8, %p10167_p7 }
  0x24   : > { %p10170_p10 = pneg %p10169_p9 }
  0x26   : > { %p10175_p12 = pnand %p10173_p11, %p10170_p10 }
  0x28   : > { %10178 = shalt.err (!%p10175_p12)
}
  0x29   : > { %s10179_s18 = scalar_lea.vmem %s10618_s19, 1024  ;;  %p10187_p5 = scmp.lt.s32.totalorder %s10618_s19, %s10618_s19 }
  0x2a   : > { %p10180_p13 = scmp.ne.s32.totalorder %s10618_s19, %s10179_s18  ;;  %p10188_p4 = scmp.lt.s32.totalorder %s10179_s18, %s10179_s18 }
  0x2c   : > { %p10182_p0 = pnand %p10180_p13, %p10643_p8  ;;  %p10189_p7 = por %p10188_p4, %p10187_p5 }
  0x2e   : > { %p10183_p2 = pneg %p10182_p0 }
  0x30   : > { %p10190_p9 = pnand %p10189_p7, %p10183_p2 }
  0x32   : > { %10193 = shalt.err (!%p10190_p9)
}
  0x33   : > { %s10478_s23 = smov 512   ;;  %s10479_s15 = smov 32  }
  0x34   : > { %10072 = dma.hbm_to_vmem [thread:$0]  (!%p10629_p6), %s13208_s25, 1024, %s10618_s19, [#allocation6], %s10478_s23, %s10478_s23, %s10479_s15  }
  0x35   : > { %s10194_s13 = scalar_lea.hbm %s13141_s8, 7168 }
  0x36   : > { %p10195_p4 = scmp.ne.s32.totalorder %s13141_s8, %s10194_s13  ;;  %p10201_p12 = scmp.lt.u32.totalorder %s10194_s13, %s13141_s8 }
  0x38   : > { %p10197_p10 = pnand %p10195_p4, %p10643_p8 }
  0x3a   : > { %p10198_p11 = pneg %p10197_p10 }
  0x3c   : > { %p10203_p13 = pnand %p10201_p12, %p10198_p11 }
  0x3e   : > { %10206 = shalt.err (!%p10203_p13)
}
  0x3f   : > { %s10207_s19 = scalar_lea.vmem %s10633_s22, 7168  ;;  %p10215_p7 = scmp.lt.s32.totalorder %s10633_s22, %s10633_s22 }
  0x40   : > { %p10208_p0 = scmp.ne.s32.totalorder %s10633_s22, %s10207_s19  ;;  %p10216_p9 = scmp.lt.s32.totalorder %s10207_s19, %s10207_s19 }
  0x42   : > { %p10210_p2 = pnand %p10208_p0, %p10643_p8  ;;  %p10217_p4 = por %p10216_p9, %p10215_p7 }
  0x44   : > { %p10211_p5 = pneg %p10210_p2 }
  0x46   : > { %p10218_p10 = pnand %p10217_p4, %p10211_p5 }
  0x48   : > { %10221 = shalt.err (!%p10218_p10)
}
  0x49   : > { %s13158_s5 = smov 256   ;;  %s13159_s9 = smov 16  }
  0x4a   : > { %10078 = dma.hbm_to_vmem [thread:$0]  (!%p10629_p6), %s13141_s8, 7168, %s10633_s22, [#allocation9], %s13158_s5, %s13158_s5, %s13159_s9  }
  0x4b   : > { %s10482_s23 = smov [#allocation11]   ;;  %s10483_s24 = smov [#allocation7]  }
  0x4c   : > { %s537_s15 = sshll.u32 %s10482_s23, 4  ;;  %s489_s26 = sshll.u32 %s10483_s24, 4  ;;  %s538_s15 = int_to_ptr.vmem [resolvable:$true] %s537_s15  ;;  %s10690_s26 = int_to_ptr.vmem [resolvable:$true] %s489_s26 }
  0x4d   : > { %s10222_s18 = scalar_lea.hbm %s13145_s12, 3584 }
  0x4e   : > { %p10223_p11 = scmp.ne.s32.totalorder %s13145_s12, %s10222_s18  ;;  %p10229_p0 = scmp.lt.u32.totalorder %s10222_s18, %s13145_s12 }
  0x50   : > { %p10225_p12 = pnand %p10223_p11, %p10643_p8 }
  0x52   : > { %p10226_p13 = pneg %p10225_p12 }
  0x54   : > { %p10231_p2 = pnand %p10229_p0, %p10226_p13 }
  0x56   : > { %10234 = shalt.err (!%p10231_p2)
}
  0x57   : > { %s10235_s13 = scalar_lea.vmem %s538_s15, 3584  ;;  %p10243_p4 = scmp.lt.s32.totalorder %s538_s15, %s538_s15 }
  0x58   : > { %p10236_p5 = scmp.ne.s32.totalorder %s538_s15, %s10235_s13  ;;  %p10244_p10 = scmp.lt.s32.totalorder %s10235_s13, %s10235_s13 }
  0x5a   : > { %p10238_p7 = pnand %p10236_p5, %p10643_p8  ;;  %p10245_p1 = por %p10244_p10, %p10243_p4 }
  0x5c   : > { %p10239_p9 = pneg %p10238_p7 }
  0x5e   : > { %p10246_p3 = pnand %p10245_p1, %p10239_p9 }
  0x60   : > { %10249 = shalt.err (!%p10246_p3)
}
  0x61   : > { %s13160_s25 = smov 128   ;;  %s13161_s23 = smov 8  }
  0x62   : > { %10084 = dma.hbm_to_vmem [thread:$0]  (!%p10629_p6), %s13145_s12, 3584, %s538_s15, [#allocation12], %s13160_s25, %s13160_s25, %s13161_s23  }
  0x63   : > { %s13210_s6 = sld [smem:[#allocation57_spill]] }
  0x69   : > { %s10250_s19 = scalar_lea.hbm %s13210_s6, 3584 }
  0x6a   : > { %p10251_p1 = scmp.ne.s32.totalorder %s13210_s6, %s10250_s19  ;;  %p10257_p12 = scmp.lt.u32.totalorder %s10250_s19, %s13210_s6 }
  0x6c   : > { %p10253_p3 = pnand %p10251_p1, %p10643_p8 }
  0x6e   : > { %p10254_p11 = pneg %p10253_p3 }
  0x70   : > { %p10259_p13 = pnand %p10257_p12, %p10254_p11 }
  0x72   : > { %10262 = shalt.err (!%p10259_p13)
}
  0x73   : > { %s10263_s15 = scalar_lea.vmem %s10690_s26, 3584  ;;  %p10271_p7 = scmp.lt.s32.totalorder %s10690_s26, %s10690_s26 }
  0x74   : > { %p10264_p0 = scmp.ne.s32.totalorder %s10690_s26, %s10263_s15  ;;  %p10272_p9 = scmp.lt.s32.totalorder %s10263_s15, %s10263_s15 }
  0x76   : > { %p10266_p2 = pnand %p10264_p0, %p10643_p8  ;;  %p10273_p4 = por %p10272_p9, %p10271_p7 }
  0x78   : > { %p10267_p5 = pneg %p10266_p2 }
  0x7a   : > { %p10274_p10 = pnand %p10273_p4, %p10267_p5 }
  0x7c   : > { %10277 = shalt.err (!%p10274_p10)
}
  0x7d   : > { %10075 = dma.hbm_to_vmem [thread:$0]  (!%p10629_p6), %s13210_s6, 3584, %s10690_s26, [#allocation6], %s13160_s25, %s13160_s25, %s13161_s23  }
  0x7e   : > { %s10486_s0 = smov [#allocation10]   ;;  %s10487_s18 = smov [#allocation13]  }
  0x7f   : > { %s521_s21 = sshll.u32 %s10486_s0, 4  ;;  %s553_s19 = sshll.u32 %s10487_s18, 4  ;;  %s522_s21 = int_to_ptr.vmem [resolvable:$true] %s521_s21  ;;  %s10739_s19 = int_to_ptr.vmem [resolvable:$true] %s553_s19 }
  0x80   : > { %s10278_s13 = scalar_lea.hbm %s13143_s10, 3584 }
  0x81   : > { %p10279_p1 = scmp.ne.s32.totalorder %s13143_s10, %s10278_s13  ;;  %p10285_p12 = scmp.lt.u32.totalorder %s10278_s13, %s13143_s10 }
  0x83   : > { %p10281_p3 = pnand %p10279_p1, %p10643_p8 }
  0x85   : > { %p10282_p11 = pneg %p10281_p3 }
  0x87   : > { %p10287_p13 = pnand %p10285_p12, %p10282_p11 }
  0x89   : > { %10290 = shalt.err (!%p10287_p13)
}
  0x8a   : > { %s10291_s24 = scalar_lea.vmem %s522_s21, 3584  ;;  %p10299_p7 = scmp.lt.s32.totalorder %s522_s21, %s522_s21 }
  0x8b   : > { %p10292_p0 = scmp.ne.s32.totalorder %s522_s21, %s10291_s24  ;;  %p10300_p9 = scmp.lt.s32.totalorder %s10291_s24, %s10291_s24 }
  0x8d   : > { %p10294_p2 = pnand %p10292_p0, %p10643_p8  ;;  %p10301_p4 = por %p10300_p9, %p10299_p7 }
  0x8f   : > { %p10295_p5 = pneg %p10294_p2 }
  0x91   : > { %p10302_p10 = pnand %p10301_p4, %p10295_p5 }
  0x93   : > { %10305 = shalt.err (!%p10302_p10)
}
  0x94   : > { %10081 = dma.hbm_to_vmem [thread:$0]  (!%p10629_p6), %s13143_s10, 3584, %s522_s21, [#allocation9], %s13160_s25, %s13160_s25, %s13161_s23  }
  0x95   : > { %s10306_s22 = scalar_lea.hbm %s13147_s14, 3584 }
  0x96   : > { %p10307_p1 = scmp.ne.s32.totalorder %s13147_s14, %s10306_s22  ;;  %p10313_p12 = scmp.lt.u32.totalorder %s10306_s22, %s13147_s14 }
  0x98   : > { %p10309_p3 = pnand %p10307_p1, %p10643_p8 }
  0x9a   : > { %p10310_p11 = pneg %p10309_p3 }
  0x9c   : > { %p10315_p13 = pnand %p10313_p12, %p10310_p11 }
  0x9e   : > { %10318 = shalt.err (!%p10315_p13)
}
  0x9f   : > { %s10319_s21 = scalar_lea.vmem %s10739_s19, 3584  ;;  %p10327_p7 = scmp.lt.s32.totalorder %s10739_s19, %s10739_s19 }
  0xa0   : > { %p10320_p0 = scmp.ne.s32.totalorder %s10739_s19, %s10319_s21  ;;  %p10328_p9 = scmp.lt.s32.totalorder %s10319_s21, %s10319_s21 }
  0xa2   : > { %p10322_p2 = pnand %p10320_p0, %p10643_p8  ;;  %p10329_p4 = por %p10328_p9, %p10327_p7 }
  0xa4   : > { %p10323_p5 = pneg %p10322_p2 }
  0xa6   : > { %p10330_p10 = pnand %p10329_p4, %p10323_p5 }
  0xa8   : > { %10333 = shalt.err (!%p10330_p10)
}
  0xa9   : > { %10087 = dma.hbm_to_vmem [thread:$0]  (!%p10629_p6), %s13147_s14, 3584, %s10739_s19, [#allocation12], %s13160_s25, %s13160_s25, %s13161_s23  }
  0xaa   : > { %s10488_s0 = smov [#allocation14]   ;;  %s10334_s13 = scalar_lea.hbm %s13149_s16, 7168 }
  0xab   : > { %s569_s18 = sshll.u32 %s10488_s0, 4  ;;  %p10335_p1 = scmp.ne.s32.totalorder %s13149_s16, %s10334_s13  ;;  %s570_s18 = int_to_ptr.vmem [resolvable:$true] %s569_s18 }
  0xac   : > { %p10341_p12 = scmp.lt.u32.totalorder %s10334_s13, %s13149_s16 }
  0xad   : > { %p10337_p3 = pnand %p10335_p1, %p10643_p8 }
  0xaf   : > { %p10338_p11 = pneg %p10337_p3 }
  0xb1   : > { %p10343_p13 = pnand %p10341_p12, %p10338_p11 }
  0xb3   : > { %10346 = shalt.err (!%p10343_p13)
}
  0xb4   : > { %s10347_s19 = scalar_lea.vmem %s570_s18, 7168  ;;  %p10355_p7 = scmp.lt.s32.totalorder %s570_s18, %s570_s18 }
  0xb5   : > { %p10348_p0 = scmp.ne.s32.totalorder %s570_s18, %s10347_s19  ;;  %p10356_p9 = scmp.lt.s32.totalorder %s10347_s19, %s10347_s19 }
  0xb7   : > { %p10350_p2 = pnand %p10348_p0, %p10643_p8  ;;  %p10357_p4 = por %p10356_p9, %p10355_p7 }
  0xb9   : > { %p10351_p5 = pneg %p10350_p2 }
  0xbb   : > { %p10358_p10 = pnand %p10357_p4, %p10351_p5 }
  0xbd   : > { %10361 = shalt.err (!%p10358_p10)
}
  0xbe   : > { %s13211_s24 = smov 16   ;;  %s13212_s9 = smov 256  }
  0xbf   : > { %10090 = dma.hbm_to_vmem [thread:$0]  (!%p10629_p6), %s13149_s16, 7168, %s570_s18, [#allocation15], %s13212_s9, %s13212_s9, %s13211_s24  }
  0xc0   : > { %s7997_s17 = sadd.s32 4294967294, %s10474_s30   ;;  %s10811_s2 = sadd.s32 1, %s10474_s30  }
  0xc1   : > { %s45_s22 = sadd.s32 1, %s10470_s29  ;;  %s42_s13 = ssub.s32 %s10474_s30, %s10811_s2 }
  0xc2   : > { %p52_p8 = scmp.ne.s32.totalorder %s10470_s29, %s10466_s28  ;;  %p43_p1 = scmp.eq.s32.totalorder %s42_s13, 0 }
  0xc3   : > { %p53_p3 = scmp.eq.s32.totalorder %s10474_s30, 0  ;;  %p58_p11 = scmp.ne.s32.totalorder %s10466_s28, %s10462_s27 }
  0xc4   : > { %p439_p12 = scmp.eq.s32.totalorder %s10613_s1, 1  ;;  %p13213_p0 = scmp.eq.s32.totalorder %s10613_s1, 0 }
  0xc5   : > { %s10823_s15 = scalar_select %p43_p1, %s10470_s29, %s45_s22  }
  0xc6   : > { %p54_p13 = por %p53_p3, %p52_p8  ;;  %p10827_p2 = por %p13213_p0, %p58_p11 }
  0xc7   : > { %p10831_p6 = por %p439_p12, %p52_p8  ;;  %p445_p5 = scmp.eq.s32.totalorder %s7997_s17, 1 }
  0xc8   : > { %p10106_p7 = scmp.lt.s32.totalorder %s10474_s30, 2  ;;  %s586_s26 = sand.u32 1, %s10470_s29  }
  0xc9   : > { %s13215_s18 = scalar_select %p10831_p6, 1, 0 }
  0xca   : > { %p10837_p9 = por %p445_p5, %p58_p11  ;;  %s8007_s19 = sshll.u32 %s586_s26, 6 }
  0xcb   : > { %s8344_s24 = sshll.u32 %s10474_s30, 10  ;;  %s13217_s11 = sld [smem:[#allocation53_spill]] }
  0xcc   : > { %s13216_s21 = scalar_select %p10837_p9, 1, 0 }
  0xcd   : > { %s590_s13 = scalar_lea.vmem [#allocation2], %s8007_s19  ;;  %p10847_p4 = pnand %p10106_p7, %p54_p13 }
  0xce   : > { %s597_s25 = sshll.u32 %s590_s13, 4  ;;  %s10853_s23 = scalar_lea.sflag [#allocation3], %s586_s26  ;;  %s10851_s25 = int_to_ptr.vmem [resolvable:$true] %s597_s25 }
  0xcf   : > { %p10364_p8 = pneg %p10847_p4 }
  0xd1   : > { %s10845_s22 = scalar_lea.hbm %s13217_s11, %s8344_s24  ;;  %s10367_s9 = scalar_lea.hbm %s13217_s11, 2048 }
  0xd2   : > { %s10362_s6 = scalar_lea.hbm %s10845_s22, 1024  ;;  %p10368_p11 = scmp.lt.u32.totalorder %s10845_s22, %s13217_s11 }
  0xd3   : > { %p10363_p10 = scmp.ne.s32.totalorder %s10845_s22, %s10362_s6  ;;  %p10369_p12 = scmp.lt.u32.totalorder %s10367_s9, %s10362_s6 }
  0xd4   : > { %p10371_p0 = scmp.lt.u32.totalorder %s10362_s6, %s10845_s22 }
  0xd5   : > { %p10365_p1 = pnand %p10364_p8, %p10363_p10  ;;  %p10370_p13 = por %p10369_p12, %p10368_p11 }
  0xd7   : > { %p10366_p3 = pneg %p10365_p1  ;;  %p10372_p5 = por %p10371_p0, %p10370_p13 }
  0xd9   : > { %p10373_p7 = pnand %p10372_p5, %p10366_p3 }
  0xdb   : > { %10376 = shalt.err (!%p10373_p7)
}
  0xdc   : > { %s10377_s26 = scalar_lea.vmem %s10851_s25, 1024  ;;  %s10489_s19 = smov [#allocation2]  }
  0xdd   : > { %p10378_p10 = scmp.ne.s32.totalorder %s10851_s25, %s10377_s26  ;;  %s10382_s24 = sshll.u32 %s10489_s19, 4  ;;  %s10383_s24 = int_to_ptr.vmem [resolvable:$false] %s10382_s24 }
  0xde   : > { %s10384_s0 = scalar_lea.vmem %s10383_s24, 2048  ;;  %p10385_p6 = scmp.lt.s32.totalorder %s10851_s25, %s10383_s24 }
  0xdf   : > { %p10380_p1 = pnand %p10378_p10, %p10364_p8  ;;  %p10386_p11 = scmp.lt.s32.totalorder %s10384_s0, %s10377_s26 }
  0xe1   : > { %p10381_p9 = pneg %p10380_p1  ;;  %p10387_p12 = por %p10386_p11, %p10385_p6 }
  0xe3   : > { %p10388_p13 = pnand %p10387_p12, %p10381_p9 }
  0xe5   : > { %10391 = shalt.err (!%p10388_p13)
}
  0xe6   : > { %s13219_s6 = smov 8   ;;  %s13220_s9 = smov 128  }
  0xe7   : > { %10094 = dma.hbm_to_vmem [thread:$0]  (!%p10847_p4), %s10845_s22, 1024, %s10851_s25, %s10853_s23, %s13220_s9, %s13220_s9, %s13219_s6  }
  0xe8   : > { %p13221_p8 = scmp.ne.s32.totalorder %s13206_s20, 0 }
  0xea   : > { %609 = sbr.rel (%p13221_p8) target bundleno = 2060 (0x80c), region = 92 }
  0xf1   : > { %s10887_s13 = sand.u32 1, %s10466_s28  }
  0xf2   : > { %s8011_s26 = sshll.u32 %s10887_s13, 6  ;;  %s612_s19 = scalar_lea.sflag [#allocation3], %s10887_s13 }
  0xf3   : > { %s10891_s24 = scalar_lea.vmem [#allocation2], %s8011_s26 }
  0xf4   : > { %10437 = dma.done.wait (%p10827_p2), %s612_s19, 1024  }
  0xf5   : > { %10439 = vsyncadd (%p10827_p2), %s612_s19, 4294966272  ;;  %p13222_p6 = scmp.eq.s32.totalorder %s10613_s1, 0 }
  0xf7   : > { %10441 = dma.done.wait (%p13222_p6), [#allocation6], 4608   ;;  %p13223_p9 = pmov %p13222_p6 }
  0xf8   : > { %p13224_p4 = pmov %p13222_p6 }
  0xf9   : > { %10443 = vsyncadd (%p13223_p9), [#allocation6], 4294962688 }
  0xfa   : > { %10445 = dma.done.wait (%p13224_p4), [#allocation9], 10752   ;;  %p13225_p3 = pmov %p13224_p4 }
  0xfc   : > { %10447 = vsyncadd (%p13225_p3), [#allocation9], 4294956544  ;;  %p13226_p0 = pmov %p13225_p3 }
  0xfe   : > { %10449 = dma.done.wait (%p13226_p0), [#allocation12], 7168   ;;  %p13227_p5 = pmov %p13226_p0 }
  0xff   : > { %p13228_p2 = pmov %p13226_p0 }
 0x100   : > { %10451 = vsyncadd (%p13227_p5), [#allocation12], 4294960128 }
 0x101   : > { %10453 = dma.done.wait (%p13228_p2), [#allocation15], 7168   ;;  %p13229_p7 = pmov %p13226_p0 }
 0x102   : > { %v13167_v0 = vmov 0.0   ;;  %v697_v1 = vld [vmem:[#allocation5 + $0x8] sm:$0xff]  ;;  %v696_v3 = vld [vmem:[#allocation5] sm:$0xff]  ;;  %vm712_vm0 = vcmask 130048   ;;  %s10491_s23 = smov 64   ;;  %v10944_v12 = vld [vmem:[%s10891_s24 + $0x10] sm:$0xff]  ;;  %v965_v19 = vlaneseq }
 0x103   : > { %10455 = vsyncadd (%p13229_p7), [#allocation15], 4294960128  ;;  %801 = vmatprep.mubr.f32.mxu0 %v13167_v0  ;;  %825 = vmatprep.mubr.f32.mxu1 %v13167_v0  ;;  %v701_v2 = vld [vmem:[#allocation5 + $0x28] sm:$0xff]  ;;  %v700_v5 = vld [vmem:[#allocation5 + $0x20] sm:$0xff]  ;;  %s13231_s17 = sld [smem:[#allocation55_spill]]  ;;  %s10035_s0 = smul.u32 384, %s10887_s13 }
 0x104   : > { %v9241_v4 = vpack.c.bf16 %v701_v2, %v697_v1  ;;  %v9243_v6 = vpack.c.bf16 %v700_v5, %v696_v3  ;;  %v10916_v7 = vld [vmem:[%s10891_s24] sm:$0xff]  ;;  %v10932_v10 = vld [vmem:[%s10891_s24 + $0x8] sm:$0xff]  ;;  %v10947_v13 = vld [vmem:[%s10891_s24 + $0x30] sm:$0xff]  ;;  %v966_v20 = vshrl.u32 %v965_v19, 7  ;;  %vm7634_vm1 = vcmask 523264   ;;  %s10492_s19 = smov 96  }
 0x105   : > { %v10919_v8 = vld [vmem:[%s10891_s24 + $0x20] sm:$0xff]  ;;  %v10935_v11 = vld [vmem:[%s10891_s24 + $0x28] sm:$0xff]  ;;  %v10956_v14 = vld [vmem:[%s10891_s24 + $0x18] sm:$0xff]  ;;  %s10997_s6 = scalar_lea.vmem [#allocation16], %s10035_s0  ;;  %vm1142_vm2 = vcmask 261120   ;;  %vm1097_vm3 = vcmask 1042432  }
 0x106   : > { %9242 = vmatprep.subr.bf16.mxu0 %v9241_v4  ;;  %9585 = vmatprep.subr.bf16.mxu1 %v9241_v4  ;;  %v8035_v9 = vld [vmem:[%s13136_s3] ss:$0 sm:$0xff]  ;;  %v10959_v15 = vld [vmem:[%s10891_s24 + $0x38] sm:$0xff]  ;;  %v1116_v17 = vld [vmem:[#allocation7 + $0x68] sm:$0xff]  ;;  %v10966_v24 = vsub.s32 0, %v966_v20  ;;  %v10971_v26 = vsub.s32 1, %v966_v20 }
 0x107   : > { %9244 = vmatpush1.bf16.msra.mxu0 %v9243_v6  ;;  %9586 = vmatpush1.bf16.msra.mxu1 %v9243_v6  ;;  %v1115_v16 = vld [vmem:[#allocation7 + $0x60] sm:$0xff]  ;;  %v1117_v21 = vld [vmem:[#allocation7 + $0x70] sm:$0xff]  ;;  %v1118_v22 = vld [vmem:[#allocation7 + $0x78] sm:$0xff]  ;;  %vm1413_vm4 = vcmask 1046528   ;;  %s10493_s24 = smov 32   ;;  %vm1572_vm5 = vcmask 1045504  }
 0x108   : > { %1013 = vrot.lane.b32.xlu0 %v8035_v9, %s10491_s23  ;;  %v9249_v18 = vpack.c.bf16 %v1116_v17, %v1115_v16  ;;  %v9253_v23 = vpack.c.bf16 %v1118_v22, %v1117_v21  ;;  %13230 = vst [vmem:[#allocation23_spill] sm:$0xff] %v10966_v24  ;;  %13232 = vst [vmem:[#allocation24_spill] sm:$0xff] %v10971_v26  ;;  %v1264_v4 = vld [vmem:[#allocation7] sm:$0xff]  ;;  %v1265_v5 = vld [vmem:[#allocation7 + $0x8] sm:$0xff]  ;;  %vm2048_vm6 = vcmask 1041408   ;;  %vm1731_vm7 = vcmask 1043456  }
 0x109   : > { %v963_v25 = vld [vmem:[%s13231_s17] sm:$0x3]  ;;  %s13235_s17 = sld [smem:[#allocation59_spill]]  ;;  %vm7412_vm8 = vcmask 1040384   ;;  %s13240_s26 = sld [smem:[#allocation56_spill]]  ;;  %vm7722_vm9 = vcmask 1048064  }
 0x10a   : > { %8019 = vmatmul.mubr.msk.f32.vlgmr.msra.gmra.mrb[0].mxu0 %vm712_vm0, %v10916_v7  ;;  %8023 = vmatmul.mubr.msk.f32.vlgmr.msra.gmra.mrb[0].mxu1 %vm712_vm0, %v10919_v8  ;;  %v10974_v27 = vrot.slane %v963_v25, %v10966_v24  ;;  %v10978_v28 = vrot.slane %v963_v25, %v10971_v26  ;;  %s13317_s20 = sld [smem:[#allocation58_spill]]  ;;  %s13320_s22 = sld [smem:[#allocation60_spill]] }
 0x10b   : > { %807 = vmatprep.mubr.f32.mxu0 %v13167_v0  ;;  %831 = vmatprep.mubr.f32.mxu1 %v13167_v0  ;;  %s13321_s0 = sld [smem:[#allocation61_spill]]  ;;  %p13324_p1 = scmp.ne.s32.totalorder %s13215_s18, 0 }
 0x10c   : > { %9250 = vmatprep.subr.bf16.mxu0 %v9249_v18 }
 0x10d   : > { %9252 = vmatpush3.bf16.msra.mxu0 %v9249_v18 }
 0x10e   : > { %8020 = vmatmul.mubr.msk.f32.gmra.mrb[2].mxu0 %vm712_vm0, %v10932_v10  ;;  %8024 = vmatmul.mubr.msk.f32.gmra.mrb[2].mxu1 %vm712_vm0, %v10935_v11 }
 0x10f   : > { %813 = vmatprep.mubr.f32.mxu0 %v13167_v0  ;;  %837 = vmatprep.mubr.f32.mxu1 %v13167_v0 }
 0x110   : > { %9254 = vmatprep.subr.bf16.mxu0 %v9253_v23 }
 0x111   : > { %9256 = vmatpush3.bf16.msra.mxu0 %v9253_v23 }
 0x112   : > { %8021 = vmatmul.mubr.msk.f32.gmra.mrb[4].mxu0 %vm712_vm0, %v10944_v12  ;;  %8025 = vmatmul.mubr.msk.f32.gmra.mrb[4].mxu1 %vm712_vm0, %v10947_v13 }
 0x113   : > { %819 = vmatprep.mubr.f32.mxu0 %v13167_v0  ;;  %843 = vmatprep.mubr.f32.mxu1 %v13167_v0 }
 0x116   : > { %8022 = vmatmul.mubr.msk.f32.gmra.mrb[6].mxu0 %vm712_vm0, %v10956_v14  ;;  %8026 = vmatmul.mubr.msk.f32.gmra.mrb[6].mxu1 %vm712_vm0, %v10959_v15 }
 0x117   : > { %914 = vmatprep.mubr.f32.mxu1 %v13167_v0 }
 0x17a   : > { %v10980_v29 = vpop.permute.xlu0 %1013 }
 0x1dd   : > { %v803_v30 = vpop.f32.mrb[0].mxu0  ;;  %v827_v31 = vpop.f32.mrb[0].mxu1 }
 0x1de   : > { %v975_v32 = vadd.f32 %v10974_v27, %v803_v30  ;;  %v10983_v33 = vpop.f32.mrb[1].mxu0  ;;  %v983_v34 = vadd.f32 %v10974_v27, %v827_v31  ;;  %v10986_v35 = vpop.f32.mrb[1].mxu1  ;;  %v9257_v31 = vpack.c.bf16 %v1265_v5, %v1264_v4 }
 0x1df   : > { %v976_v36 = vadd.f32 %v10978_v28, %v10983_v33  ;;  %v10992_v37 = vadd.f32 %v10980_v29, %v10983_v33  ;;  %v984_v38 = vadd.f32 %v10978_v28, %v10986_v35  ;;  %v1020_v6 = vadd.f32 %v10980_v29, %v10986_v35 }
 0x1e0   : > { %v991_v39 = vmax.f32 %v975_v32, 0.0  ;;  %v999_v40 = vmax.f32 %v983_v34, 0.0  ;;  %9258 = vmatprep.subr.bf16.mxu0 %v9257_v31 }
 0x1e1   : > { %v992_v41 = vmax.f32 %v976_v36, 0.0  ;;  %v1000_v42 = vmax.f32 %v984_v38, 0.0  ;;  %v809_v43 = vpop.f32.mrb[2].mxu0  ;;  %v833_v44 = vpop.f32.mrb[2].mxu1  ;;  %v1024_v45 = vmax.f32 %v10992_v37, 0.0 }
 0x1e2   : > { %7633 = vst [vmem:[%s10997_s6] sm:$0xff] %v991_v39  ;;  %7642 = vst [vmem:[%s10997_s6 + $0xc0] sm:$0xff] %v999_v40  ;;  %v977_v46 = vadd.f32 %v10974_v27, %v809_v43  ;;  %v985_v47 = vadd.f32 %v10974_v27, %v833_v44  ;;  %v11003_v48 = vpop.f32.mrb[3].mxu0  ;;  %v11005_v49 = vpop.f32.mrb[3].mxu1  ;;  %v1028_v40 = vmax.f32 %v1020_v6, 0.0 }
 0x1e3   : > { %v978_v50 = vadd.f32 %v10978_v28, %v11003_v48  ;;  %v986_v51 = vadd.f32 %v10978_v28, %v11005_v49  ;;  %1126 = vrot.lane.b32.xlu0 %v1024_v45, %s10491_s23  ;;  %v11016_v52 = vadd.f32 %v10980_v29, %v11003_v48  ;;  %7635 = vst.msk [vmem:[%s10997_s6 + $0x8] sm:$0xff] %vm7634_vm1, %v992_v41  ;;  %7643 = vst.msk [vmem:[%s10997_s6 + $0xc8] sm:$0xff] %vm7634_vm1, %v1000_v42 }
 0x1e4   : > { %v993_v53 = vmax.f32 %v977_v46, 0.0  ;;  %v1001_v54 = vmax.f32 %v985_v47, 0.0 }
 0x1e5   : > { %v994_v55 = vmax.f32 %v978_v50, 0.0  ;;  %v1002_v56 = vmax.f32 %v986_v51, 0.0  ;;  %v815_v57 = vpop.f32.mrb[4].mxu0  ;;  %v839_v58 = vpop.f32.mrb[4].mxu1  ;;  %v1025_v59 = vmax.f32 %v11016_v52, 0.0  ;;  %v1065_v50 = vrot.slane %v1024_v45, 5 }
 0x1e6   : > { %7636 = vst [vmem:[%s10997_s6 + $0x30] sm:$0xff] %v993_v53  ;;  %7644 = vst [vmem:[%s10997_s6 + $0xf0] sm:$0xff] %v1001_v54  ;;  %v979_v60 = vadd.f32 %v10974_v27, %v815_v57  ;;  %v987_v61 = vadd.f32 %v10974_v27, %v839_v58  ;;  %v11027_v62 = vpop.f32.mrb[5].mxu0  ;;  %v11029_v63 = vpop.f32.mrb[5].mxu1  ;;  %v8036_v45 = vld [vmem:[%s13137_s4] ss:$0 sm:$0xff] }
 0x1e7   : > { %v980_v1 = vadd.f32 %v10978_v28, %v11027_v62  ;;  %v1018_v2 = vadd.f32 %v10980_v29, %v11027_v62  ;;  %v988_v3 = vadd.f32 %v10978_v28, %v11029_v63  ;;  %1128 = vrot.lane.b32.xlu1 %v1025_v59, %s10491_s23  ;;  %7637 = vst.msk [vmem:[%s10997_s6 + $0x38] sm:$0xff] %vm7634_vm1, %v994_v55  ;;  %7645 = vst.msk [vmem:[%s10997_s6 + $0xf8] sm:$0xff] %vm7634_vm1, %v1002_v56  ;;  %v1266_v58 = vld [vmem:[#allocation7 + $0x10] sm:$0xff] }
 0x1e8   : > { %v995_v9 = vmax.f32 %v979_v60, 0.0  ;;  %v1003_v16 = vmax.f32 %v987_v61, 0.0  ;;  %v1022_v41 = vadd.f32 %v10980_v29, %v11029_v63  ;;  %v1066_v52 = vrot.slane %v1025_v59, 5  ;;  %v1267_v59 = vld [vmem:[#allocation7 + $0x18] sm:$0xff] }
 0x1e9   : > { %v996_v17 = vmax.f32 %v980_v1, 0.0  ;;  %v1004_v18 = vmax.f32 %v988_v3, 0.0  ;;  %v821_v19 = vpop.f32.mrb[6].mxu0  ;;  %v845_v20 = vpop.f32.mrb[6].mxu1  ;;  %v1026_v21 = vmax.f32 %v1018_v2, 0.0  ;;  %v9261_v60 = vpack.c.bf16 %v1267_v59, %v1266_v58  ;;  %v1439_v1 = vld [vmem:[#allocation7 + $0x20] sm:$0xff] }
 0x1ea   : > { %7638 = vst [vmem:[%s10997_s6 + $0x60] sm:$0xff] %v995_v9  ;;  %7646 = vst [vmem:[%s10997_s6 + $0x120] sm:$0xff] %v1003_v16  ;;  %v981_v22 = vadd.f32 %v10974_v27, %v821_v19  ;;  %v989_v23 = vadd.f32 %v10974_v27, %v845_v20  ;;  %v11048_v25 = vpop.f32.mrb[7].mxu0  ;;  %v11050_v30 = vpop.f32.mrb[7].mxu1  ;;  %v1021_v27 = vadd.f32 %v10980_v29, %v11005_v49  ;;  %v1030_v46 = vmax.f32 %v1022_v41, 0.0  ;;  %v1440_v2 = vld [vmem:[#allocation7 + $0x28] sm:$0xff] }
 0x1eb   : > { %v982_v32 = vadd.f32 %v10978_v28, %v11048_v25  ;;  %v1019_v34 = vadd.f32 %v10980_v29, %v11048_v25  ;;  %v990_v36 = vadd.f32 %v10978_v28, %v11050_v30  ;;  %1130 = vrot.lane.b32.xlu1 %v1026_v21, %s10491_s23  ;;  %7639 = vst.msk [vmem:[%s10997_s6 + $0x68] sm:$0xff] %vm7634_vm1, %v996_v17  ;;  %7647 = vst.msk [vmem:[%s10997_s6 + $0x128] sm:$0xff] %vm7634_vm1, %v1004_v18  ;;  %v1441_v20 = vld [vmem:[#allocation7 + $0x30] sm:$0xff] }
 0x1ec   : > { %v997_v38 = vmax.f32 %v981_v22, 0.0  ;;  %v1005_v39 = vmax.f32 %v989_v23, 0.0  ;;  %v1023_v44 = vadd.f32 %v10980_v29, %v11050_v30  ;;  %v1029_v47 = vmax.f32 %v1021_v27, 0.0  ;;  %v1599_v27 = vld [vmem:[#allocation7 + $0x48] sm:$0xff]  ;;  %v1600_v59 = vld [vmem:[#allocation7 + $0x50] sm:$0xff] }
 0x1ed   : > { %v998_v42 = vmax.f32 %v982_v32, 0.0  ;;  %v1006_v28 = vmax.f32 %v990_v36, 0.0  ;;  %v1027_v43 = vmax.f32 %v1019_v34, 0.0  ;;  %v1067_v53 = vrot.slane %v1026_v21, 5  ;;  %v1442_v21 = vld [vmem:[#allocation7 + $0x38] sm:$0xff]  ;;  %v1598_v36 = vld [vmem:[#allocation7 + $0x40] sm:$0xff] }
 0x1ee   : > { %7640 = vst [vmem:[%s10997_s6 + $0x90] sm:$0xff] %v997_v38  ;;  %7648 = vst [vmem:[%s10997_s6 + $0x150] sm:$0xff] %v1005_v39  ;;  %v1031_v51 = vmax.f32 %v1023_v44, 0.0  ;;  %v1069_v29 = vrot.slane %v1028_v40, 5  ;;  %v1071_v55 = vrot.slane %v1030_v46, 5  ;;  %v1070_v37 = vrot.slane %v1029_v47, 5 }
 0x1ef   : > { %1134 = vrot.lane.b32.xlu1 %v1028_v40, %s10491_s23  ;;  %1132 = vrot.lane.b32.xlu0 %v1027_v43, %s10491_s23  ;;  %7641 = vst.msk [vmem:[%s10997_s6 + $0x98] sm:$0xff] %vm7634_vm1, %v998_v42  ;;  %7649 = vst.msk [vmem:[%s10997_s6 + $0x158] sm:$0xff] %vm7634_vm1, %v1006_v28  ;;  %v1068_v54 = vrot.slane %v1027_v43, 5  ;;  %v9265_v3 = vpack.c.bf16 %v1440_v2, %v1439_v1  ;;  %v9273_v40 = vpack.c.bf16 %v1599_v27, %v1598_v36 }
 0x1f0   : > { %v1072_v56 = vrot.slane %v1031_v51, 5 }
 0x1f3   : > { %1138 = vrot.lane.b32.xlu1 %v1030_v46, %s10491_s23  ;;  %1136 = vrot.lane.b32.xlu0 %v1029_v47, %s10491_s23 }
 0x1f7   : > { %1073 = vrot.lane.b32.xlu1 %v1065_v50, %s10491_s23  ;;  %1140 = vrot.lane.b32.xlu0 %v1031_v51, %s10491_s23 }
 0x1fb   : > { %1077 = vrot.lane.b32.xlu1 %v1067_v53, %s10491_s23  ;;  %1075 = vrot.lane.b32.xlu0 %v1066_v52, %s10491_s23 }
 0x1ff   : > { %1081 = vrot.lane.b32.xlu1 %v1069_v29, %s10491_s23  ;;  %1079 = vrot.lane.b32.xlu0 %v1068_v54, %s10491_s23 }
 0x203   : > { %1085 = vrot.lane.b32.xlu1 %v1071_v55, %s10491_s23  ;;  %1083 = vrot.lane.b32.xlu0 %v1070_v37, %s10491_s23 }
 0x207   : > { %1038 = vrot.lane.b32.xlu1 %v8036_v45, %s10492_s19  ;;  %1087 = vrot.lane.b32.xlu0 %v1072_v56, %s10491_s23  ;;  %s13322_s19 = sld [smem:[#allocation62_spill]] }
 0x255   : > { %v1127_v57 = vpop.permute.xlu0 %1126 }
 0x256   : > { %8689 = vmatprep.mubr.msk.f32.mxu0 %vm1142_vm2, %v1127_v57 }
 0x259   : > { %v1129_v61 = vpop.permute.xlu1 %1128 }
 0x25a   : > { %8690 = vmatmul.mubr.msk.f32.vlgmr.msra.gmra.mrb[8].mxu0 %vm1142_vm2, %v1129_v61 }
 0x25b   : > { %9260 = vmatpush3.bf16.msra.mxu0 %v9257_v31  ;;  %v9269_v31 = vpack.c.bf16 %v1442_v21, %v1441_v20  ;;  %v1757_v20 = vld [vmem:[#allocation7 + $0x80] sm:$0xff]  ;;  %v1758_v21 = vld [vmem:[#allocation7 + $0x88] sm:$0xff] }
 0x25c   : > { %9262 = vmatprep.subr.bf16.mxu0 %v9261_v60 }
 0x25d   : > { %v1131_v4 = vpop.permute.xlu1 %1130 }
 0x25e   : > { %8692 = vmatprep.mubr.msk.f32.mxu0 %vm1142_vm2, %v1131_v4 }
 0x25f   : > { %9264 = vmatpush3.bf16.msra.mxu0 %v9261_v60  ;;  %v1601_v60 = vld [vmem:[#allocation7 + $0x58] sm:$0xff] }
 0x260   : > { %9266 = vmatprep.subr.bf16.mxu0 %v9265_v3 }
 0x261   : > { %v1135_v5 = vpop.permute.xlu1 %1134  ;;  %v1133_v6 = vpop.permute.xlu0 %1132 }
 0x262   : > { %8693 = vmatmul.mubr.msk.f32.gmra.mrb[10].mxu0 %vm1142_vm2, %v1133_v6  ;;  %v9277_v6 = vpack.c.bf16 %v1601_v60, %v1600_v59 }
 0x263   : > { %8695 = vmatprep.mubr.msk.f32.mxu0 %vm1142_vm2, %v1135_v5 }
 0x265   : > { %v1139_v9 = vpop.permute.xlu1 %1138  ;;  %v1137_v16 = vpop.permute.xlu0 %1136 }
 0x266   : > { %8696 = vmatmul.mubr.msk.f32.gmra.mrb[12].mxu0 %vm1142_vm2, %v1137_v16 }
 0x267   : > { %8698 = vmatprep.mubr.msk.f32.mxu0 %vm1142_vm2, %v1139_v9 }
 0x269   : > { %v1074_v17 = vpop.permute.xlu1 %1073  ;;  %v1141_v18 = vpop.permute.xlu0 %1140 }
 0x26a   : > { %v11101_v19 = vsel %vm1097_vm3, 0.0, %v1074_v17  ;;  %8699 = vmatmul.mubr.msk.f32.gmra.mrb[14].mxu0 %vm1142_vm2, %v1141_v18  ;;  %v11117_v41 = vsel %vm1097_vm3, %v1074_v17, 0.0 }
 0x26b   : > { %8709 = vmatprep.mubr.msk.f32.mxu0 %vm1142_vm2, %v11101_v19  ;;  %v1414_v46 = vrot.slane %v11101_v19, 1  ;;  %v1415_v47 = vrot.slane %v11117_v41, 1 }
 0x26d   : > { %v1078_v22 = vpop.permute.xlu1 %1077  ;;  %v1076_v23 = vpop.permute.xlu0 %1075  ;;  %v1416_v37 = vsel %vm1413_vm4, %v1414_v46, %v1415_v47 }
 0x26e   : > { %v11107_v32 = vsel %vm1097_vm3, 0.0, %v1078_v22  ;;  %v11110_v34 = vsel %vm1097_vm3, 0.0, %v1076_v23  ;;  %v11138_v52 = vsel %vm1097_vm3, %v1076_v23, 0.0  ;;  %v11143_v53 = vsel %vm1097_vm3, %v1078_v22, 0.0 }
 0x26f   : > { %8710 = vmatmul.mubr.msk.f32.vlgmr.msra.gmra.mrb[8].mxu0 %vm1142_vm2, %v11110_v34  ;;  %v1417_v29 = vrot.slane %v11110_v34, 1  ;;  %v1418_v45 = vrot.slane %v11138_v52, 1  ;;  %v1420_v2 = vrot.slane %v11107_v32, 1  ;;  %v1577_v60 = vrot.slane %v11138_v52, 2 }
 0x270   : > { %8712 = vmatprep.mubr.msk.f32.mxu0 %vm1142_vm2, %v11107_v32  ;;  %9268 = vmatpush3.bf16.msra.mxu0 %v9265_v3  ;;  %v1421_v3 = vrot.slane %v11143_v53, 1 }
 0x271   : > { %v1082_v38 = vpop.permute.xlu1 %1081  ;;  %v1080_v39 = vpop.permute.xlu0 %1079  ;;  %9270 = vmatprep.subr.bf16.mxu0 %v9269_v31  ;;  %v1419_v9 = vsel %vm1413_vm4, %v1417_v29, %v1418_v45 }
 0x272   : > { %v11120_v42 = vsel %vm1097_vm3, 0.0, %v1082_v38  ;;  %v11123_v28 = vsel %vm1097_vm3, 0.0, %v1080_v39  ;;  %v11156_v61 = vsel %vm1097_vm3, %v1082_v38, 0.0  ;;  %v11159_v1 = vsel %vm1097_vm3, %v1080_v39, 0.0 }
 0x273   : > { %8713 = vmatmul.mubr.msk.f32.gmra.mrb[10].mxu0 %vm1142_vm2, %v11123_v28  ;;  %v1423_v16 = vrot.slane %v11123_v28, 1  ;;  %v1424_v17 = vrot.slane %v11159_v1, 1  ;;  %v1426_v18 = vrot.slane %v11120_v42, 1  ;;  %v1422_v22 = vsel %vm1413_vm4, %v1420_v2, %v1421_v3 }
 0x274   : > { %8715 = vmatprep.mubr.msk.f32.mxu0 %vm1142_vm2, %v11120_v42  ;;  %9272 = vmatpush3.bf16.msra.mxu0 %v9269_v31  ;;  %v1427_v23 = vrot.slane %v11156_v61, 1  ;;  %v1573_v39 = vrot.slane %v11101_v19, 2  ;;  %v1579_v2 = vrot.slane %v11107_v32, 2  ;;  %v2049_v3 = vrot.slane %v11101_v19, 6 }
 0x275   : > { %v1086_v43 = vpop.permute.xlu1 %1085  ;;  %v1084_v44 = vpop.permute.xlu0 %1083  ;;  %9274 = vmatprep.subr.bf16.mxu0 %v9273_v40 }
 0x276   : > { %v11132_v50 = vsel %vm1097_vm3, 0.0, %v1086_v43  ;;  %v11135_v51 = vsel %vm1097_vm3, 0.0, %v1084_v44 }
 0x277   : > { %8716 = vmatmul.mubr.msk.f32.gmra.mrb[12].mxu0 %vm1142_vm2, %v11135_v51  ;;  %v1429_v46 = vrot.slane %v11135_v51, 1  ;;  %v1432_v29 = vrot.slane %v11132_v50, 1 }
 0x278   : > { %8718 = vmatprep.mubr.msk.f32.mxu0 %vm1142_vm2, %v11132_v50 }
 0x279   : > { %v1039_v54 = vpop.permute.xlu1 %1038  ;;  %v1088_v55 = vpop.permute.xlu0 %1087 }
 0x27a   : > { %v11151_v56 = vsel %vm1097_vm3, 0.0, %v1088_v55  ;;  %v1042_v57 = vadd.f32 %v1039_v54, %v11003_v48  ;;  %v1041_v58 = vadd.f32 %v1039_v54, %v10983_v33  ;;  %v1044_v33 = vadd.f32 %v1039_v54, %v11048_v25 }
 0x27b   : > { %8719 = vmatmul.mubr.msk.f32.gmra.mrb[14].mxu0 %vm1142_vm2, %v11151_v56  ;;  %v1043_v5 = vadd.f32 %v1039_v54, %v11027_v62  ;;  %v11175_v25 = vsel %vm1097_vm3, %v1086_v43, 0.0  ;;  %v11178_v62 = vsel %vm1097_vm3, %v1084_v44, 0.0  ;;  %v1046_v27 = vadd.f32 %v1039_v54, %v11005_v49 }
 0x27c   : > { %8729 = vmatprep.mubr.msk.f32.mxu0 %vm1142_vm2, %v1416_v37  ;;  %v1050_v48 = vmax.f32 %v1042_v57, 0.0  ;;  %v1049_v4 = vmax.f32 %v1041_v58, 0.0  ;;  %v1052_v31 = vmax.f32 %v1044_v33, 0.0  ;;  %v1045_v38 = vadd.f32 %v1039_v54, %v10986_v35  ;;  %v1760_v33 = vld [vmem:[#allocation7 + $0x98] sm:$0xff] }
 0x27d   : > { %v1051_v36 = vmax.f32 %v1043_v5, 0.0  ;;  %v11187_v43 = vpack.c.bf16 %v1758_v21, %v1757_v20  ;;  %v1425_v44 = vsel %vm1413_vm4, %v1423_v16, %v1424_v17  ;;  %v1430_v47 = vrot.slane %v11178_v62, 1 }
 0x27e   : > { %3229 = vrot.lane.b32.xlu1 %v1050_v48, %s10493_s24  ;;  %3227 = vrot.lane.b32.xlu0 %v1049_v4, %s10493_s24  ;;  %v1574_v49 = vrot.slane %v11117_v41, 2  ;;  %v11196_v35 = vsel %vm1097_vm3, %v1088_v55, 0.0  ;;  %v1433_v37 = vrot.slane %v11175_v25, 1  ;;  %v1054_v45 = vmax.f32 %v1046_v27, 0.0  ;;  %v1759_v4 = vld [vmem:[#allocation7 + $0x90] sm:$0xff] }
 0x27f   : > { %8730 = vmatmul.mubr.msk.f32.vlgmr.msra.gmra.mrb[8].mxu0 %vm1142_vm2, %v1419_v9  ;;  %v1053_v57 = vmax.f32 %v1045_v38, 0.0  ;;  %v1048_v58 = vadd.f32 %v1039_v54, %v11050_v30  ;;  %v1047_v59 = vadd.f32 %v1039_v54, %v11029_v63  ;;  %v1576_v55 = vrot.slane %v11110_v34, 2 }
 0x280   : > { %8732 = vmatprep.mubr.msk.f32.mxu0 %vm1142_vm2, %v1422_v22  ;;  %9276 = vmatpush3.bf16.msra.mxu0 %v9273_v40  ;;  %v1428_v40 = vsel %vm1413_vm4, %v1426_v18, %v1427_v23  ;;  %v1431_v48 = vsel %vm1413_vm4, %v1429_v46, %v1430_v47  ;;  %v1435_v30 = vrot.slane %v11151_v56, 1  ;;  %v1436_v63 = vrot.slane %v11196_v35, 1 }
 0x281   : > { %9278 = vmatprep.subr.bf16.mxu0 %v9277_v6  ;;  %v1580_v54 = vrot.slane %v11143_v53, 2  ;;  %v2052_v5 = vrot.slane %v11110_v34, 6  ;;  %v1434_v9 = vsel %vm1413_vm4, %v1432_v29, %v1433_v37  ;;  %v2050_v16 = vrot.slane %v11117_v41, 6 }
 0x282   : > { %3233 = vrot.lane.b32.xlu1 %v1052_v31, %s10493_s24  ;;  %3231 = vrot.lane.b32.xlu0 %v1051_v36, %s10493_s24  ;;  %v1056_v17 = vmax.f32 %v1048_v58, 0.0  ;;  %v1055_v18 = vmax.f32 %v1047_v59, 0.0  ;;  %v1575_v20 = vsel %vm1572_vm5, %v1573_v39, %v1574_v49  ;;  %v1578_v21 = vsel %vm1572_vm5, %v1576_v55, %v1577_v60  ;;  %v1915_v59 = vld [vmem:[#allocation7 + $0xa0] sm:$0xff]  ;;  %v1916_v55 = vld [vmem:[#allocation7 + $0xa8] sm:$0xff] }
 0x283   : > { %8733 = vmatmul.mubr.msk.f32.gmra.mrb[10].mxu0 %vm1142_vm2, %v1425_v44  ;;  %v9285_v22 = vpack.c.bf16 %v1760_v33, %v1759_v4  ;;  %v1437_v23 = vsel %vm1413_vm4, %v1435_v30, %v1436_v63  ;;  %v1581_v31 = vsel %vm1572_vm5, %v1579_v2, %v1580_v54  ;;  %v1582_v36 = vrot.slane %v11123_v28, 2 }
 0x284   : > { %8735 = vmatprep.mubr.msk.f32.mxu0 %vm1142_vm2, %v1428_v40  ;;  %9280 = vmatpush3.bf16.msra.mxu0 %v9277_v6  ;;  %v2053_v6 = vrot.slane %v11138_v52, 6  ;;  %v1583_v27 = vrot.slane %v11159_v1, 2  ;;  %v1585_v38 = vrot.slane %v11120_v42, 2  ;;  %v11233_v39 = vsel %vm2048_vm6, %v2049_v3, %v2050_v16 }
 0x285   : > { %9282 = vmatprep.subr.bf16.mxu0 %v11187_v43  ;;  %v2055_v46 = vrot.slane %v11107_v32, 6  ;;  %v1586_v47 = vrot.slane %v11156_v61, 2  ;;  %v2056_v49 = vrot.slane %v11143_v53, 6  ;;  %v2058_v40 = vrot.slane %v11123_v28, 6 }
 0x286   : > { %3237 = vrot.lane.b32.xlu1 %v1054_v45, %s10493_s24  ;;  %3235 = vrot.lane.b32.xlu0 %v1053_v57, %s10493_s24  ;;  %v11236_v44 = vsel %vm2048_vm6, %v2052_v5, %v2053_v6  ;;  %v2059_v29 = vrot.slane %v11159_v1, 6  ;;  %v2061_v37 = vrot.slane %v11120_v42, 6  ;;  %v2062_v45 = vrot.slane %v11156_v61, 6 }
 0x287   : > { %8736 = vmatmul.mubr.msk.f32.gmra.mrb[12].mxu0 %vm1142_vm2, %v1431_v48  ;;  %v2064_v57 = vrot.slane %v11135_v51, 6  ;;  %v2065_v58 = vrot.slane %v11178_v62, 6  ;;  %v11249_v60 = vsel %vm2048_vm6, %v2055_v46, %v2056_v49  ;;  %v2067_v3 = vrot.slane %v11132_v50, 6  ;;  %v1917_v49 = vld [vmem:[#allocation7 + $0xb0] sm:$0xff] }
 0x288   : > { %8738 = vmatprep.mubr.msk.f32.mxu0 %vm1142_vm2, %v1434_v9  ;;  %v11252_v2 = vsel %vm2048_vm6, %v2058_v40, %v2059_v29  ;;  %v2068_v48 = vrot.slane %v11175_v25, 6  ;;  %v11258_v30 = vsel %vm2048_vm6, %v2061_v37, %v2062_v45  ;;  %v2070_v54 = vrot.slane %v11151_v56, 6  ;;  %v1918_v40 = vld [vmem:[#allocation7 + $0xb8] sm:$0xff] }
 0x289   : > { %v11261_v63 = vsel %vm2048_vm6, %v2064_v57, %v2065_v58  ;;  %v2071_v4 = vrot.slane %v11196_v35, 6  ;;  %v9289_v5 = vpack.c.bf16 %v1916_v55, %v1915_v59  ;;  %v1584_v9 = vsel %vm1572_vm5, %v1582_v36, %v1583_v27 }
 0x28a   : > { %3241 = vrot.lane.b32.xlu1 %v1056_v17, %s10493_s24  ;;  %3239 = vrot.lane.b32.xlu0 %v1055_v18, %s10493_s24  ;;  %v11268_v33 = vsel %vm2048_vm6, %v2067_v3, %v2068_v48  ;;  %v1588_v16 = vrot.slane %v11135_v51, 2  ;;  %v1589_v17 = vrot.slane %v11178_v62, 2  ;;  %v1587_v18 = vsel %vm1572_vm5, %v1585_v38, %v1586_v47  ;;  %v2074_v3 = vld [vmem:[#allocation7 + $0xc0] sm:$0xff]  ;;  %v2075_v48 = vld [vmem:[#allocation7 + $0xc8] sm:$0xff]  ;;  %s10036_s24 = smul.u32 6144, %s10613_s1  ;;  %s7844_s1 = scalar_lea.sflag [#allocation4], %s10887_s13 }
 0x28b   : > { %8739 = vmatmul.mubr.msk.f32.gmra.mrb[14].mxu0 %vm1142_vm2, %v1437_v23  ;;  %v11271_v6 = vsel %vm2048_vm6, %v2070_v54, %v2071_v4  ;;  %v1594_v23 = vrot.slane %v11151_v56, 2  ;;  %v1732_v27 = vrot.slane %v11101_v19, 4  ;;  %v1733_v38 = vrot.slane %v11117_v41, 4 }
 0x28c   : > { %8749 = vmatprep.mubr.msk.f32.mxu0 %vm1142_vm2, %v1575_v20  ;;  %v1592_v20 = vrot.slane %v11175_v25, 2  ;;  %v1736_v46 = vrot.slane %v11138_v52, 4  ;;  %v1738_v37 = vrot.slane %v11107_v32, 4  ;;  %v1739_v45 = vrot.slane %v11143_v53, 4 }
 0x28d   : > { %v1734_v29 = vsel %vm1731_vm7, %v1732_v27, %v1733_v38  ;;  %v9293_v57 = vpack.c.bf16 %v1918_v40, %v1917_v49  ;;  %v1741_v59 = vrot.slane %v11123_v28, 4  ;;  %v1742_v55 = vrot.slane %v11159_v1, 4  ;;  %v2076_v40 = vld [vmem:[#allocation7 + $0xd0] sm:$0xff] }
 0x28e   : > { %v1740_v54 = vsel %vm1731_vm7, %v1738_v37, %v1739_v45  ;;  %v1744_v4 = vrot.slane %v11120_v42, 4  ;;  %v1890_v38 = vrot.slane %v11101_v19, 5  ;;  %v1896_v45 = vrot.slane %v11107_v32, 5 }
 0x28f   : > { %8750 = vmatmul.mubr.msk.f32.vlgmr.msra.gmra.mrb[8].mxu0 %vm1142_vm2, %v1578_v21  ;;  %v1590_v21 = vsel %vm1572_vm5, %v1588_v16, %v1589_v17  ;;  %v9297_v16 = vpack.c.bf16 %v2075_v48, %v2074_v3  ;;  %v1743_v17 = vsel %vm1731_vm7, %v1741_v59, %v1742_v55  ;;  %v1897_v19 = vrot.slane %v11143_v53, 5  ;;  %v3245_v59 = vld [vmem:[#allocation10 + $0x68] sm:$0xff] }
 0x290   : > { %8752 = vmatprep.mubr.msk.f32.mxu0 %vm1142_vm2, %v1581_v31  ;;  %9284 = vmatpush3.bf16.msra.mxu0 %v11187_v43  ;;  %v1591_v43 = vrot.slane %v11132_v50, 2  ;;  %v1595_v31 = vrot.slane %v11196_v35, 2  ;;  %v1902_v3 = vrot.slane %v11120_v42, 5  ;;  %v1903_v32 = vrot.slane %v11156_v61, 5 }
 0x291   : > { %9286 = vmatprep.subr.bf16.mxu0 %v9285_v22  ;;  %v1898_v55 = vsel %vm1097_vm3, %v1896_v45, %v1897_v19  ;;  %v1909_v42 = vrot.slane %v11175_v25, 5  ;;  %v3613_v45 = vld [vmem:[#allocation10 + $0x48] sm:$0xff]  ;;  %v3615_v19 = vld [vmem:[#allocation10 + $0x58] sm:$0xff] }
 0x292   : > { %v1593_v36 = vsel %vm1572_vm5, %v1591_v43, %v1592_v20  ;;  %v1596_v47 = vsel %vm1572_vm5, %v1594_v23, %v1595_v31  ;;  %v1748_v43 = vrot.slane %v11178_v62, 4  ;;  %v1751_v23 = vrot.slane %v11175_v25, 4  ;;  %v3247_v25 = vld [vmem:[#allocation10 + $0x78] sm:$0xff] }
 0x293   : > { %8753 = vmatmul.mubr.msk.f32.gmra.mrb[10].mxu0 %vm1142_vm2, %v1584_v9  ;;  %v1745_v9 = vrot.slane %v11156_v61, 4  ;;  %v1753_v31 = vrot.slane %v11151_v56, 4 }
 0x294   : > { %8755 = vmatprep.mubr.msk.f32.mxu0 %vm1142_vm2, %v1587_v18  ;;  %9288 = vmatpush3.bf16.msra.mxu0 %v9285_v22  ;;  %v1735_v22 = vrot.slane %v11110_v34, 4  ;;  %v1747_v18 = vrot.slane %v11135_v51, 4 }
 0x295   : > { %9290 = vmatprep.subr.bf16.mxu0 %v9289_v5  ;;  %v1746_v20 = vsel %vm1731_vm7, %v1744_v4, %v1745_v9  ;;  %v1908_v4 = vrot.slane %v11132_v50, 5  ;;  %v1911_v9 = vrot.slane %v11151_v56, 5  ;;  %v3377_v56 = vld [vmem:[#allocation10 + $0x8] sm:$0xff] }
 0x296   : > { %v1737_v58 = vsel %vm1731_vm7, %v1735_v22, %v1736_v46  ;;  %v1891_v22 = vrot.slane %v11117_v41, 5  ;;  %v1893_v46 = vrot.slane %v11110_v34, 5  ;;  %v1899_v34 = vrot.slane %v11123_v28, 5 }
 0x297   : > { %8756 = vmatmul.mubr.msk.f32.gmra.mrb[12].mxu0 %vm1142_vm2, %v1590_v21  ;;  %v1750_v21 = vrot.slane %v11132_v50, 4  ;;  %v1905_v28 = vrot.slane %v11135_v51, 5  ;;  %v1912_v51 = vrot.slane %v11196_v35, 5 }
 0x298   : > { %8758 = vmatprep.mubr.msk.f32.mxu0 %vm1142_vm2, %v1593_v36  ;;  %v1754_v36 = vrot.slane %v11196_v35, 4  ;;  %v1892_v37 = vsel %vm1097_vm3, %v1890_v38, %v1891_v22  ;;  %v3494_v38 = vld [vmem:[#allocation10 + $0x20] sm:$0xff]  ;;  %v3495_v22 = vld [vmem:[#allocation10 + $0x28] sm:$0xff] }
 0x299   : > { %v1752_v27 = vsel %vm1731_vm7, %v1750_v21, %v1751_v23  ;;  %v1913_v50 = vsel %vm1097_vm3, %v1911_v9, %v1912_v51  ;;  %v2219_v21 = vld [vmem:[#allocation8 + $0xd8] sm:$0xff] }
 0x29a   : > { %v1755_v49 = vsel %vm1731_vm7, %v1753_v31, %v1754_v36  ;;  %v2218_v31 = vld [vmem:[#allocation8 + $0xd0] sm:$0xff]  ;;  %v3851_v9 = vld [vmem:[#allocation10 + $0xb8] sm:$0xff] }
 0x29b   : > { %8759 = vmatmul.mubr.msk.f32.gmra.mrb[14].mxu0 %vm1142_vm2, %v1596_v47  ;;  %v1894_v47 = vrot.slane %v11138_v52, 5  ;;  %v1900_v52 = vrot.slane %v11159_v1, 5  ;;  %v1906_v1 = vrot.slane %v11178_v62, 5  ;;  %v1910_v62 = vsel %vm1097_vm3, %v1908_v4, %v1909_v42  ;;  %v3849_v4 = vld [vmem:[#allocation10 + $0xa8] sm:$0xff] }
 0x29c   : > { %8769 = vmatprep.mubr.msk.f32.mxu0 %vm1142_vm2, %v1734_v29  ;;  %v2077_v29 = vld [vmem:[#allocation7 + $0xd8] sm:$0xff] }
 0x29d   : > { %v9301_v41 = vpack.c.bf16 %v2077_v29, %v2076_v40  ;;  %v1901_v48 = vsel %vm1097_vm3, %v1899_v34, %v1900_v52  ;;  %v1907_v61 = vsel %vm1097_vm3, %v1905_v28, %v1906_v1  ;;  %v3496_v40 = vld [vmem:[#allocation10 + $0x30] sm:$0xff]  ;;  %v3497_v29 = vld [vmem:[#allocation10 + $0x38] sm:$0xff]  ;;  %v3731_v34 = vld [vmem:[#allocation10 + $0x88] sm:$0xff] }
 0x29e   : > { %v3733_v28 = vld [vmem:[#allocation10 + $0x98] sm:$0xff] }
 0x29f   : > { %8770 = vmatmul.mubr.msk.f32.vlgmr.msra.gmra.mrb[8].mxu0 %vm1142_vm2, %v1737_v58  ;;  %v3244_v58 = vld [vmem:[#allocation10 + $0x60] sm:$0xff] }
 0x2a0   : > { %8772 = vmatprep.mubr.msk.f32.mxu0 %vm1142_vm2, %v1740_v54  ;;  %9292 = vmatpush3.bf16.msra.mxu0 %v9289_v5  ;;  %v1749_v5 = vsel %vm1731_vm7, %v1747_v18, %v1748_v43  ;;  %v9361_v53 = vpack.c.bf16 %v3245_v59, %v3244_v58  ;;  %v1904_v54 = vsel %vm1097_vm3, %v1902_v3, %v1903_v32  ;;  %v3376_v18 = vld [vmem:[#allocation10] sm:$0xff]  ;;  %v2221_v58 = vld [vmem:[#allocation8 + $0xe8] sm:$0xff]  ;;  %v2223_v59 = vld [vmem:[#allocation8 + $0xf8] sm:$0xff] }
 0x2a1   : > { %9294 = vmatprep.subr.bf16.mxu0 %v9293_v57  ;;  %v9369_v35 = vpack.c.bf16 %v3377_v56, %v3376_v18  ;;  %v9309_v3 = vpack.c.bf16 %v2223_v59, %v2221_v58  ;;  %v2222_v32 = vld [vmem:[#allocation8 + $0xf0] sm:$0xff] }
 0x2a2   : > { %v3968_v56 = vld [vmem:[#allocation10 + $0xd0] sm:$0xff] }
 0x2a3   : > { %8773 = vmatmul.mubr.msk.f32.gmra.mrb[10].mxu0 %vm1142_vm2, %v1743_v17 }
 0x2a4   : > { %8775 = vmatprep.mubr.msk.f32.mxu0 %vm1142_vm2, %v1746_v20  ;;  %9296 = vmatpush3.bf16.msra.mxu0 %v9293_v57  ;;  %v1895_v57 = vsel %vm1097_vm3, %v1893_v46, %v1894_v47  ;;  %v702_v20 = vld [vmem:[#allocation5 + $0x30] sm:$0xff]  ;;  %v9377_v46 = vpack.c.bf16 %v3495_v22, %v3494_v38  ;;  %v2515_v38 = vld [vmem:[#allocation8 + $0x48] sm:$0xff]  ;;  %v2517_v22 = vld [vmem:[#allocation8 + $0x58] sm:$0xff] }
 0x2a5   : > { %9298 = vmatprep.subr.bf16.mxu0 %v9297_v16 }
 0x2a7   : > { %8776 = vmatmul.mubr.msk.f32.gmra.mrb[12].mxu0 %vm1142_vm2, %v1749_v5  ;;  %v2216_v5 = vld [vmem:[#allocation8 + $0xc0] sm:$0xff] }
 0x2a8   : > { %8778 = vmatprep.mubr.msk.f32.mxu0 %vm1142_vm2, %v1752_v27 }
 0x2ab   : > { %8779 = vmatmul.mubr.msk.f32.gmra.mrb[14].mxu0 %vm1142_vm2, %v1755_v49 }
 0x2ac   : > { %8789 = vmatprep.mubr.msk.f32.mxu0 %vm1142_vm2, %v1892_v37  ;;  %v3612_v37 = vld [vmem:[#allocation10 + $0x40] sm:$0xff] }
 0x2af   : > { %8790 = vmatmul.mubr.msk.f32.vlgmr.msra.gmra.mrb[8].mxu0 %vm1142_vm2, %v1895_v57  ;;  %v3730_v57 = vld [vmem:[#allocation10 + $0x80] sm:$0xff] }
 0x2b0   : > { %8792 = vmatprep.mubr.msk.f32.mxu0 %vm1142_vm2, %v1898_v55  ;;  %9300 = vmatpush3.bf16.msra.mxu0 %v9297_v16  ;;  %v3246_v16 = vld [vmem:[#allocation10 + $0x70] sm:$0xff]  ;;  %v9393_v52 = vpack.c.bf16 %v3731_v34, %v3730_v57  ;;  %v2220_v55 = vld [vmem:[#allocation8 + $0xe0] sm:$0xff] }
 0x2b1   : > { %9302 = vmatprep.subr.bf16.mxu0 %v9301_v41  ;;  %v9365_v17 = vpack.c.bf16 %v3247_v25, %v3246_v16  ;;  %v3966_v16 = vld [vmem:[#allocation10 + $0xc0] sm:$0xff]  ;;  %v3967_v25 = vld [vmem:[#allocation10 + $0xc8] sm:$0xff] }
 0x2b2   : > { %v9409_v18 = vpack.c.bf16 %v3967_v25, %v3966_v16  ;;  %v2653_v16 = vld [vmem:[#allocation8 + $0x88] sm:$0xff]  ;;  %v2655_v25 = vld [vmem:[#allocation8 + $0x98] sm:$0xff] }
 0x2b3   : > { %8793 = vmatmul.mubr.msk.f32.gmra.mrb[10].mxu0 %vm1142_vm2, %v1901_v48  ;;  %v3732_v48 = vld [vmem:[#allocation10 + $0x90] sm:$0xff] }
 0x2b4   : > { %8795 = vmatprep.mubr.msk.f32.mxu0 %vm1142_vm2, %v1904_v54  ;;  %9304 = vmatpush3.bf16.msra.mxu0 %v9301_v41  ;;  %v9397_v1 = vpack.c.bf16 %v3733_v28, %v3732_v48  ;;  %v3848_v54 = vld [vmem:[#allocation10 + $0xa0] sm:$0xff]  ;;  %v2516_v28 = vld [vmem:[#allocation8 + $0x50] sm:$0xff] }
 0x2b5   : > { %9362 = vmatprep.subr.bf16.mxu0 %v9361_v53  ;;  %v9401_v42 = vpack.c.bf16 %v3849_v4, %v3848_v54  ;;  %v2514_v48 = vld [vmem:[#allocation8 + $0x40] sm:$0xff]  ;;  %v2521_v54 = vld [vmem:[#allocation8 + $0x78] sm:$0xff] }
 0x2b6   : > { %v4264_v4 = vld [vmem:[#allocation11] sm:$0xff] }
 0x2b7   : > { %8796 = vmatmul.mubr.msk.f32.gmra.mrb[12].mxu0 %vm1142_vm2, %v1907_v61  ;;  %v3850_v61 = vld [vmem:[#allocation10 + $0xb0] sm:$0xff] }
 0x2b8   : > { %8798 = vmatprep.mubr.msk.f32.mxu0 %vm1142_vm2, %v1910_v62  ;;  %v9405_v51 = vpack.c.bf16 %v3851_v9, %v3850_v61  ;;  %v2374_v62 = vld [vmem:[#allocation8 + $0x8] sm:$0xff]  ;;  %v9323_v9 = vpack.c.bf16 %v2516_v28, %v2514_v48 }
 0x2bb   : > { %8799 = vmatmul.mubr.msk.f32.gmra.mrb[14].mxu0 %vm1142_vm2, %v1913_v50  ;;  %v2376_v50 = vld [vmem:[#allocation8 + $0x18] sm:$0xff] }
 0x2bc   : > { %8809 = vmatprep.mubr.msk.f32.mxu0 %vm1142_vm2, %v11233_v39  ;;  %v699_v39 = vld [vmem:[#allocation5 + $0x18] sm:$0xff] }
 0x2bf   : > { %8810 = vmatmul.mubr.msk.f32.vlgmr.msra.gmra.mrb[8].mxu0 %vm1142_vm2, %v11236_v44  ;;  %v703_v44 = vld [vmem:[#allocation5 + $0x38] sm:$0xff] }
 0x2c0   : > { %8812 = vmatprep.mubr.msk.f32.mxu0 %vm1142_vm2, %v11249_v60  ;;  %9364 = vmatpush3.bf16.msra.mxu0 %v9361_v53  ;;  %v698_v60 = vld [vmem:[#allocation5 + $0x10] sm:$0xff]  ;;  %v9245_v43 = vpack.c.bf16 %v703_v44, %v699_v39  ;;  %v9311_v53 = vpack.c.bf16 %v2222_v32, %v2220_v55  ;;  %v8037_v44 = vld [vmem:[%s13140_s7] ss:$0 sm:$0xff] }
 0x2c1   : > { %9366 = vmatprep.subr.bf16.mxu0 %v9365_v17  ;;  %v9247_v23 = vpack.c.bf16 %v702_v20, %v698_v60  ;;  %v2375_v20 = vld [vmem:[#allocation8 + $0x10] sm:$0xff] }
 0x2c2   : > { %9246 = vmatprep.subr.bf16.mxu1 %v9245_v43  ;;  %v2373_v43 = vld [vmem:[#allocation8] sm:$0xff] }
 0x2c3   : > { %8813 = vmatmul.mubr.msk.f32.gmra.mrb[10].mxu0 %vm1142_vm2, %v11252_v2  ;;  %v2217_v2 = vld [vmem:[#allocation8 + $0xc8] sm:$0xff]  ;;  %9248 = vmatpush1.bf16.msra.mxu1 %v9247_v23  ;;  %v2380_v23 = vld [vmem:[#allocation8 + $0x38] sm:$0xff] }
 0x2c4   : > { %8815 = vmatprep.mubr.msk.f32.mxu0 %vm1142_vm2, %v11258_v30  ;;  %9368 = vmatpush3.bf16.msra.mxu0 %v9365_v17  ;;  %v9305_v30 = vpack.c.bf16 %v2219_v21, %v2217_v2  ;;  %v9313_v17 = vpack.c.bf16 %v2376_v50, %v2374_v62  ;;  %v2378_v21 = vld [vmem:[#allocation8 + $0x28] sm:$0xff]  ;;  %v2518_v62 = vld [vmem:[#allocation8 + $0x60] sm:$0xff]  ;;  %v2520_v50 = vld [vmem:[#allocation8 + $0x70] sm:$0xff] }
 0x2c5   : > { %9370 = vmatprep.subr.bf16.mxu0 %v9369_v35 }
 0x2c6   : > { %9306 = vmatprep.subr.bf16.mxu1 %v9305_v30  ;;  %8027 = vmatmul.mubr.msk.f32.vlgmr.msra.gmra.mrb[8].mxu1 %vm712_vm0, %v10916_v7 }
 0x2c7   : > { %8816 = vmatmul.mubr.msk.f32.gmra.mrb[12].mxu0 %vm1142_vm2, %v11261_v63  ;;  %v9307_v63 = vpack.c.bf16 %v2218_v31, %v2216_v5  ;;  %920 = vmatprep.mubr.f32.mxu1 %v13167_v0  ;;  %v9315_v5 = vpack.c.bf16 %v2375_v20, %v2373_v43  ;;  %v2656_v20 = vld [vmem:[#allocation8 + $0xa0] sm:$0xff] }
 0x2c8   : > { %8818 = vmatprep.mubr.msk.f32.mxu0 %vm1142_vm2, %v11268_v33  ;;  %v3378_v33 = vld [vmem:[#allocation10 + $0x10] sm:$0xff] }
 0x2c9   : > { %9308 = vmatpush1.bf16.msra.mxu1 %v9307_v63 }
 0x2ca   : > { %8028 = vmatmul.mubr.msk.f32.gmra.mrb[10].mxu1 %vm712_vm0, %v10932_v10  ;;  %9310 = vmatprep.subr.bf16.mxu1 %v9309_v3 }
 0x2cb   : > { %8819 = vmatmul.mubr.msk.f32.gmra.mrb[14].mxu0 %vm1142_vm2, %v11271_v6  ;;  %926 = vmatprep.mubr.f32.mxu1 %v13167_v0  ;;  %v3379_v6 = vld [vmem:[#allocation10 + $0x18] sm:$0xff] }
 0x2cc   : > { %v9373_v7 = vpack.c.bf16 %v3379_v6, %v3378_v33  ;;  %v9317_v6 = vpack.c.bf16 %v2380_v23, %v2378_v21  ;;  %v2791_v21 = vld [vmem:[#allocation8 + $0x108] sm:$0xff]  ;;  %v2793_v23 = vld [vmem:[#allocation8 + $0x118] sm:$0xff] }
 0x2cd   : > { %9312 = vmatpush1.bf16.msra.mxu1 %v9311_v53 }
 0x2ce   : > { %8029 = vmatmul.mubr.msk.f32.gmra.mrb[12].mxu1 %vm712_vm0, %v10944_v12  ;;  %9314 = vmatprep.subr.bf16.mxu1 %v9313_v17  ;;  %v9327_v17 = vpack.c.bf16 %v2520_v50, %v2518_v62 }
 0x2cf   : > { %932 = vmatprep.mubr.f32.mxu1 %v13167_v0 }
 0x2d2   : > { %8030 = vmatmul.mubr.msk.f32.gmra.mrb[14].mxu1 %vm712_vm0, %v10956_v14 }
 0x2d3   : > { %938 = vmatprep.mubr.f32.mxu1 %v13167_v0 }
 0x2d6   : > { %8031 = vmatmul.mubr.msk.f32.gmra.mrb[16].mxu1 %vm712_vm0, %v10919_v8 }
 0x2d7   : > { %944 = vmatprep.mubr.f32.mxu1 %v13167_v0 }
 0x2da   : > { %8032 = vmatmul.mubr.msk.f32.gmra.mrb[18].mxu1 %vm712_vm0, %v10935_v11  ;;  %v9381_v11 = vpack.c.bf16 %v3497_v29, %v3496_v40 }
 0x2db   : > { %950 = vmatprep.mubr.f32.mxu1 %v13167_v0 }
 0x2de   : > { %8033 = vmatmul.mubr.msk.f32.gmra.mrb[20].mxu1 %vm712_vm0, %v10947_v13  ;;  %v9385_v13 = vpack.c.bf16 %v3613_v45, %v3612_v37 }
 0x2df   : > { %956 = vmatprep.mubr.f32.mxu1 %v13167_v0 }
 0x2e2   : > { %8034 = vmatmul.mubr.msk.f32.gmra.mrb[22].mxu1 %vm712_vm0, %v10959_v15  ;;  %v3614_v15 = vld [vmem:[#allocation10 + $0x50] sm:$0xff] }
 0x2e3   : > { %2324 = vmatprep.mubr.f32.mxu1 %v13167_v0  ;;  %v9389_v41 = vpack.c.bf16 %v3615_v19, %v3614_v15  ;;  %v4134_v15 = vld [vmem:[#allocation11 + $0x70] sm:$0xff]  ;;  %v4135_v19 = vld [vmem:[#allocation11 + $0x78] sm:$0xff] }
 0x2e4   : > { %v9421_v34 = vpack.c.bf16 %v4135_v19, %v4134_v15  ;;  %v3067_v15 = vld [vmem:[#allocation8 + $0x188] sm:$0xff]  ;;  %v3069_v19 = vld [vmem:[#allocation8 + $0x198] sm:$0xff] }
 0x2f0   : > { %v11378_v36 = vpop.permute.xlu1 %3229  ;;  %v11380_v27 = vpop.permute.xlu0 %3227 }
 0x2f1   : > { %8829 = vmatprep.mubr.msk.f32.mxu0 %vm1142_vm2, %v11380_v27 }
 0x2f2   : > { %8830 = vmatmul.mubr.msk.f32.vlgmr.msra.gmra.mrb[16].mxu0 %vm1142_vm2, %v11378_v36 }
 0x2f3   : > { %9372 = vmatpush3.bf16.msra.mxu0 %v9369_v35  ;;  %v3969_v35 = vld [vmem:[#allocation10 + $0xd8] sm:$0xff] }
 0x2f4   : > { %v11389_v10 = vpop.permute.xlu1 %3233  ;;  %v11391_v12 = vpop.permute.xlu0 %3231  ;;  %9374 = vmatprep.subr.bf16.mxu0 %v9373_v7  ;;  %v9413_v39 = vpack.c.bf16 %v3969_v35, %v3968_v56  ;;  %v2652_v56 = vld [vmem:[#allocation8 + $0x80] sm:$0xff]  ;;  %v2654_v35 = vld [vmem:[#allocation8 + $0x90] sm:$0xff] }
 0x2f5   : > { %8832 = vmatprep.mubr.msk.f32.mxu0 %vm1142_vm2, %v11391_v12 }
 0x2f6   : > { %8833 = vmatmul.mubr.msk.f32.gmra.mrb[18].mxu0 %vm1142_vm2, %v11389_v10 }
 0x2f7   : > { %9376 = vmatpush3.bf16.msra.mxu0 %v9373_v7 }
 0x2f8   : > { %v11400_v14 = vpop.permute.xlu1 %3237  ;;  %v11402_v47 = vpop.permute.xlu0 %3235  ;;  %9378 = vmatprep.subr.bf16.mxu0 %v9377_v46 }
 0x2f9   : > { %8835 = vmatprep.mubr.msk.f32.mxu0 %vm1142_vm2, %v11402_v47 }
 0x2fa   : > { %8836 = vmatmul.mubr.msk.f32.gmra.mrb[20].mxu0 %vm1142_vm2, %v11400_v14 }
 0x2fc   : > { %v11411_v8 = vpop.permute.xlu1 %3241  ;;  %v11413_v49 = vpop.permute.xlu0 %3239 }
 0x2fd   : > { %8838 = vmatprep.mubr.msk.f32.mxu0 %vm1142_vm2, %v11413_v49 }
 0x2fe   : > { %8839 = vmatmul.mubr.msk.f32.gmra.mrb[22].mxu0 %vm1142_vm2, %v11411_v8 }
 0x2ff   : > { %8849 = vmatprep.mubr.f32.mxu0 %v13167_v0 }
 0x302   : > { %8850 = vmatmul.mubr.f32.vlgmr.msra.gmra.mrb[16].mxu0 %v13167_v0 }
 0x303   : > { %9380 = vmatpush3.bf16.msra.mxu0 %v9377_v46  ;;  %8852 = vmatprep.mubr.f32.mxu0 %v13167_v0  ;;  %v4133_v46 = vld [vmem:[#allocation11 + $0x68] sm:$0xff] }
 0x304   : > { %9382 = vmatprep.subr.bf16.mxu0 %v9381_v11 }
 0x306   : > { %8853 = vmatmul.mubr.msk.f32.gmra.mrb[18].mxu0 %vm1142_vm2, %v11380_v27 }
 0x307   : > { %8855 = vmatprep.mubr.msk.f32.mxu0 %vm1142_vm2, %v11378_v36  ;;  %9384 = vmatpush3.bf16.msra.mxu0 %v9381_v11 }
 0x308   : > { %9386 = vmatprep.subr.bf16.mxu0 %v9385_v13 }
 0x30a   : > { %8856 = vmatmul.mubr.msk.f32.gmra.mrb[20].mxu0 %vm1142_vm2, %v11391_v12 }
 0x30b   : > { %8858 = vmatprep.mubr.msk.f32.mxu0 %vm1142_vm2, %v11389_v10 }
 0x30e   : > { %8859 = vmatmul.mubr.msk.f32.gmra.mrb[22].mxu0 %vm1142_vm2, %v11402_v47 }
 0x30f   : > { %8869 = vmatprep.mubr.f32.mxu0 %v13167_v0 }
 0x312   : > { %8870 = vmatmul.mubr.f32.vlgmr.msra.gmra.mrb[16].mxu0 %v13167_v0 }
 0x313   : > { %9388 = vmatpush3.bf16.msra.mxu0 %v9385_v13  ;;  %8872 = vmatprep.mubr.msk.f32.mxu0 %vm1142_vm2, %v11380_v27 }
 0x314   : > { %9390 = vmatprep.subr.bf16.mxu0 %v9389_v41 }
 0x316   : > { %8873 = vmatmul.mubr.msk.f32.gmra.mrb[18].mxu0 %vm1142_vm2, %v11378_v36 }
 0x317   : > { %8875 = vmatprep.mubr.msk.f32.mxu0 %vm1142_vm2, %v11391_v12  ;;  %9392 = vmatpush3.bf16.msra.mxu0 %v9389_v41 }
 0x318   : > { %9394 = vmatprep.subr.bf16.mxu0 %v9393_v52 }
 0x31a   : > { %8876 = vmatmul.mubr.msk.f32.gmra.mrb[20].mxu0 %vm1142_vm2, %v11389_v10 }
 0x31b   : > { %8878 = vmatprep.mubr.msk.f32.mxu0 %vm1142_vm2, %v11402_v47 }
 0x31e   : > { %8879 = vmatmul.mubr.msk.f32.gmra.mrb[22].mxu0 %vm1142_vm2, %v11400_v14 }
 0x31f   : > { %8889 = vmatprep.mubr.f32.mxu0 %v13167_v0 }
 0x322   : > { %8890 = vmatmul.mubr.msk.f32.vlgmr.msra.gmra.mrb[16].mxu0 %vm1142_vm2, %v11380_v27  ;;  %v2379_v27 = vld [vmem:[#allocation8 + $0x30] sm:$0xff] }
 0x323   : > { %9396 = vmatpush3.bf16.msra.mxu0 %v9393_v52  ;;  %8892 = vmatprep.mubr.msk.f32.mxu0 %vm1142_vm2, %v11378_v36 }
 0x324   : > { %9398 = vmatprep.subr.bf16.mxu0 %v9397_v1 }
 0x326   : > { %8893 = vmatmul.mubr.msk.f32.gmra.mrb[18].mxu0 %vm1142_vm2, %v11391_v12 }
 0x327   : > { %8895 = vmatprep.mubr.msk.f32.mxu0 %vm1142_vm2, %v11389_v10  ;;  %9400 = vmatpush3.bf16.msra.mxu0 %v9397_v1  ;;  %v2519_v1 = vld [vmem:[#allocation8 + $0x68] sm:$0xff] }
 0x328   : > { %9402 = vmatprep.subr.bf16.mxu0 %v9401_v42 }
 0x32a   : > { %8896 = vmatmul.mubr.msk.f32.gmra.mrb[20].mxu0 %vm1142_vm2, %v11402_v47 }
 0x32b   : > { %8898 = vmatprep.mubr.msk.f32.mxu0 %vm1142_vm2, %v11400_v14 }
 0x32e   : > { %8899 = vmatmul.mubr.msk.f32.gmra.mrb[22].mxu0 %vm1142_vm2, %v11413_v49 }
 0x32f   : > { %8909 = vmatprep.mubr.msk.f32.mxu0 %vm1142_vm2, %v11378_v36  ;;  %v2377_v36 = vld [vmem:[#allocation8 + $0x20] sm:$0xff] }
 0x332   : > { %8910 = vmatmul.mubr.msk.f32.vlgmr.msra.gmra.mrb[16].mxu0 %vm1142_vm2, %v11391_v12 }
 0x333   : > { %9404 = vmatpush3.bf16.msra.mxu0 %v9401_v42  ;;  %8912 = vmatprep.mubr.msk.f32.mxu0 %vm1142_vm2, %v11389_v10  ;;  %v4265_v42 = vld [vmem:[#allocation11 + $0x8] sm:$0xff] }
 0x334   : > { %9406 = vmatprep.subr.bf16.mxu0 %v9405_v51  ;;  %v11551_v61 = vpack.c.bf16 %v4265_v42, %v4264_v4 }
 0x336   : > { %8913 = vmatmul.mubr.msk.f32.gmra.mrb[18].mxu0 %vm1142_vm2, %v11402_v47 }
 0x337   : > { %8915 = vmatprep.mubr.msk.f32.mxu0 %vm1142_vm2, %v11400_v14  ;;  %9408 = vmatpush3.bf16.msra.mxu0 %v9405_v51  ;;  %v9325_v51 = vpack.c.bf16 %v2521_v54, %v2519_v1 }
 0x338   : > { %9410 = vmatprep.subr.bf16.mxu0 %v9409_v18 }
 0x33a   : > { %8916 = vmatmul.mubr.msk.f32.gmra.mrb[20].mxu0 %vm1142_vm2, %v11413_v49 }
 0x33b   : > { %8918 = vmatprep.mubr.msk.f32.mxu0 %vm1142_vm2, %v11411_v8 }
 0x33e   : > { %8919 = vmatmul.mubr.f32.gmra.mrb[22].mxu0 %v13167_v0 }
 0x33f   : > { %8929 = vmatprep.mubr.msk.f32.mxu0 %vm1142_vm2, %v11391_v12  ;;  %v4132_v12 = vld [vmem:[#allocation11 + $0x60] sm:$0xff] }
 0x340   : > { %v9417_v40 = vpack.c.bf16 %v4133_v46, %v4132_v12  ;;  %v2931_v12 = vld [vmem:[#allocation8 + $0x158] sm:$0xff] }
 0x342   : > { %8930 = vmatmul.mubr.msk.f32.vlgmr.msra.gmra.mrb[16].mxu0 %vm1142_vm2, %v11389_v10 }
 0x343   : > { %9412 = vmatpush3.bf16.msra.mxu0 %v9409_v18  ;;  %8932 = vmatprep.mubr.msk.f32.mxu0 %vm1142_vm2, %v11402_v47  ;;  %v9329_v18 = vpack.c.bf16 %v2655_v25, %v2653_v16 }
 0x344   : > { %9414 = vmatprep.subr.bf16.mxu0 %v9413_v39 }
 0x346   : > { %8933 = vmatmul.mubr.msk.f32.gmra.mrb[18].mxu0 %vm1142_vm2, %v11400_v14 }
 0x347   : > { %8935 = vmatprep.mubr.msk.f32.mxu0 %vm1142_vm2, %v11413_v49  ;;  %9416 = vmatpush3.bf16.msra.mxu0 %v9413_v39  ;;  %v2657_v39 = vld [vmem:[#allocation8 + $0xa8] sm:$0xff] }
 0x348   : > { %9418 = vmatprep.subr.bf16.mxu0 %v9417_v40 }
 0x34a   : > { %8936 = vmatmul.mubr.msk.f32.gmra.mrb[20].mxu0 %vm1142_vm2, %v11411_v8 }
 0x34b   : > { %8938 = vmatprep.mubr.f32.mxu0 %v13167_v0 }
 0x34e   : > { %8939 = vmatmul.mubr.f32.gmra.mrb[22].mxu0 %v13167_v0 }
 0x34f   : > { %8949 = vmatprep.mubr.msk.f32.mxu0 %vm1142_vm2, %v11389_v10  ;;  %v9319_v10 = vpack.c.bf16 %v2379_v27, %v2377_v36  ;;  %v2797_v36 = vld [vmem:[#allocation8 + $0x138] sm:$0xff] }
 0x352   : > { %8950 = vmatmul.mubr.msk.f32.vlgmr.msra.gmra.mrb[16].mxu0 %vm1142_vm2, %v11402_v47 }
 0x353   : > { %8952 = vmatprep.mubr.msk.f32.mxu0 %vm1142_vm2, %v11400_v14  ;;  %9420 = vmatpush3.bf16.msra.mxu0 %v9417_v40  ;;  %v2935_v40 = vld [vmem:[#allocation8 + $0x178] sm:$0xff] }
 0x354   : > { %9422 = vmatprep.subr.bf16.mxu0 %v9421_v34 }
 0x356   : > { %8953 = vmatmul.mubr.msk.f32.gmra.mrb[18].mxu0 %vm1142_vm2, %v11413_v49  ;;  %v9321_v49 = vpack.c.bf16 %v2517_v22, %v2515_v38  ;;  %v2794_v38 = vld [vmem:[#allocation8 + $0x120] sm:$0xff]  ;;  %v2796_v22 = vld [vmem:[#allocation8 + $0x130] sm:$0xff] }
 0x357   : > { %8955 = vmatprep.mubr.msk.f32.mxu0 %vm1142_vm2, %v11411_v8  ;;  %9424 = vmatpush3.bf16.msra.mxu0 %v9421_v34  ;;  %v9343_v46 = vpack.c.bf16 %v2796_v22, %v2794_v38  ;;  %v9353_v34 = vpack.c.bf16 %v3069_v19, %v3067_v15  ;;  %v11709_v15 = vld [vmem:[#allocation8 + $0x190] sm:$0xff] }
 0x358   : > { %9426 = vmatprep.subr.bf16.mxu0 %v11551_v61  ;;  %v4598_v19 = vld [vmem:[#allocation11 + $0x50] sm:$0xff] }
 0x35a   : > { %8956 = vmatmul.mubr.f32.gmra.mrb[20].mxu0 %v13167_v0 }
 0x35b   : > { %8958 = vmatprep.mubr.f32.mxu0 %v13167_v0 }
 0x35e   : > { %8959 = vmatmul.mubr.f32.gmra.mrb[22].mxu0 %v13167_v0 }
 0x392   : > { %v8811_v60 = vpop.f32.mrb[8].mxu0 }
 0x393   : > { %v2160_v2 = vpop.f32.mrb[9].mxu0  ;;  %v9587_v31 = vadd.f32 %v8811_v60, %v8037_v44  ;;  %v9331_v60 = vpack.c.bf16 %v2654_v35, %v2652_v56 }
 0x394   : > { %v9588_v30 = vadd.f32 %v8037_v44, %v2160_v2  ;;  %v2658_v2 = vld [vmem:[#allocation8 + $0xb0] sm:$0xff] }
 0x395   : > { %v11517_v14 = vmax.f32 %v9587_v31, 0.0  ;;  %v2790_v31 = vld [vmem:[#allocation8 + $0x100] sm:$0xff] }
 0x396   : > { %v11512_v63 = vmax.f32 %v9588_v30, 0.0  ;;  %v8814_v33 = vpop.f32.mrb[10].mxu0  ;;  %v9335_v30 = vpack.c.bf16 %v2658_v2, %v2656_v20 }
 0x397   : > { %v2170_v7 = vpop.f32.mrb[11].mxu0  ;;  %v9589_v11 = vadd.f32 %v8814_v33, %v8037_v44  ;;  %v2792_v33 = vld [vmem:[#allocation8 + $0x110] sm:$0xff] }
 0x398   : > { %8094 = vmatmul.mubr.msk.f32.vlgmr.msra.gmra.mrb[24].mxu1 %vm1142_vm2, %v11512_v63  ;;  %v9590_v47 = vadd.f32 %v8037_v44, %v2170_v7  ;;  %v9339_v27 = vpack.c.bf16 %v2792_v33, %v2790_v31  ;;  %v4266_v31 = vld [vmem:[#allocation11 + $0x10] sm:$0xff]  ;;  %v4267_v33 = vld [vmem:[#allocation11 + $0x18] sm:$0xff] }
 0x399   : > { %2330 = vmatprep.mubr.f32.mxu1 %v13167_v0  ;;  %9316 = vmatpush1.bf16.msra.mxu1 %v9315_v5  ;;  %v11527_v41 = vmax.f32 %v9589_v11, 0.0  ;;  %v9337_v5 = vpack.c.bf16 %v2793_v23, %v2791_v21 }
 0x39a   : > { %v8817_v8 = vpop.f32.mrb[12].mxu0  ;;  %9318 = vmatprep.subr.bf16.mxu1 %v9317_v6  ;;  %v11522_v37 = vmax.f32 %v9590_v47, 0.0  ;;  %v2795_v6 = vld [vmem:[#allocation8 + $0x128] sm:$0xff] }
 0x39b   : > { %v2180_v29 = vpop.f32.mrb[13].mxu0  ;;  %v9591_v52 = vadd.f32 %v8817_v8, %v8037_v44  ;;  %v9341_v7 = vpack.c.bf16 %v2797_v36, %v2795_v6  ;;  %v2930_v8 = vld [vmem:[#allocation8 + $0x150] sm:$0xff] }
 0x39c   : > { %8095 = vmatmul.mubr.msk.f32.gmra.mrb[26].mxu1 %vm1142_vm2, %v11517_v14  ;;  %v9592_v57 = vadd.f32 %v8037_v44, %v2180_v29 }
 0x39d   : > { %2336 = vmatprep.mubr.f32.mxu1 %v13167_v0  ;;  %9320 = vmatpush1.bf16.msra.mxu1 %v9319_v10  ;;  %v11537_v59 = vmax.f32 %v9591_v52, 0.0  ;;  %v2929_v10 = vld [vmem:[#allocation8 + $0x148] sm:$0xff]  ;;  %v916_v52 = vpop.f32.mrb[8].mxu1 }
 0x39e   : > { %v8820_v45 = vpop.f32.mrb[14].mxu0  ;;  %9322 = vmatprep.subr.bf16.mxu1 %v9321_v49  ;;  %v11532_v58 = vmax.f32 %v9592_v57, 0.0  ;;  %v9345_v47 = vpack.c.bf16 %v2931_v12, %v2929_v10  ;;  %v2933_v49 = vld [vmem:[#allocation8 + $0x168] sm:$0xff]  ;;  %v9429_v12 = vpack.c.bf16 %v4267_v33, %v4266_v31 }
 0x39f   : > { %v2190_v13 = vpop.f32.mrb[15].mxu0  ;;  %13233 = vst [vmem:[#allocation25_spill] sm:$0xff] %v11537_v59  ;;  %v9593_v3 = vadd.f32 %v8820_v45, %v8037_v44  ;;  %v9349_v11 = vpack.c.bf16 %v2935_v40, %v2933_v49  ;;  %v2932_v45 = vld [vmem:[#allocation8 + $0x160] sm:$0xff]  ;;  %v4440_v49 = vld [vmem:[#allocation11 + $0x30] sm:$0xff]  ;;  %v4441_v40 = vld [vmem:[#allocation11 + $0x38] sm:$0xff] }
 0x3a0   : > { %8096 = vmatmul.mubr.msk.f32.gmra.mrb[28].mxu1 %vm1142_vm2, %v11522_v37  ;;  %v9594_v55 = vadd.f32 %v8037_v44, %v2190_v13  ;;  %v2659_v44 = vld [vmem:[#allocation8 + $0xb8] sm:$0xff]  ;;  %v2934_v13 = vld [vmem:[#allocation8 + $0x170] sm:$0xff] }
 0x3a1   : > { %2342 = vmatprep.mubr.f32.mxu1 %v13167_v0  ;;  %v11547_v53 = vmax.f32 %v9593_v3, 0.0  ;;  %v9333_v43 = vpack.c.bf16 %v2659_v44, %v2657_v39  ;;  %v9351_v57 = vpack.c.bf16 %v2934_v13, %v2932_v45  ;;  %v11707_v13 = vld [vmem:[#allocation8 + $0x180] sm:$0xff] }
 0x3a2   : > { %v11542_v32 = vmax.f32 %v9594_v55, 0.0  ;;  %v918_v55 = vpop.f32.mrb[9].mxu1 }
 0x3a3   : > { %v922_v3 = vpop.f32.mrb[10].mxu1 }
 0x3a4   : > { %8097 = vmatmul.mubr.msk.f32.gmra.mrb[30].mxu1 %vm1142_vm2, %v11527_v41  ;;  %13234 = vst [vmem:[#allocation26_spill] sm:$0xff] %v11542_v32  ;;  %v11627_v48 = vadd.f32 %v922_v3, %v916_v52  ;;  %v924_v28 = vpop.f32.mrb[11].mxu1  ;;  %v11711_v52 = vld [vmem:[#allocation8 + $0x1a8] sm:$0xff] }
 0x3a5   : > { %2348 = vmatprep.mubr.f32.mxu1 %v13167_v0  ;;  %v928_v1 = vpop.f32.mrb[12].mxu1 }
 0x3a6   : > { %v7336_v54 = vadd.f32 %v928_v1, %v922_v3  ;;  %v11632_v4 = vadd.f32 %v11627_v48, %v928_v1  ;;  %v930_v42 = vpop.f32.mrb[13].mxu1 }
 0x3a7   : > { %v934_v62 = vpop.f32.mrb[14].mxu1 }
 0x3a8   : > { %8098 = vmatmul.mubr.msk.f32.gmra.mrb[32].mxu1 %vm1142_vm2, %v11532_v58  ;;  %v7338_v50 = vadd.f32 %v934_v62, %v928_v1  ;;  %v11640_v16 = vpop.f32.mrb[15].mxu1  ;;  %v11656_v39 = vadd.f32 %v7336_v54, %v934_v62  ;;  %v11721_v1 = vld [vmem:[#allocation8 + $0x1b0] sm:$0xff]  ;;  %v4754_v54 = vld [vmem:[#allocation11 + $0x80] sm:$0xff] }
 0x3a9   : > { %2354 = vmatprep.mubr.f32.mxu1 %v13167_v0  ;;  %v11642_v25 = vpop.f32.mrb[16].mxu1  ;;  %v11659_v44 = vadd.f32 %v11640_v16, %v930_v42 }
 0x3aa   : > { %v11670_v21 = vadd.f32 %v11642_v25, %v934_v62  ;;  %v11673_v23 = vadd.f32 %v7338_v50, %v11642_v25  ;;  %v4755_v50 = vld [vmem:[#allocation11 + $0x88] sm:$0xff] }
 0x3ac   : > { %8099 = vmatmul.mubr.msk.f32.gmra.mrb[34].mxu1 %vm1142_vm2, %v11537_v59  ;;  %13237 = vst [vmem:[#allocation28_spill] sm:$0xff] %v11673_v23 }
 0x3ad   : > { %2360 = vmatprep.mubr.f32.mxu1 %v13167_v0 }
 0x3b0   : > { %8100 = vmatmul.mubr.msk.f32.gmra.mrb[36].mxu1 %vm1142_vm2, %v11542_v32 }
 0x3b1   : > { %2366 = vmatprep.mubr.f32.mxu1 %v13167_v0 }
 0x3b4   : > { %8101 = vmatmul.mubr.msk.f32.gmra.mrb[38].mxu1 %vm1142_vm2, %v11547_v53 }
 0x3b5   : > { %2448 = vmatprep.mubr.f32.mxu1 %v13167_v0 }
 0x3b8   : > { %2449 = vmatmul.mubr.f32.vlgmr.msra.gmra.mrb[24].mxu1 %v13167_v0 }
 0x3b9   : > { %2454 = vmatprep.mubr.f32.mxu1 %v13167_v0  ;;  %9324 = vmatpush1.bf16.msra.mxu1 %v9323_v9  ;;  %v7337_v9 = vadd.f32 %v930_v42, %v924_v28 }
 0x3ba   : > { %9326 = vmatprep.subr.bf16.mxu1 %v9325_v51 }
 0x3bb   : > { %v11667_v2 = vadd.f32 %v7337_v9, %v11640_v16 }
 0x3bc   : > { %2455 = vmatmul.mubr.f32.gmra.mrb[26].mxu1 %v13167_v0 }
 0x3bd   : > { %2460 = vmatprep.mubr.f32.mxu1 %v13167_v0  ;;  %9328 = vmatpush1.bf16.msra.mxu1 %v9327_v17  ;;  %v11647_v17 = vld [vmem:[%s13235_s17] ss:$0 sm:$0xff]  ;;  %13236 = vst [vmem:[#allocation27_spill] sm:$0xff] %v11667_v2 }
 0x3be   : > { %9330 = vmatprep.subr.bf16.mxu1 %v9329_v18  ;;  %v11649_v18 = vpop.f32.mrb[17].mxu1 }
 0x3bf   : > { %v11653_v56 = vpop.f32.mrb[18].mxu1 }
 0x3c0   : > { %2461 = vmatmul.mubr.f32.gmra.mrb[28].mxu1 %v13167_v0 }
 0x3c1   : > { %2466 = vmatprep.mubr.f32.mxu1 %v13167_v0 }
 0x3c4   : > { %8102 = vmatmul.mubr.msk.f32.gmra.mrb[30].mxu1 %vm1142_vm2, %v11512_v63 }
 0x3c5   : > { %2472 = vmatprep.mubr.f32.mxu1 %v13167_v0 }
 0x3c8   : > { %8103 = vmatmul.mubr.msk.f32.gmra.mrb[32].mxu1 %vm1142_vm2, %v11517_v14 }
 0x3c9   : > { %2478 = vmatprep.mubr.f32.mxu1 %v13167_v0 }
 0x3cc   : > { %8104 = vmatmul.mubr.msk.f32.gmra.mrb[34].mxu1 %vm1142_vm2, %v11522_v37 }
 0x3cd   : > { %2484 = vmatprep.mubr.f32.mxu1 %v13167_v0 }
 0x3d0   : > { %8105 = vmatmul.mubr.msk.f32.gmra.mrb[36].mxu1 %vm1142_vm2, %v11527_v41 }
 0x3d1   : > { %2490 = vmatprep.mubr.f32.mxu1 %v13167_v0 }
 0x3d4   : > { %8106 = vmatmul.mubr.msk.f32.gmra.mrb[38].mxu1 %vm1142_vm2, %v11532_v58 }
 0x3d5   : > { %2586 = vmatprep.mubr.f32.mxu1 %v13167_v0 }
 0x3d8   : > { %2587 = vmatmul.mubr.f32.vlgmr.msra.gmra.mrb[24].mxu1 %v13167_v0 }
 0x3d9   : > { %2592 = vmatprep.mubr.f32.mxu1 %v13167_v0  ;;  %9332 = vmatpush1.bf16.msra.mxu1 %v9331_v60  ;;  %v11661_v60 = vpop.f32.mrb[19].mxu1 }
 0x3da   : > { %9334 = vmatprep.subr.bf16.mxu1 %v9333_v43 }
 0x3dc   : > { %2593 = vmatmul.mubr.f32.gmra.mrb[26].mxu1 %v13167_v0 }
 0x3dd   : > { %2598 = vmatprep.mubr.f32.mxu1 %v13167_v0  ;;  %9336 = vmatpush1.bf16.msra.mxu1 %v9335_v30  ;;  %v11675_v30 = vpop.f32.mrb[20].mxu1 }
 0x3de   : > { %9338 = vmatprep.subr.bf16.mxu1 %v9337_v5  ;;  %v11680_v6 = vpop.f32.mrb[21].mxu1 }
 0x3df   : > { %v11684_v36 = vpop.f32.mrb[22].mxu1 }
 0x3e0   : > { %8107 = vmatmul.mubr.msk.f32.gmra.mrb[28].mxu1 %vm1142_vm2, %v11512_v63  ;;  %13238 = vst [vmem:[#allocation29_spill] sm:$0xff] %v11684_v36  ;;  %v11688_v38 = vpop.f32.mrb[23].mxu1 }
 0x3e1   : > { %2604 = vmatprep.mubr.f32.mxu1 %v13167_v0  ;;  %13239 = vst [vmem:[#allocation30_spill] sm:$0xff] %v11688_v38 }
 0x3e4   : > { %8108 = vmatmul.mubr.msk.f32.gmra.mrb[30].mxu1 %vm1142_vm2, %v11517_v14 }
 0x3e5   : > { %2610 = vmatprep.mubr.f32.mxu1 %v13167_v0 }
 0x3e8   : > { %8109 = vmatmul.mubr.msk.f32.gmra.mrb[32].mxu1 %vm1142_vm2, %v11522_v37 }
 0x3e9   : > { %2616 = vmatprep.mubr.f32.mxu1 %v13167_v0 }
 0x3ec   : > { %8110 = vmatmul.mubr.msk.f32.gmra.mrb[34].mxu1 %vm1142_vm2, %v11527_v41 }
 0x3ed   : > { %2622 = vmatprep.mubr.f32.mxu1 %v13167_v0 }
 0x3f0   : > { %8111 = vmatmul.mubr.msk.f32.gmra.mrb[36].mxu1 %vm1142_vm2, %v11532_v58 }
 0x3f1   : > { %2628 = vmatprep.mubr.f32.mxu1 %v13167_v0 }
 0x3f4   : > { %8112 = vmatmul.mubr.msk.f32.gmra.mrb[38].mxu1 %vm1142_vm2, %v11537_v59 }
 0x3f5   : > { %2724 = vmatprep.mubr.f32.mxu1 %v13167_v0 }
 0x3f8   : > { %2725 = vmatmul.mubr.f32.vlgmr.msra.gmra.mrb[24].mxu1 %v13167_v0 }
 0x3f9   : > { %2730 = vmatprep.mubr.f32.mxu1 %v13167_v0  ;;  %9340 = vmatpush1.bf16.msra.mxu1 %v9339_v27 }
 0x3fa   : > { %9342 = vmatprep.subr.bf16.mxu1 %v9341_v7 }
 0x3fc   : > { %8113 = vmatmul.mubr.msk.f32.gmra.mrb[26].mxu1 %vm1142_vm2, %v11512_v63  ;;  %v2928_v63 = vld [vmem:[#allocation8 + $0x140] sm:$0xff] }
 0x3fd   : > { %2736 = vmatprep.mubr.f32.mxu1 %v13167_v0  ;;  %9344 = vmatpush1.bf16.msra.mxu1 %v9343_v46  ;;  %v9347_v29 = vpack.c.bf16 %v2930_v8, %v2928_v63  ;;  %v4439_v63 = vld [vmem:[#allocation11 + $0x28] sm:$0xff] }
 0x3fe   : > { %9346 = vmatprep.subr.bf16.mxu1 %v9345_v47  ;;  %v4438_v47 = vld [vmem:[#allocation11 + $0x20] sm:$0xff] }
 0x3ff   : > { %v11729_v62 = vpack.c.bf16 %v4439_v63, %v4438_v47  ;;  %v4914_v47 = vld [vmem:[#allocation11 + $0xb0] sm:$0xff] }
 0x400   : > { %8114 = vmatmul.mubr.msk.f32.gmra.mrb[28].mxu1 %vm1142_vm2, %v11517_v14 }
 0x401   : > { %2742 = vmatprep.mubr.f32.mxu1 %v13167_v0 }
 0x404   : > { %8115 = vmatmul.mubr.msk.f32.gmra.mrb[30].mxu1 %vm1142_vm2, %v11522_v37 }
 0x405   : > { %2748 = vmatprep.mubr.f32.mxu1 %v13167_v0 }
 0x408   : > { %8116 = vmatmul.mubr.msk.f32.gmra.mrb[32].mxu1 %vm1142_vm2, %v11527_v41 }
 0x409   : > { %2754 = vmatprep.mubr.f32.mxu1 %v13167_v0 }
 0x40c   : > { %8117 = vmatmul.mubr.msk.f32.gmra.mrb[34].mxu1 %vm1142_vm2, %v11532_v58 }
 0x40d   : > { %2760 = vmatprep.mubr.f32.mxu1 %v13167_v0 }
 0x410   : > { %8118 = vmatmul.mubr.msk.f32.gmra.mrb[36].mxu1 %vm1142_vm2, %v11537_v59 }
 0x411   : > { %2766 = vmatprep.mubr.f32.mxu1 %v13167_v0 }
 0x414   : > { %8119 = vmatmul.mubr.msk.f32.gmra.mrb[38].mxu1 %vm1142_vm2, %v11542_v32 }
 0x415   : > { %2862 = vmatprep.mubr.f32.mxu1 %v13167_v0 }
 0x418   : > { %8120 = vmatmul.mubr.msk.f32.vlgmr.msra.gmra.mrb[24].mxu1 %vm1142_vm2, %v11517_v14  ;;  %v11629_v14 = vadd.f32 %v924_v28, %v918_v55  ;;  %v11713_v55 = vld [vmem:[#allocation8 + $0x1b8] sm:$0xff] }
 0x419   : > { %2868 = vmatprep.mubr.f32.mxu1 %v13167_v0  ;;  %9348 = vmatpush1.bf16.msra.mxu1 %v9347_v29  ;;  %v4596_v29 = vld [vmem:[#allocation11 + $0x40] sm:$0xff] }
 0x41a   : > { %9350 = vmatprep.subr.bf16.mxu1 %v9349_v11  ;;  %v11637_v51 = vadd.f32 %v11629_v14, %v930_v42  ;;  %v4597_v11 = vld [vmem:[#allocation11 + $0x48] sm:$0xff] }
 0x41c   : > { %8121 = vmatmul.mubr.msk.f32.gmra.mrb[26].mxu1 %vm1142_vm2, %v11522_v37 }
 0x41d   : > { %2874 = vmatprep.mubr.f32.mxu1 %v13167_v0  ;;  %9352 = vmatpush1.bf16.msra.mxu1 %v9351_v57 }
 0x41e   : > { %9354 = vmatprep.subr.bf16.mxu1 %v9353_v34  ;;  %v4599_v34 = vld [vmem:[#allocation11 + $0x58] sm:$0xff] }
 0x420   : > { %8122 = vmatmul.mubr.msk.f32.gmra.mrb[28].mxu1 %vm1142_vm2, %v11527_v41 }
 0x421   : > { %2880 = vmatprep.mubr.f32.mxu1 %v13167_v0 }
 0x424   : > { %8123 = vmatmul.mubr.msk.f32.gmra.mrb[30].mxu1 %vm1142_vm2, %v11532_v58 }
 0x425   : > { %v8951_v35 = vpop.f32.mrb[16].mxu0  ;;  %2886 = vmatprep.mubr.f32.mxu1 %v13167_v0 }
 0x426   : > { %v11664_v43 = vadd.f32 %v8951_v35, %v11647_v17  ;;  %v4036_v20 = vpop.f32.mrb[17].mxu0  ;;  %v4756_v35 = vld [vmem:[#allocation11 + $0x90] sm:$0xff] }
 0x427   : > { %v11678_v5 = vadd.f32 %v11647_v17, %v4036_v20  ;;  %v4757_v20 = vld [vmem:[#allocation11 + $0x98] sm:$0xff] }
 0x428   : > { %8124 = vmatmul.mubr.msk.f32.gmra.mrb[32].mxu1 %vm1142_vm2, %v11537_v59  ;;  %v13163_v22 = vmax.f32 %v11664_v43, 0.0 }
 0x429   : > { %v13164_v27 = vmax.f32 %v11678_v5, 0.0  ;;  %v8954_v7 = vpop.f32.mrb[18].mxu0  ;;  %2892 = vmatprep.mubr.f32.mxu1 %v13167_v0 }
 0x42a   : > { %v4046_v10 = vpop.f32.mrb[19].mxu0  ;;  %v11698_v8 = vadd.f32 %v8954_v7, %v11647_v17  ;;  %v11736_v7 = vpack.c.bf16 %v4441_v40, %v4440_v49  ;;  %v4915_v49 = vld [vmem:[#allocation11 + $0xb8] sm:$0xff]  ;;  %v5070_v40 = vld [vmem:[#allocation11 + $0xc0] sm:$0xff] }
 0x42b   : > { %v11692_v46 = vadd.f32 %v11647_v17, %v4046_v10  ;;  %8969 = vmatprep.mubr.msk.f32.mxu0 %vm1142_vm2, %v13164_v27  ;;  %v11738_v10 = vpack.c.bf16 %v4597_v11, %v4596_v29  ;;  %v11745_v27 = vpack.c.bf16 %v4599_v34, %v4598_v19  ;;  %v5071_v29 = vld [vmem:[#allocation11 + $0xc8] sm:$0xff]  ;;  %v7380_v11 = vrot.slane %v11627_v48, 7 }
 0x42c   : > { %8125 = vmatmul.mubr.msk.f32.gmra.mrb[34].mxu1 %vm1142_vm2, %v11542_v32  ;;  %8970 = vmatmul.mubr.msk.f32.vlgmr.msra.gmra.mrb[24].mxu0 %vm1142_vm2, %v13163_v22  ;;  %v13166_v42 = vmax.f32 %v11698_v8, 0.0  ;;  %v9355_v22 = vpack.c.bf16 %v11709_v15, %v11707_v13  ;;  %v7381_v13 = vrot.slane %v11629_v14, 7  ;;  %v7589_v15 = vld [vmem:[%s13240_s26] sm:$0x3] }
 0x42d   : > { %9428 = vmatpush3.bf16.msra.mxu0 %v11551_v61  ;;  %v8957_v45 = vpop.f32.mrb[20].mxu0  ;;  %2898 = vmatprep.mubr.f32.mxu1 %v13167_v0  ;;  %v13165_v3 = vmax.f32 %v11692_v46, 0.0  ;;  %v11719_v61 = vld [vmem:[#allocation8 + $0x1a0] sm:$0xff] }
 0x42e   : > { %v4056_v57 = vpop.f32.mrb[21].mxu0  ;;  %9430 = vmatprep.subr.bf16.mxu0 %v9429_v12  ;;  %v11725_v9 = vadd.f32 %v8957_v45, %v11647_v17  ;;  %v4912_v45 = vld [vmem:[#allocation11 + $0xa0] sm:$0xff] }
 0x42f   : > { %v11717_v28 = vadd.f32 %v11647_v17, %v4056_v57  ;;  %8972 = vmatprep.mubr.msk.f32.mxu0 %vm1142_vm2, %v13165_v3  ;;  %v4913_v57 = vld [vmem:[#allocation11 + $0xa8] sm:$0xff]  ;;  %v9357_v3 = vpack.c.bf16 %v11713_v55, %v11711_v52  ;;  %v7382_v55 = vrot.slane %v11632_v4, 7 }
 0x430   : > { %8126 = vmatmul.mubr.msk.f32.gmra.mrb[36].mxu1 %vm1142_vm2, %v11547_v53  ;;  %8973 = vmatmul.mubr.msk.f32.gmra.mrb[26].mxu0 %vm1142_vm2, %v13166_v42  ;;  %v9359_v42 = vpack.c.bf16 %v11721_v1, %v11719_v61  ;;  %v4088_v19 = vmax.f32 %v11725_v9, 0.0  ;;  %v11772_v61 = vpack.c.bf16 %v4757_v20, %v4756_v35  ;;  %v11774_v1 = vpack.c.bf16 %v4913_v57, %v4912_v45 }
 0x431   : > { %v13169_v31 = vmax.f32 %v11717_v28, 0.0  ;;  %v8960_v33 = vpop.f32.mrb[22].mxu0  ;;  %2904 = vmatprep.mubr.f32.mxu1 %v13167_v0  ;;  %9432 = vmatpush3.bf16.msra.mxu0 %v9429_v12  ;;  %v11755_v0 = vpack.c.bf16 %v4755_v50, %v4754_v54  ;;  %v13241_v12 = vmov 0.0   ;;  %v11776_v54 = vpack.c.bf16 %v4915_v49, %v4914_v47 }
 0x432   : > { %v4066_v63 = vpop.f32.mrb[23].mxu0  ;;  %v11763_v34 = vadd.f32 %v8960_v33, %v11647_v17  ;;  %9434 = vmatprep.subr.bf16.mxu0 %v11729_v62  ;;  %13242 = vst [vmem:[#allocation31_spill] sm:$0xff] %v11772_v61  ;;  %13243 = vst [vmem:[#allocation32_spill] sm:$0xff] %v11774_v1  ;;  %v11778_v9 = vpack.c.bf16 %v5071_v29, %v5070_v40  ;;  %v13246_v50 = vmax.f32 %v11678_v5, 0.0  ;;  %v11791_v35 = vsel %vm7412_vm8, %v7380_v11, 0.0 }
 0x433   : > { %8975 = vmatprep.mubr.msk.f32.mxu0 %vm1142_vm2, %v13169_v31  ;;  %v11766_v52 = vadd.f32 %v11647_v17, %v4066_v63  ;;  %13244 = vst [vmem:[#allocation33_spill] sm:$0xff] %v11776_v54  ;;  %v11785_v63 = vsel %vm7412_vm8, 0.0, %v7380_v11  ;;  %v11788_v31 = vrot.slane %v7589_v15, %v10966_v24  ;;  %v11794_v20 = vsel %vm7412_vm8, 0.0, %v7381_v13 }
 0x434   : > { %2905 = vmatmul.mubr.f32.gmra.mrb[38].mxu1 %v13241_v12  ;;  %13245 = vst [vmem:[#allocation34_spill] sm:$0xff] %v11778_v9  ;;  %v4099_v17 = vrot.slane %v13246_v50, 5  ;;  %8976 = vmatmul.mubr.msk.f32.gmra.mrb[28].mxu0 %vm1142_vm2, %v4088_v19  ;;  %v7383_v45 = vrot.slane %v11637_v51, 7  ;;  %v11798_v5 = vrot.slane %v7589_v15, %v10971_v26  ;;  %v4090_v57 = vmax.f32 %v11763_v34, 0.0 }
 0x435   : > { %3000 = vmatprep.mubr.f32.mxu1 %v13241_v12  ;;  %v13170_v33 = vmax.f32 %v11766_v52, 0.0  ;;  %v11807_v47 = vsel %vm7412_vm8, %v7381_v13, 0.0  ;;  %v11810_v49 = vsel %vm7412_vm8, 0.0, %v7382_v55  ;;  %v7384_v40 = vrot.slane %v11656_v39, 7 }
 0x436   : > { %13247 = vst [vmem:[#allocation35_spill] sm:$0xff] %v11798_v5  ;;  %13248 = vst [vmem:[#allocation36_spill] sm:$0xff] %v11810_v49  ;;  %v13249_v29 = vmax.f32 %v11664_v43, 0.0  ;;  %v11818_v15 = vadd.f32 %v11785_v63, %v11627_v48  ;;  %v11822_v13 = vsel %vm7412_vm8, %v7382_v55, 0.0  ;;  %v11825_v34 = vsel %vm1097_vm3, 0.0, %v4099_v17 }
 0x437   : > { %8978 = vmatprep.mubr.msk.f32.mxu0 %vm1142_vm2, %v13170_v33  ;;  %13250 = vst [vmem:[#allocation37_spill] sm:$0xff] %v11822_v13  ;;  %v13251_v50 = vmax.f32 %v11692_v46, 0.0  ;;  %v11833_v48 = vadd.f32 %v11794_v20, %v11629_v14  ;;  %v11841_v46 = vadd.f32 %v11810_v49, %v11632_v4  ;;  %v13256_v4 = vmax.f32 %v11698_v8, 0.0 }
 0x438   : > { %8127 = vmatmul.mubr.msk.f32.vlgmr.msra.gmra.mrb[24].mxu1 %vm1142_vm2, %v11522_v37  ;;  %v4100_v11 = vrot.slane %v13249_v29, 5  ;;  %8979 = vmatmul.mubr.msk.f32.gmra.mrb[30].mxu0 %vm1142_vm2, %v4090_v57  ;;  %v11844_v29 = vsel %vm7412_vm8, 0.0, %v7383_v45  ;;  %v11863_v43 = vsel %vm7412_vm8, %v7384_v40, 0.0  ;;  %v13177_v14 = vrot.slane %v11667_v2, 7 }
 0x439   : > { %3006 = vmatprep.mubr.f32.mxu1 %v13241_v12  ;;  %9356 = vmatpush1.bf16.msra.mxu1 %v9355_v22  ;;  %v4101_v33 = vrot.slane %v13251_v50, 5  ;;  %13252 = vst [vmem:[#allocation38_spill] sm:$0xff] %v11841_v46  ;;  %13253 = vst [vmem:[#allocation39_spill] sm:$0xff] %v11844_v29  ;;  %v11851_v50 = vsel %vm7412_vm8, %v7383_v45, 0.0  ;;  %v11854_v22 = vsel %vm7412_vm8, 0.0, %v7384_v40  ;;  %v4102_v37 = vrot.slane %v13256_v4, 5 }
 0x43a   : > { %9358 = vmatprep.subr.bf16.mxu1 %v9357_v3  ;;  %8989 = vmatprep.mubr.msk.f32.mxu0 %vm1142_vm2, %v11825_v34  ;;  %13254 = vst [vmem:[#allocation40_spill] sm:$0xff] %v11851_v50  ;;  %13255 = vst [vmem:[#allocation41_spill] sm:$0xff] %v11854_v22  ;;  %v11857_v55 = vsel %vm1097_vm3, 0.0, %v4100_v11  ;;  %v11867_v45 = vsel %vm1097_vm3, %v4100_v11, 0.0  ;;  %v13258_v26 = vmax.f32 %v11717_v28, 0.0  ;;  %v11878_v8 = vadd.f32 %v11844_v29, %v11637_v51 }
 0x43b   : > { %13257 = vst [vmem:[#allocation42_spill] sm:$0xff] %v11863_v43  ;;  %v11870_v3 = vsel %vm1097_vm3, 0.0, %v4101_v33  ;;  %v11890_v28 = vsel %vm1097_vm3, %v4099_v17, 0.0  ;;  %v4106_v4 = vrot.slane %v4090_v57, 5  ;;  %v11899_v40 = vsel %vm1097_vm3, 0.0, %v4102_v37 }
 0x43c   : > { %8128 = vmatmul.mubr.msk.f32.gmra.mrb[26].mxu1 %vm1142_vm2, %v11527_v41  ;;  %v4103_v24 = vrot.slane %v13258_v26, 5  ;;  %8990 = vmatmul.mubr.msk.f32.vlgmr.msra.gmra.mrb[24].mxu0 %vm1142_vm2, %v11857_v55  ;;  %13259 = vst [vmem:[#allocation43_spill] sm:$0xff] %v11878_v8  ;;  %v11887_v26 = vadd.f32 %v11854_v22, %v11656_v39  ;;  %v4413_v39 = vrot.slane %v11825_v34, 1  ;;  %v11906_v17 = vsel %vm7412_vm8, 0.0, %v13177_v14 }
 0x43d   : > { %3012 = vmatprep.mubr.f32.mxu1 %v13241_v12  ;;  %9360 = vmatpush1.bf16.msra.mxu1 %v9359_v42  ;;  %v4104_v42 = vrot.slane %v4088_v19, 5  ;;  %v4417_v19 = vrot.slane %v11867_v45, 1  ;;  %13261 = vst [vmem:[#allocation45_spill] sm:$0xff] %v11906_v17  ;;  %v11909_v57 = vsel %vm1097_vm3, %v4102_v37, 0.0  ;;  %v11912_v51 = vsel %vm1097_vm3, %v4101_v33, 0.0 }
 0x43e   : > { %9436 = vmatpush3.bf16.msra.mxu0 %v11729_v62  ;;  %8992 = vmatprep.mubr.msk.f32.mxu0 %vm1142_vm2, %v11870_v3  ;;  %13260 = vst [vmem:[#allocation44_spill] sm:$0xff] %v11887_v26  ;;  %v11915_v62 = vsel %vm1097_vm3, 0.0, %v4103_v24  ;;  %v13262_v11 = vmax.f32 %v11766_v52, 0.0  ;;  %v11928_v37 = vsel %vm1097_vm3, %v4103_v24, 0.0  ;;  %v4414_v52 = vrot.slane %v11890_v28, 1 }
 0x43f   : > { %9438 = vmatprep.subr.bf16.mxu0 %v11736_v7  ;;  %v11922_v54 = vsel %vm1097_vm3, 0.0, %v4104_v42  ;;  %v11925_v14 = vsel %vm1097_vm3, %v4104_v42, 0.0  ;;  %v11935_v33 = vsel %vm1097_vm3, 0.0, %v4106_v4  ;;  %v4416_v24 = vrot.slane %v11857_v55, 1 }
 0x440   : > { %8129 = vmatmul.mubr.msk.f32.gmra.mrb[28].mxu1 %vm1142_vm2, %v11532_v58  ;;  %v4105_v9 = vrot.slane %v13262_v11, 5  ;;  %8993 = vmatmul.mubr.msk.f32.gmra.mrb[26].mxu0 %vm1142_vm2, %v11899_v40  ;;  %v11938_v11 = vsel %vm1097_vm3, %v4106_v4, 0.0  ;;  %v4422_v42 = vrot.slane %v11899_v40, 1  ;;  %v4420_v26 = vrot.slane %v11912_v51, 1 }
 0x441   : > { %3018 = vmatprep.mubr.f32.mxu1 %v13241_v12  ;;  %8995 = vmatprep.mubr.msk.f32.mxu0 %vm1142_vm2, %v11915_v62  ;;  %v4423_v22 = vrot.slane %v11909_v57, 1  ;;  %v4425_v4 = vrot.slane %v11915_v62, 1  ;;  %v4426_v17 = vrot.slane %v11928_v37, 1  ;;  %v4428_v1 = vrot.slane %v11922_v54, 1 }
 0x442   : > { %9440 = vmatpush3.bf16.msra.mxu0 %v11736_v7  ;;  %v4419_v7 = vrot.slane %v11870_v3, 1  ;;  %v11951_v43 = vsel %vm1097_vm3, 0.0, %v4105_v9  ;;  %v4429_v38 = vrot.slane %v11925_v14, 1  ;;  %v4435_v5 = vrot.slane %v11938_v11, 1 }
 0x443   : > { %9442 = vmatprep.subr.bf16.mxu0 %v11738_v10  ;;  %v5049_v2 = vrot.slane %v11867_v45, 6  ;;  %v11966_v36 = vsel %vm1097_vm3, %v4105_v9, 0.0  ;;  %v4571_v29 = vrot.slane %v11825_v34, 2  ;;  %v4572_v8 = vrot.slane %v11890_v28, 2 }
 0x444   : > { %8130 = vmatmul.mubr.msk.f32.gmra.mrb[30].mxu1 %vm1142_vm2, %v11537_v59  ;;  %8996 = vmatmul.mubr.msk.f32.gmra.mrb[28].mxu0 %vm1142_vm2, %v11922_v54  ;;  %v4434_v59 = vrot.slane %v11935_v33, 1  ;;  %v4415_v61 = vsel %vm1413_vm4, %v4413_v39, %v4414_v52  ;;  %v4418_v50 = vsel %vm1413_vm4, %v4416_v24, %v4417_v19  ;;  %v4421_v46 = vsel %vm1413_vm4, %v4419_v7, %v4420_v26 }
 0x445   : > { %3024 = vmatprep.mubr.f32.mxu1 %v13241_v12  ;;  %8998 = vmatprep.mubr.msk.f32.mxu0 %vm1142_vm2, %v11951_v43  ;;  %v4424_v49 = vsel %vm1413_vm4, %v4422_v42, %v4423_v22  ;;  %v4427_v9 = vsel %vm1413_vm4, %v4425_v4, %v4426_v17  ;;  %v4431_v13 = vrot.slane %v11951_v43, 1  ;;  %v4432_v39 = vrot.slane %v11966_v36, 1 }
 0x446   : > { %v11986_v19 = vsel %vm1413_vm4, %v4434_v59, %v4435_v5  ;;  %v5045_v26 = vrot.slane %v11825_v34, 6  ;;  %v5046_v17 = vrot.slane %v11890_v28, 6  ;;  %v4580_v59 = vrot.slane %v11899_v40, 2 }
 0x447   : > { %v5051_v5 = vrot.slane %v11870_v3, 6  ;;  %v5052_v52 = vrot.slane %v11912_v51, 6  ;;  %v5054_v24 = vrot.slane %v11899_v40, 6  ;;  %v5055_v42 = vrot.slane %v11909_v57, 6 }
 0x448   : > { %8131 = vmatmul.mubr.msk.f32.gmra.mrb[32].mxu1 %vm1142_vm2, %v11542_v32  ;;  %8999 = vmatmul.mubr.msk.f32.gmra.mrb[30].mxu0 %vm1142_vm2, %v11935_v33  ;;  %v4430_v32 = vsel %vm1413_vm4, %v4428_v1, %v4429_v38  ;;  %v11993_v38 = vsel %vm1572_vm5, %v4571_v29, %v4572_v8  ;;  %v4578_v1 = vrot.slane %v11912_v51, 2  ;;  %v12005_v29 = vsel %vm2048_vm6, %v5045_v26, %v5046_v17 }
 0x449   : > { %3030 = vmatprep.mubr.f32.mxu1 %v13241_v12  ;;  %9009 = vmatprep.mubr.msk.f32.mxu0 %vm1142_vm2, %v4415_v61  ;;  %v5048_v61 = vrot.slane %v11857_v55, 6  ;;  %v5057_v7 = vrot.slane %v11915_v62, 6  ;;  %v12015_v4 = vsel %vm2048_vm6, %v5051_v5, %v5052_v52  ;;  %v5058_v22 = vrot.slane %v11928_v37, 6 }
 0x44a   : > { %13264 = vst [vmem:[#allocation47_spill] sm:$0xff] %v12015_v4  ;;  %v5061_v26 = vrot.slane %v11925_v14, 6  ;;  %v5066_v17 = vrot.slane %v11935_v33, 6  ;;  %v5067_v23 = vrot.slane %v11938_v11, 6 }
 0x44b   : > { %v12008_v8 = vsel %vm2048_vm6, %v5048_v61, %v5049_v2  ;;  %v12023_v2 = vsel %vm2048_vm6, %v5054_v24, %v5055_v42  ;;  %v4433_v61 = vsel %vm1413_vm4, %v4431_v13, %v4432_v39  ;;  %v12031_v5 = vsel %vm2048_vm6, %v5057_v7, %v5058_v22 }
 0x44c   : > { %8132 = vmatmul.mubr.msk.f32.gmra.mrb[34].mxu1 %vm1142_vm2, %v11547_v53  ;;  %9010 = vmatmul.mubr.msk.f32.vlgmr.msra.gmra.mrb[24].mxu0 %vm1142_vm2, %v4418_v50  ;;  %13263 = vst [vmem:[#allocation46_spill] sm:$0xff] %v12008_v8  ;;  %v5060_v50 = vrot.slane %v11922_v54, 6  ;;  %13265 = vst [vmem:[#allocation48_spill] sm:$0xff] %v12023_v2  ;;  %v4581_v24 = vrot.slane %v11909_v57, 2  ;;  %v4583_v42 = vrot.slane %v11915_v62, 2  ;;  %v4584_v2 = vrot.slane %v11928_v37, 2 }
 0x44d   : > { %3036 = vmatprep.mubr.f32.mxu1 %v13241_v12  ;;  %9444 = vmatpush3.bf16.msra.mxu0 %v11738_v10  ;;  %v5063_v10 = vrot.slane %v11951_v43, 6  ;;  %13266 = vst [vmem:[#allocation49_spill] sm:$0xff] %v12031_v5  ;;  %v4586_v13 = vrot.slane %v11922_v54, 2  ;;  %v12048_v39 = vsel %vm2048_vm6, %v5066_v17, %v5067_v23  ;;  %v12054_v22 = vadd.f32 %v11659_v44, %v11649_v18 }
 0x44e   : > { %9012 = vmatprep.mubr.msk.f32.mxu0 %vm1142_vm2, %v4421_v46  ;;  %9446 = vmatprep.subr.bf16.mxu0 %v11745_v27  ;;  %v5064_v46 = vrot.slane %v11966_v36, 6  ;;  %v12034_v52 = vsel %vm2048_vm6, %v5060_v50, %v5061_v26  ;;  %13269 = vst [vmem:[#allocation52_spill] sm:$0xff] %v12048_v39  ;;  %v7342_v7 = vadd.f32 %v11653_v56, %v11642_v25  ;;  %v4592_v44 = vrot.slane %v11935_v33, 2 }
 0x44f   : > { %13267 = vst [vmem:[#allocation50_spill] sm:$0xff] %v12034_v52  ;;  %v12064_v23 = vadd.f32 %v11670_v21, %v11653_v56  ;;  %v4593_v50 = vrot.slane %v11938_v11, 2  ;;  %v4729_v26 = vrot.slane %v11825_v34, 4  ;;  %v7343_v25 = vadd.f32 %v11661_v60, %v11649_v18 }
 0x450   : > { %3037 = vmatmul.mubr.f32.gmra.mrb[36].mxu1 %v13241_v12  ;;  %9013 = vmatmul.mubr.msk.f32.gmra.mrb[26].mxu0 %vm1142_vm2, %v4424_v49  ;;  %v12042_v4 = vsel %vm2048_vm6, %v5063_v10, %v5064_v46  ;;  %v7341_v49 = vadd.f32 %v11649_v18, %v11640_v16  ;;  %v4590_v16 = vrot.slane %v11966_v36, 2  ;;  %v4730_v10 = vrot.slane %v11890_v28, 4 }
 0x451   : > { %3042 = vmatprep.mubr.f32.mxu1 %v13241_v12  ;;  %13268 = vst [vmem:[#allocation51_spill] sm:$0xff] %v12042_v4  ;;  %9015 = vmatprep.mubr.msk.f32.mxu0 %vm1142_vm2, %v4427_v9  ;;  %v4587_v9 = vrot.slane %v11925_v14, 2  ;;  %v13270_v46 = vrot.slane %v11791_v35, 2  ;;  %v13271_v17 = vrot.slane %v11785_v63, 2  ;;  %v13272_v4 = vrot.slane %v11867_v45, 2 }
 0x452   : > { %9448 = vmatpush3.bf16.msra.mxu0 %v11745_v27  ;;  %v4589_v27 = vrot.slane %v11951_v43, 2  ;;  %v12076_v21 = vadd.f32 %v7341_v49, %v11661_v60  ;;  %v13274_v5 = vrot.slane %v11870_v3, 2  ;;  %v13275_v35 = vrot.slane %v11807_v47, 2 }
 0x453   : > { %9450 = vmatprep.subr.bf16.mxu0 %v11755_v0  ;;  %v7495_v39 = vsel %vm1572_vm5, %v13271_v17, %v13270_v46  ;;  %v13276_v63 = vrot.slane %v11794_v20, 2  ;;  %v4585_v17 = vsel %vm1572_vm5, %v4583_v42, %v4584_v2  ;;  %v12111_v20 = vsel %vm1572_vm5, %v4592_v44, %v4593_v50 }
 0x454   : > { %3043 = vmatmul.mubr.f32.gmra.mrb[38].mxu1 %v13241_v12  ;;  %9016 = vmatmul.mubr.msk.f32.gmra.mrb[28].mxu0 %vm1142_vm2, %v4430_v32  ;;  %v13273_v32 = vrot.slane %v11857_v55, 2  ;;  %v4579_v18 = vsel %vm1572_vm5, %v13274_v5, %v4578_v1  ;;  %v7557_v49 = vadd.f32 %v7495_v39, %v11818_v15  ;;  %v4732_v1 = vrot.slane %v11857_v55, 4 }
 0x455   : > { %3138 = vmatprep.mubr.f32.mxu1 %v13241_v12  ;;  %9018 = vmatprep.mubr.msk.f32.mxu0 %vm1142_vm2, %v4433_v61  ;;  %v7498_v46 = vsel %vm1572_vm5, %v13276_v63, %v13275_v35  ;;  %v4582_v61 = vsel %vm1572_vm5, %v4580_v59, %v4581_v24  ;;  %v12108_v47 = vsel %vm1572_vm5, %v4589_v27, %v4590_v16  ;;  %v4735_v15 = vrot.slane %v11870_v3, 4  ;;  %v13283_v35 = vld [vmem:[#allocation38_spill] sm:$0xff] }
 0x456   : > { %v4576_v52 = vsel %vm1572_vm5, %v13273_v32, %v13272_v4  ;;  %v12103_v4 = vsel %vm1572_vm5, %v4586_v13, %v4587_v9  ;;  %v12118_v59 = vsel %vm1731_vm7, %v4729_v26, %v4730_v10  ;;  %v7573_v2 = vmul.f32 0.11111111, %v7557_v49  ;;  %v13281_v26 = vld [vmem:[#allocation36_spill] sm:$0xff] }
 0x457   : > { %v7558_v5 = vadd.f32 %v7498_v46, %v11833_v48  ;;  %v7344_v24 = vadd.f32 %v11675_v30, %v11653_v56  ;;  %v4738_v42 = vrot.slane %v11899_v40, 4  ;;  %v4739_v13 = vrot.slane %v11909_v57, 4  ;;  %v13284_v46 = vld [vmem:[#allocation40_spill] sm:$0xff] }
 0x458   : > { %8133 = vmatmul.mubr.msk.f32.vlgmr.msra.gmra.mrb[24].mxu1 %vm1142_vm2, %v11527_v41  ;;  %v4736_v41 = vrot.slane %v11912_v51, 4  ;;  %9019 = vmatmul.mubr.msk.f32.gmra.mrb[30].mxu0 %vm1142_vm2, %v11986_v19  ;;  %v12128_v39 = vadd.f32 %v7342_v7, %v11675_v30  ;;  %v7345_v19 = vadd.f32 %v11680_v6, %v11661_v60  ;;  %v13277_v48 = vrot.slane %v11867_v45, 4  ;;  %v13278_v7 = vld [vmem:[#allocation28_spill] sm:$0xff] }
 0x459   : > { %3144 = vmatprep.mubr.f32.mxu1 %v13241_v12  ;;  %9029 = vmatprep.mubr.msk.f32.mxu0 %vm1142_vm2, %v11993_v38  ;;  %v4741_v38 = vrot.slane %v11915_v62, 4  ;;  %v4742_v9 = vrot.slane %v11928_v37, 4  ;;  %v7601_v27 = vadd.f32 %v11788_v31, %v7573_v2  ;;  %v7386_v16 = vrot.slane %v13278_v7, 7  ;;  %v13286_v2 = vld [vmem:[#allocation39_spill] sm:$0xff] }
 0x45a   : > { %v12137_v56 = vsel %vm1731_vm7, %v4732_v1, %v13277_v48  ;;  %v7574_v44 = vmul.f32 0.11111111, %v7558_v5  ;;  %v12145_v60 = vadd.f32 %v7343_v25, %v11680_v6  ;;  %v13282_v10 = vrot.slane %v13281_v26, 2  ;;  %v13288_v25 = vld [vmem:[#allocation29_spill] sm:$0xff] }
 0x45b   : > { %v7617_v49 = vmax.f32 %v7601_v27, 0.0  ;;  %v13285_v1 = vrot.slane %v13284_v46, 2  ;;  %v13287_v48 = vrot.slane %v13286_v2, 2  ;;  %v12161_v8 = vadd.f32 %v13288_v25, %v11675_v30  ;;  %v13289_v27 = vld [vmem:[#allocation27_spill] sm:$0xff] }
 0x45c   : > { %8134 = vmatmul.mubr.msk.f32.gmra.mrb[26].mxu1 %vm1142_vm2, %v11532_v58  ;;  %v13279_v58 = vld [vmem:[#allocation37_spill] sm:$0xff]  ;;  %9030 = vmatmul.mubr.msk.f32.vlgmr.msra.gmra.mrb[24].mxu0 %vm1142_vm2, %v4576_v52  ;;  %v12169_v52 = vsel %vm1731_vm7, %v4738_v42, %v4739_v13  ;;  %v13293_v30 = vld [vmem:[#allocation31_spill] sm:$0xff]  ;;  %v12183_v42 = vsel %vm1731_vm7, %v4741_v38, %v4742_v9  ;;  %v7388_v38 = vrot.slane %v12064_v23, 7 }
 0x45d   : > { %3150 = vmatprep.mubr.f32.mxu1 %v13241_v12  ;;  %v13280_v50 = vrot.slane %v13279_v58, 2  ;;  %v7504_v5 = vsel %vm1572_vm5, %v13287_v48, %v13285_v1  ;;  %9452 = vmatpush3.bf16.msra.mxu0 %v11755_v0  ;;  %v12166_v58 = vsel %vm1731_vm7, %v4735_v15, %v4736_v41  ;;  %v4744_v0 = vrot.slane %v11922_v54, 4  ;;  %v13294_v46 = vld [vmem:[#allocation43_spill] sm:$0xff] }
 0x45e   : > { %9032 = vmatprep.mubr.msk.f32.mxu0 %vm1142_vm2, %v4579_v18  ;;  %9454 = vmatprep.subr.bf16.mxu0 %v13293_v30  ;;  %v4745_v18 = vrot.slane %v11925_v14, 4  ;;  %v7560_v1 = vadd.f32 %v7504_v5, %v13294_v46  ;;  %v12191_v48 = vsel %vm7412_vm8, 0.0, %v7386_v16 }
 0x45f   : > { %v7501_v32 = vsel %vm1572_vm5, %v13282_v10, %v13280_v50  ;;  %v13290_v50 = vrot.slane %v13289_v27, 7  ;;  %v13291_v10 = vld [vmem:[#allocation35_spill] sm:$0xff]  ;;  %7771 = vrot.lane.b32.xlu0 %v7617_v49, %s10491_s23  ;;  %v12199_v49 = vadd.f32 %v7344_v24, %v13288_v25  ;;  %v13298_v24 = vld [vmem:[#allocation45_spill] sm:$0xff] }
 0x460   : > { %v7559_v63 = vadd.f32 %v7501_v32, %v13283_v35  ;;  %v7602_v32 = vadd.f32 %v13291_v10, %v7574_v44  ;;  %v13292_v35 = vld [vmem:[#allocation25_spill] sm:$0xff]  ;;  %9033 = vmatmul.mubr.msk.f32.gmra.mrb[26].mxu0 %vm1142_vm2, %v4582_v61  ;;  %v7576_v9 = vmul.f32 0.11111111, %v7560_v1  ;;  %v13295_v61 = vld [vmem:[#allocation30_spill] sm:$0xff]  ;;  %v7508_v25 = vrot.slane %v13298_v24, 2 }
 0x461   : > { %v7434_v26 = vsel %vm7412_vm8, %v13290_v50, 0.0  ;;  %8135 = vmatmul.mubr.msk.f32.gmra.mrb[28].mxu1 %vm1142_vm2, %v13292_v35  ;;  %9035 = vmatprep.mubr.msk.f32.mxu0 %vm1142_vm2, %v4585_v17  ;;  %v12203_v5 = vadd.f32 %v13295_v61, %v11680_v6  ;;  %v13297_v35 = vld [vmem:[#allocation32_spill] sm:$0xff]  ;;  %v7389_v17 = vrot.slane %v12076_v21, 7  ;;  %v12211_v46 = vadd.f32 %v7345_v19, %v13295_v61 }
 0x462   : > { %v7575_v41 = vmul.f32 0.11111111, %v7559_v63  ;;  %3156 = vmatprep.mubr.f32.mxu1 %v13241_v12  ;;  %v7618_v44 = vmax.f32 %v7602_v32, 0.0  ;;  %v7387_v63 = vrot.slane %v12054_v22, 7  ;;  %9456 = vmatpush3.bf16.msra.mxu0 %v13293_v30  ;;  %v13296_v32 = vld [vmem:[#allocation26_spill] sm:$0xff]  ;;  %v7509_v1 = vrot.slane %v7434_v26, 2 }
 0x463   : > { %9458 = vmatprep.subr.bf16.mxu0 %v13297_v35  ;;  %v7435_v6 = vsel %vm7412_vm8, %v7386_v16, 0.0  ;;  %v7451_v19 = vadd.f32 %v12191_v48, %v13278_v7  ;;  %v7511_v16 = vrot.slane %v12191_v48, 2  ;;  %v7421_v26 = vsel %vm7412_vm8, 0.0, %v7388_v38  ;;  %v13299_v48 = vld [vmem:[#allocation42_spill] sm:$0xff] }
 0x464   : > { %v7603_v50 = vadd.f32 %v11788_v31, %v7575_v41  ;;  %7773 = vrot.lane.b32.xlu1 %v7618_v44, %s10491_s23  ;;  %9036 = vmatmul.mubr.msk.f32.gmra.mrb[28].mxu0 %vm1142_vm2, %v12103_v4  ;;  %v7420_v61 = vsel %vm7412_vm8, 0.0, %v7387_v63  ;;  %v7436_v2 = vsel %vm7412_vm8, %v7387_v63, 0.0  ;;  %v7390_v4 = vrot.slane %v12128_v39, 7  ;;  %v13301_v41 = vld [vmem:[#allocation41_spill] sm:$0xff] }
 0x465   : > { %8136 = vmatmul.mubr.msk.f32.gmra.mrb[30].mxu1 %vm1142_vm2, %v13296_v32  ;;  %v7604_v32 = vadd.f32 %v13291_v10, %v7576_v9  ;;  %9038 = vmatprep.mubr.msk.f32.mxu0 %vm1142_vm2, %v12108_v47  ;;  %v7512_v7 = vrot.slane %v7435_v6, 2  ;;  %v7422_v63 = vsel %vm7412_vm8, 0.0, %v7389_v17  ;;  %v7391_v9 = vrot.slane %v12145_v60, 7 }
 0x466   : > { %v7619_v30 = vmax.f32 %v7603_v50, 0.0  ;;  %3162 = vmatprep.mubr.f32.mxu1 %v13241_v12  ;;  %v7450_v50 = vadd.f32 %v13298_v24, %v13289_v27  ;;  %v7437_v27 = vsel %vm7412_vm8, %v7388_v38, 0.0  ;;  %v7514_v47 = vrot.slane %v7420_v61, 2 }
 0x467   : > { %v7620_v44 = vmax.f32 %v7604_v32, 0.0  ;;  %v13300_v24 = vrot.slane %v13299_v48, 2  ;;  %v13302_v32 = vrot.slane %v13301_v41, 2  ;;  %v7452_v38 = vadd.f32 %v7420_v61, %v12054_v22 }
 0x468   : > { %7775 = vrot.lane.b32.xlu0 %v7619_v30, %s10491_s23  ;;  %v7515_v30 = vrot.slane %v7436_v2, 2  ;;  %9039 = vmatmul.mubr.msk.f32.gmra.mrb[30].mxu0 %vm1142_vm2, %v12111_v20  ;;  %v7453_v6 = vadd.f32 %v7421_v26, %v12064_v23  ;;  %v7517_v13 = vrot.slane %v7421_v26, 2  ;;  %v7438_v2 = vsel %vm7412_vm8, %v7389_v17, 0.0 }
 0x469   : > { %8137 = vmatmul.mubr.msk.f32.gmra.mrb[32].mxu1 %vm1142_vm2, %v11547_v53  ;;  %7777 = vrot.lane.b32.xlu1 %v7620_v44, %s10491_s23  ;;  %v7507_v15 = vsel %vm1572_vm5, %v13302_v32, %v13300_v24  ;;  %v7510_v53 = vsel %vm1572_vm5, %v7508_v25, %v7509_v1  ;;  %v7518_v44 = vrot.slane %v7437_v27, 2  ;;  %v7454_v41 = vadd.f32 %v7422_v63, %v12076_v21  ;;  %v13303_v1 = vld [vmem:[#allocation44_spill] sm:$0xff] }
 0x46a   : > { %3168 = vmatprep.mubr.f32.mxu1 %v13241_v12  ;;  %9049 = vmatprep.mubr.msk.f32.mxu0 %vm1142_vm2, %v12118_v59  ;;  %v7423_v48 = vsel %vm7412_vm8, 0.0, %v7390_v4  ;;  %v7439_v25 = vsel %vm7412_vm8, %v7390_v4, 0.0  ;;  %v7520_v20 = vrot.slane %v7422_v63, 2  ;;  %v7424_v22 = vsel %vm7412_vm8, 0.0, %v7391_v9 }
 0x46b   : > { %v7561_v23 = vadd.f32 %v7507_v15, %v13303_v1  ;;  %v7562_v61 = vadd.f32 %v7510_v53, %v7450_v50  ;;  %v7521_v17 = vrot.slane %v7438_v2, 2  ;;  %v7440_v59 = vsel %vm7412_vm8, %v7391_v9, 0.0 }
 0x46c   : > { %v7513_v26 = vsel %vm1572_vm5, %v7511_v16, %v7512_v7  ;;  %v7516_v21 = vsel %vm1572_vm5, %v7514_v47, %v7515_v30  ;;  %9050 = vmatmul.mubr.msk.f32.vlgmr.msra.gmra.mrb[24].mxu0 %vm1142_vm2, %v12137_v56  ;;  %v7523_v4 = vrot.slane %v7423_v48, 2  ;;  %v7524_v27 = vrot.slane %v7439_v25, 2  ;;  %v13304_v16 = vld [vmem:[#allocation33_spill] sm:$0xff] }
 0x46d   : > { %3169 = vmatmul.mubr.f32.gmra.mrb[34].mxu1 %v13241_v12  ;;  %v7577_v63 = vmul.f32 0.11111111, %v7561_v23  ;;  %v7578_v24 = vmul.f32 0.11111111, %v7562_v61  ;;  %9460 = vmatpush3.bf16.msra.mxu0 %v13297_v35  ;;  %v7455_v15 = vadd.f32 %v7423_v48, %v12128_v39  ;;  %v7526_v50 = vrot.slane %v7424_v22, 2 }
 0x46e   : > { %3174 = vmatprep.mubr.f32.mxu1 %v13241_v12  ;;  %9052 = vmatprep.mubr.msk.f32.mxu0 %vm1142_vm2, %v12166_v58  ;;  %v7563_v9 = vadd.f32 %v7513_v26, %v7451_v19  ;;  %v7564_v32 = vadd.f32 %v7516_v21, %v7452_v38  ;;  %v7527_v7 = vrot.slane %v7440_v59, 2  ;;  %v7519_v30 = vsel %vm1572_vm5, %v7517_v13, %v7518_v44 }
 0x46f   : > { %9462 = vmatprep.subr.bf16.mxu0 %v13304_v16  ;;  %v7605_v56 = vadd.f32 %v11788_v31, %v7577_v63  ;;  %v7606_v47 = vadd.f32 %v13291_v10, %v7578_v24  ;;  %v7456_v58 = vadd.f32 %v7424_v22, %v12145_v60  ;;  %v7565_v53 = vadd.f32 %v7519_v30, %v7453_v6 }
 0x470   : > { %v7579_v35 = vmul.f32 0.11111111, %v7563_v9  ;;  %v7580_v39 = vmul.f32 0.11111111, %v7564_v32  ;;  %9053 = vmatmul.mubr.msk.f32.gmra.mrb[26].mxu0 %vm1142_vm2, %v12169_v52  ;;  %v7522_v2 = vsel %vm1572_vm5, %v7520_v20, %v7521_v17  ;;  %v7525_v48 = vsel %vm1572_vm5, %v7523_v4, %v7524_v27  ;;  %v13305_v20 = vld [vmem:[#allocation34_spill] sm:$0xff]  ;;  %v5072_v9 = vld [vmem:[#allocation11 + $0xd0] sm:$0xff] }
 0x471   : > { %3175 = vmatmul.mubr.f32.gmra.mrb[36].mxu1 %v13241_v12  ;;  %v7621_v19 = vmax.f32 %v7605_v56, 0.0  ;;  %v7622_v38 = vmax.f32 %v7606_v47, 0.0  ;;  %9055 = vmatprep.mubr.msk.f32.mxu0 %vm1142_vm2, %v12183_v42  ;;  %v7581_v44 = vmul.f32 0.11111111, %v7565_v53  ;;  %v7566_v6 = vadd.f32 %v7522_v2, %v7454_v41  ;;  %v5073_v32 = vld [vmem:[#allocation11 + $0xd8] sm:$0xff] }
 0x472   : > { %3180 = vmatprep.mubr.f32.mxu1 %v13241_v12  ;;  %9464 = vmatpush3.bf16.msra.mxu0 %v13304_v16  ;;  %v7607_v13 = vadd.f32 %v11788_v31, %v7579_v35  ;;  %v7608_v60 = vadd.f32 %v13291_v10, %v7580_v39  ;;  %v4746_v52 = vsel %vm1731_vm7, %v4744_v0, %v4745_v18  ;;  %v4887_v25 = vrot.slane %v11825_v34, 5 }
 0x473   : > { %9466 = vmatprep.subr.bf16.mxu0 %v13305_v20  ;;  %v7567_v42 = vadd.f32 %v7525_v48, %v7455_v15  ;;  %v7528_v22 = vsel %vm1572_vm5, %v7526_v50, %v7527_v7  ;;  %7779 = vrot.lane.b32.xlu0 %v7621_v19, %s10491_s23  ;;  %v7609_v23 = vadd.f32 %v11788_v31, %v7581_v44  ;;  %v7582_v61 = vmul.f32 0.11111111, %v7566_v6  ;;  %v13314_v6 = vld [vmem:[#allocation50_spill] sm:$0xff] }
 0x474   : > { %7781 = vrot.lane.b32.xlu1 %v7622_v38, %s10491_s23  ;;  %v7623_v41 = vmax.f32 %v7607_v13, 0.0  ;;  %v7624_v1 = vmax.f32 %v7608_v60, 0.0  ;;  %9056 = vmatmul.mubr.msk.f32.gmra.mrb[28].mxu0 %vm1142_vm2, %v4746_v52  ;;  %v13306_v0 = vrot.slane %v11966_v36, 4  ;;  %v13307_v34 = vrot.slane %v11951_v43, 4  ;;  %v13315_v52 = vld [vmem:[#allocation51_spill] sm:$0xff] }
 0x475   : > { %3181 = vmatmul.mubr.f32.gmra.mrb[38].mxu1 %v13241_v12  ;;  %v4888_v17 = vrot.slane %v11890_v28, 5  ;;  %v7583_v59 = vmul.f32 0.11111111, %v7567_v42  ;;  %v7568_v26 = vadd.f32 %v7528_v22, %v7456_v58  ;;  %v7610_v21 = vadd.f32 %v13291_v10, %v7582_v61 }
 0x476   : > { %v4749_v18 = vsel %vm1731_vm7, %v13307_v34, %v13306_v0  ;;  %v4891_v4 = vrot.slane %v11867_v45, 5  ;;  %v4890_v27 = vrot.slane %v11857_v55, 5  ;;  %v13308_v24 = vrot.slane %v11938_v11, 4 }
 0x477   : > { %9058 = vmatprep.mubr.msk.f32.mxu0 %vm1142_vm2, %v4749_v18  ;;  %v7584_v63 = vmul.f32 0.11111111, %v7568_v26  ;;  %v13309_v15 = vrot.slane %v11935_v33, 4  ;;  %7783 = vrot.lane.b32.xlu0 %v7623_v41, %s10491_s23  ;;  %v7625_v28 = vmax.f32 %v7609_v23, 0.0  ;;  %v7626_v16 = vmax.f32 %v7610_v21, 0.0 }
 0x478   : > { %7785 = vrot.lane.b32.xlu1 %v7624_v1, %s10491_s23  ;;  %v7611_v7 = vadd.f32 %v11788_v31, %v7583_v59  ;;  %v4889_v55 = vsel %vm1097_vm3, %v4887_v25, %v4888_v17  ;;  %v4893_v45 = vrot.slane %v11870_v3, 5  ;;  %v4894_v56 = vrot.slane %v11912_v51, 5 }
 0x479   : > { %v4752_v50 = vsel %vm1731_vm7, %v13309_v15, %v13308_v24  ;;  %v7612_v47 = vadd.f32 %v13291_v10, %v7584_v63  ;;  %v4892_v30 = vsel %vm1097_vm3, %v4890_v27, %v4891_v4  ;;  %v9469_v58 = vpack.c.bf16 %v5073_v32, %v5072_v9  ;;  %v5213_v32 = vld [vmem:[#allocation13 + $0x68] sm:$0xff] }
 0x47a   : > { %9059 = vmatmul.mubr.msk.f32.gmra.mrb[30].mxu0 %vm1142_vm2, %v4752_v50  ;;  %v4896_v35 = vrot.slane %v11899_v40, 5  ;;  %v4897_v39 = vrot.slane %v11909_v57, 5  ;;  %v7627_v53 = vmax.f32 %v7611_v7, 0.0  ;;  %v4895_v3 = vsel %vm1097_vm3, %v4893_v45, %v4894_v56  ;;  %v5353_v45 = vld [vmem:[#allocation13 + $0x8] sm:$0xff] }
 0x47b   : > { %9069 = vmatprep.mubr.msk.f32.mxu0 %vm1142_vm2, %v4889_v55  ;;  %7787 = vrot.lane.b32.xlu0 %v7625_v28, %s10491_s23  ;;  %v7628_v19 = vmax.f32 %v7612_v47, 0.0  ;;  %v4899_v51 = vrot.slane %v11915_v62, 5  ;;  %v4900_v38 = vrot.slane %v11928_v37, 5  ;;  %v4902_v57 = vrot.slane %v11922_v54, 5  ;;  %v5214_v28 = vld [vmem:[#allocation13 + $0x70] sm:$0xff]  ;;  %v5352_v55 = vld [vmem:[#allocation13] sm:$0xff] }
 0x47c   : > { %7789 = vrot.lane.b32.xlu1 %v7626_v16, %s10491_s23  ;;  %v4898_v40 = vsel %vm1097_vm3, %v4896_v35, %v4897_v39  ;;  %v4903_v2 = vrot.slane %v11925_v14, 5  ;;  %v4905_v37 = vrot.slane %v11951_v43, 5  ;;  %v4906_v48 = vrot.slane %v11966_v36, 5  ;;  %v13310_v36 = vld [vmem:[#allocation46_spill] sm:$0xff]  ;;  %v13311_v43 = vld [vmem:[#allocation47_spill] sm:$0xff] }
 0x47d   : > { %v4901_v62 = vsel %vm1097_vm3, %v4899_v51, %v4900_v38  ;;  %v4908_v54 = vrot.slane %v11935_v33, 5  ;;  %v4909_v14 = vrot.slane %v11938_v11, 5  ;;  %v13312_v33 = vld [vmem:[#allocation48_spill] sm:$0xff]  ;;  %v13313_v11 = vld [vmem:[#allocation49_spill] sm:$0xff]  ;;  %v7393_v25 = vrot.slane %v12211_v46, 7  ;;  %v5215_v16 = vld [vmem:[#allocation13 + $0x78] sm:$0xff] }
 0x47e   : > { %9070 = vmatmul.mubr.msk.f32.vlgmr.msra.gmra.mrb[24].mxu0 %vm1142_vm2, %v4892_v30  ;;  %v4904_v13 = vsel %vm1097_vm3, %v4902_v57, %v4903_v2  ;;  %v4907_v60 = vsel %vm1097_vm3, %v4905_v37, %v4906_v48  ;;  %v9477_v7 = vpack.c.bf16 %v5215_v16, %v5214_v28  ;;  %v12381_v56 = vpack.c.bf16 %v5353_v45, %v5352_v55 }
 0x47f   : > { %9468 = vmatpush3.bf16.msra.mxu0 %v13305_v20  ;;  %9072 = vmatprep.mubr.msk.f32.mxu0 %vm1142_vm2, %v4895_v3  ;;  %v4910_v44 = vsel %vm1097_vm3, %v4908_v54, %v4909_v14  ;;  %v13316_v20 = vld [vmem:[#allocation52_spill] sm:$0xff]  ;;  %v7426_v41 = vsel %vm7412_vm8, 0.0, %v7393_v25  ;;  %v7442_v1 = vsel %vm7412_vm8, %v7393_v25, 0.0  ;;  %v2224_v14 = vld [vmem:[%s13317_s20] sm:$0x3]  ;;  %s7857_s20 = sshll.u32 %s10997_s6, 4  ;;  %s13084_s20 = int_to_ptr.vmem [resolvable:$true] %s7857_s20 }
 0x480   : > { %9470 = vmatprep.subr.bf16.mxu0 %v9469_v58  ;;  %7791 = vrot.lane.b32.xlu0 %v7627_v53, %s10491_s23  ;;  %v7532_v0 = vrot.slane %v7426_v41, 2  ;;  %v7533_v34 = vrot.slane %v7442_v1, 2  ;;  %v7458_v59 = vadd.f32 %v7426_v41, %v12211_v46  ;;  %s10392_s17 = scalar_lea.vmem %s13084_s20, 6144 }
 0x481   : > { %7793 = vrot.lane.b32.xlu1 %v7628_v19, %s10491_s23  ;;  %p10393_p10 = scmp.ne.s32.totalorder %s13084_s20, %s10392_s17 }
 0x482   : > { %9073 = vmatmul.mubr.msk.f32.gmra.mrb[26].mxu0 %vm1142_vm2, %v4898_v40  ;;  %v7534_v26 = vsel %vm1572_vm5, %v7532_v0, %v7533_v34  ;;  %v7394_v0 = vrot.slane %v12161_v8, 7 }
 0x483   : > { %9075 = vmatprep.mubr.msk.f32.mxu0 %vm1142_vm2, %v4901_v62  ;;  %9472 = vmatpush3.bf16.msra.mxu0 %v9469_v58  ;;  %v7570_v4 = vadd.f32 %v7534_v26, %v7458_v59  ;;  %p10394_p11 = pnand %p10393_p10, %p13324_p1 }
 0x485   : > { %v7586_v63 = vmul.f32 0.11111111, %v7570_v4  ;;  %p10395_p12 = pneg %p10394_p11 }
 0x486   : > { %9076 = vmatmul.mubr.msk.f32.gmra.mrb[28].mxu0 %vm1142_vm2, %v4904_v13 }
 0x487   : > { %9078 = vmatprep.mubr.msk.f32.mxu0 %vm1142_vm2, %v4907_v60  ;;  %v7614_v15 = vadd.f32 %v13291_v10, %v7586_v63  ;;  %v7443_v63 = vsel %vm7412_vm8, %v7394_v0, 0.0 }
 0x488   : > { %v7536_v16 = vrot.slane %v7443_v63, 2 }
 0x489   : > { %v7630_v9 = vmax.f32 %v7614_v15, 0.0 }
 0x48a   : > { %9079 = vmatmul.mubr.msk.f32.gmra.mrb[30].mxu0 %vm1142_vm2, %v4910_v44 }
 0x48b   : > { %9089 = vmatprep.mubr.msk.f32.mxu0 %vm1142_vm2, %v12005_v29  ;;  %v7392_v29 = vrot.slane %v12199_v49, 7  ;;  %7797 = vrot.lane.b32.xlu1 %v7630_v9, %s10491_s23 }
 0x48d   : > { %v7425_v42 = vsel %vm7412_vm8, 0.0, %v7392_v29  ;;  %v7441_v22 = vsel %vm7412_vm8, %v7392_v29, 0.0 }
 0x48e   : > { %9090 = vmatmul.mubr.msk.f32.vlgmr.msra.gmra.mrb[24].mxu0 %vm1142_vm2, %v13310_v36  ;;  %v7529_v23 = vrot.slane %v7425_v42, 2  ;;  %v7530_v61 = vrot.slane %v7441_v22, 2  ;;  %v7457_v18 = vadd.f32 %v7425_v42, %v12199_v49  ;;  %v5212_v49 = vld [vmem:[#allocation13 + $0x60] sm:$0xff] }
 0x48f   : > { %9092 = vmatprep.mubr.msk.f32.mxu0 %vm1142_vm2, %v13311_v43  ;;  %v9473_v46 = vpack.c.bf16 %v5213_v32, %v5212_v49  ;;  %v13318_v43 = vld [vmem:[#allocation23_spill] sm:$0xff] }
 0x490   : > { %v7531_v17 = vsel %vm1572_vm5, %v7529_v23, %v7530_v61 }
 0x491   : > { %v7569_v21 = vadd.f32 %v7531_v17, %v7457_v18  ;;  %9474 = vmatprep.subr.bf16.mxu1 %v9473_v46  ;;  %v7395_v18 = vrot.slane %v12203_v5, 7 }
 0x492   : > { %9093 = vmatmul.mubr.msk.f32.gmra.mrb[26].mxu0 %vm1142_vm2, %v13312_v33  ;;  %9476 = vmatpush3.bf16.msra.mxu1 %v9473_v46  ;;  %v12423_v33 = vrot.slane %v2224_v14, %v13318_v43 }
 0x493   : > { %9095 = vmatprep.mubr.msk.f32.mxu0 %vm1142_vm2, %v13313_v11  ;;  %v7585_v27 = vmul.f32 0.11111111, %v7569_v21  ;;  %9478 = vmatprep.subr.bf16.mxu1 %v9477_v7  ;;  %v13319_v11 = vld [vmem:[#allocation24_spill] sm:$0xff]  ;;  %v7428_v15 = vsel %vm7412_vm8, 0.0, %v7395_v18 }
 0x494   : > { %v7538_v55 = vrot.slane %v7428_v15, 2 }
 0x495   : > { %v7613_v24 = vadd.f32 %v11788_v31, %v7585_v27  ;;  %v7427_v27 = vsel %vm7412_vm8, 0.0, %v7394_v0 }
 0x496   : > { %9096 = vmatmul.mubr.msk.f32.gmra.mrb[28].mxu0 %vm1142_vm2, %v13314_v6  ;;  %9480 = vmatpush3.bf16.msra.mxu1 %v9477_v7  ;;  %v12426_v6 = vrot.slane %v2224_v14, %v13319_v11  ;;  %v7535_v28 = vrot.slane %v7427_v27, 2 }
 0x497   : > { %9098 = vmatprep.mubr.msk.f32.mxu0 %vm1142_vm2, %v13315_v52  ;;  %v7629_v50 = vmax.f32 %v7613_v24, 0.0  ;;  %9482 = vmatprep.subr.bf16.mxu1 %v12381_v56 }
 0x499   : > { %7795 = vrot.lane.b32.xlu0 %v7629_v50, %s10491_s23  ;;  %v7444_v50 = vsel %vm7412_vm8, %v7395_v18, 0.0 }
 0x49a   : > { %9099 = vmatmul.mubr.msk.f32.gmra.mrb[30].mxu0 %vm1142_vm2, %v13316_v20  ;;  %v7539_v45 = vrot.slane %v7444_v50, 2  ;;  %v6631_v50 = vld [vmem:[#allocation14 + $0x90] sm:$0xff] }
 0x49b   : > { %6717 = vmatprep.mubr.f32.mxu0 %v13241_v12 }
 0x4d1   : > { %v12384_v47 = vpop.permute.xlu0 %7771 }
 0x4d6   : > { %v7774_v30 = vpop.permute.xlu1 %7773 }
 0x4d7   : > { %v7803_v58 = vsel %vm7634_vm1, %v12384_v47, %v7774_v30 }
 0x4d8   : > { %7828 = vst [vmem:[%s10997_s6 + $0x28] sm:$0xff] %v7803_v58 }
 0x4da   : > { %v12389_v35 = vpop.permute.xlu0 %7775 }
 0x4db   : > { %v7778_v39 = vpop.permute.xlu1 %7777 }
 0x4dc   : > { %v7804_v53 = vsel %vm7634_vm1, %v12389_v35, %v7778_v39 }
 0x4dd   : > { %7830 = vst [vmem:[%s10997_s6 + $0x58] sm:$0xff] %v7804_v53  ;;  %v7459_v53 = vadd.f32 %v7427_v27, %v12161_v8 }
 0x4e5   : > { %v12394_v19 = vpop.permute.xlu0 %7779 }
 0x4e6   : > { %v7782_v3 = vpop.permute.xlu1 %7781 }
 0x4e7   : > { %v7805_v51 = vsel %vm7634_vm1, %v12394_v19, %v7782_v3 }
 0x4e8   : > { %7832 = vst [vmem:[%s10997_s6 + $0x88] sm:$0xff] %v7805_v51 }
 0x4e9   : > { %v12399_v38 = vpop.permute.xlu0 %7783 }
 0x4ea   : > { %v7786_v40 = vpop.permute.xlu1 %7785 }
 0x4eb   : > { %v7806_v57 = vsel %vm7634_vm1, %v12399_v38, %v7786_v40  ;;  %v7537_v40 = vsel %vm1572_vm5, %v7535_v28, %v7536_v16  ;;  %v5354_v16 = vld [vmem:[#allocation13 + $0x10] sm:$0xff] }
 0x4ec   : > { %7834 = vst [vmem:[%s10997_s6 + $0xb8] sm:$0xff] %v7806_v57  ;;  %v7460_v57 = vadd.f32 %v7428_v15, %v12203_v5  ;;  %v6629_v15 = vld [vmem:[#allocation14 + $0x80] sm:$0xff] }
 0x4ed   : > { %v12404_v2 = vpop.permute.xlu0 %7787 }
 0x4ee   : > { %v7790_v62 = vpop.permute.xlu1 %7789 }
 0x4ef   : > { %v7807_v37 = vsel %vm7634_vm1, %v12404_v2, %v7790_v62 }
 0x4f0   : > { %7836 = vst [vmem:[%s10997_s6 + $0xe8] sm:$0xff] %v7807_v37  ;;  %v7540_v37 = vsel %vm1572_vm5, %v7538_v55, %v7539_v45 }
 0x4f2   : > { %v12409_v48 = vpop.permute.xlu0 %7791 }
 0x4f3   : > { %v7794_v13 = vpop.permute.xlu1 %7793 }
 0x4f4   : > { %v7808_v54 = vsel %vm7634_vm1, %v12409_v48, %v7794_v13 }
 0x4f5   : > { %7838 = vst [vmem:[%s10997_s6 + $0x118] sm:$0xff] %v7808_v54 }
 0x4fd   : > { %v7798_v44 = vpop.permute.xlu1 %7797 }
 0x50b   : > { %v12417_v60 = vpop.permute.xlu0 %7795 }
 0x50c   : > { %v7809_v36 = vsel %vm7634_vm1, %v12417_v60, %v7798_v44  ;;  %v7571_v44 = vadd.f32 %v7537_v40, %v7459_v53  ;;  %v5471_v40 = vld [vmem:[#allocation13 + $0x28] sm:$0xff] }
 0x50d   : > { %7840 = vst [vmem:[%s10997_s6 + $0x148] sm:$0xff] %v7809_v36 }
 0x52b   : > { %v3140_v52 = vpop.f32.mrb[24].mxu1 }
 0x52c   : > { %v9595_v29 = vadd.f32 %v3140_v52, %v12423_v33  ;;  %v3142_v25 = vpop.f32.mrb[25].mxu1  ;;  %v7572_v52 = vadd.f32 %v7540_v37, %v7460_v57 }
 0x52d   : > { %v9596_v20 = vadd.f32 %v3142_v25, %v12426_v6 }
 0x52e   : > { %v3203_v42 = vmax.f32 %v9595_v29, 0.0 }
 0x52f   : > { %v3204_v22 = vmax.f32 %v9596_v20, 0.0  ;;  %v3146_v41 = vpop.f32.mrb[26].mxu1 }
 0x530   : > { %v9597_v1 = vadd.f32 %v3146_v41, %v12423_v33  ;;  %7666 = vrot.lane.b32.xlu0 %v3203_v42, %s10491_s23  ;;  %v3148_v23 = vpop.f32.mrb[27].mxu1  ;;  %v7587_v42 = vmul.f32 0.11111111, %v7571_v44 }
 0x531   : > { %v9598_v61 = vadd.f32 %v3148_v23, %v12426_v6  ;;  %7668 = vrot.lane.b32.xlu1 %v3204_v22, %s10491_s23 }
 0x532   : > { %v3205_v34 = vmax.f32 %v9597_v1, 0.0  ;;  %v7588_v1 = vmul.f32 0.11111111, %v7572_v52 }
 0x533   : > { %v3206_v17 = vmax.f32 %v9598_v61, 0.0 }
 0x534   : > { %v3152_v59 = vpop.f32.mrb[28].mxu1  ;;  %7670 = vrot.lane.b32.xlu0 %v3205_v34, %s10491_s23 }
 0x535   : > { %v9599_v26 = vadd.f32 %v3152_v59, %v12423_v33  ;;  %v3154_v21 = vpop.f32.mrb[29].mxu1  ;;  %7672 = vrot.lane.b32.xlu1 %v3206_v17, %s10491_s23  ;;  %v7615_v59 = vadd.f32 %v11788_v31, %v7587_v42  ;;  %v6632_v31 = vld [vmem:[#allocation14 + $0x98] sm:$0xff]  ;;  %v5472_v42 = vld [vmem:[#allocation13 + $0x30] sm:$0xff] }
 0x536   : > { %v9600_v4 = vadd.f32 %v3154_v21, %v12426_v6  ;;  %v7616_v21 = vadd.f32 %v13291_v10, %v7588_v1  ;;  %v8183_v10 = vld [vmem:[%s13320_s22] ss:$0 sm:$0xff]  ;;  %s13323_s22 = sld [smem:[#allocation63_spill]] }
 0x537   : > { %v3207_v24 = vmax.f32 %v9599_v26, 0.0  ;;  %v7631_v63 = vmax.f32 %v7615_v59, 0.0  ;;  %v5588_v1 = vld [vmem:[#allocation13 + $0x40] sm:$0xff]  ;;  %v5707_v59 = vld [vmem:[#allocation13 + $0x88] sm:$0xff] }
 0x538   : > { %v3208_v9 = vmax.f32 %v9600_v4, 0.0  ;;  %v3158_v49 = vpop.f32.mrb[30].mxu1 }
 0x539   : > { %v9601_v32 = vadd.f32 %v3158_v49, %v12423_v33  ;;  %7674 = vrot.lane.b32.xlu0 %v3207_v24, %s10491_s23  ;;  %v3160_v46 = vpop.f32.mrb[31].mxu1  ;;  %v7632_v24 = vmax.f32 %v7616_v21, 0.0  ;;  %v5708_v21 = vld [vmem:[#allocation13 + $0x90] sm:$0xff] }
 0x53a   : > { %v9602_v7 = vadd.f32 %v3160_v46, %v12426_v6  ;;  %7676 = vrot.lane.b32.xlu1 %v3208_v9, %s10491_s23  ;;  %v9555_v9 = vpack.c.bf16 %v6631_v50, %v6629_v15  ;;  %v5827_v50 = vld [vmem:[#allocation13 + $0xb8] sm:$0xff] }
 0x53b   : > { %v3209_v30 = vmax.f32 %v9601_v32, 0.0 }
 0x53c   : > { %v3210_v58 = vmax.f32 %v9602_v7, 0.0  ;;  %v3164_v39 = vpop.f32.mrb[32].mxu1  ;;  %v5355_v7 = vld [vmem:[#allocation13 + $0x18] sm:$0xff] }
 0x53d   : > { %v9603_v3 = vadd.f32 %v3164_v39, %v12423_v33  ;;  %7678 = vrot.lane.b32.xlu0 %v3209_v30, %s10491_s23  ;;  %v3166_v51 = vpop.f32.mrb[33].mxu1  ;;  %v9485_v53 = vpack.c.bf16 %v5355_v7, %v5354_v16 }
 0x53e   : > { %v9604_v62 = vadd.f32 %v3166_v51, %v12426_v6  ;;  %7680 = vrot.lane.b32.xlu1 %v3210_v58, %s10491_s23  ;;  %v5470_v51 = vld [vmem:[#allocation13 + $0x20] sm:$0xff] }
 0x53f   : > { %v3211_v13 = vmax.f32 %v9603_v3, 0.0 }
 0x540   : > { %v3212_v54 = vmax.f32 %v9604_v62, 0.0  ;;  %v3170_v14 = vpop.f32.mrb[34].mxu1 }
 0x541   : > { %v9605_v8 = vadd.f32 %v3170_v14, %v12423_v33  ;;  %7682 = vrot.lane.b32.xlu0 %v3211_v13, %s10491_s23  ;;  %v3172_v36 = vpop.f32.mrb[35].mxu1  ;;  %v9489_v14 = vpack.c.bf16 %v5471_v40, %v5470_v51  ;;  %v5944_v40 = vld [vmem:[#allocation13 + $0xd0] sm:$0xff] }
 0x542   : > { %v9606_v29 = vadd.f32 %v3172_v36, %v12426_v6  ;;  %7684 = vrot.lane.b32.xlu1 %v3212_v54, %s10491_s23 }
 0x543   : > { %v3213_v5 = vmax.f32 %v9605_v8, 0.0 }
 0x544   : > { %v3214_v25 = vmax.f32 %v9606_v29, 0.0  ;;  %v3176_v20 = vpop.f32.mrb[36].mxu1 }
 0x545   : > { %v9607_v22 = vadd.f32 %v3176_v20, %v12423_v33  ;;  %7686 = vrot.lane.b32.xlu0 %v3213_v5, %s10491_s23  ;;  %v3178_v41 = vpop.f32.mrb[37].mxu1 }
 0x546   : > { %v9608_v23 = vadd.f32 %v3178_v41, %v12426_v6  ;;  %7688 = vrot.lane.b32.xlu1 %v3214_v25, %s10491_s23 }
 0x547   : > { %v3215_v61 = vmax.f32 %v9607_v22, 0.0  ;;  %v5473_v22 = vld [vmem:[#allocation13 + $0x38] sm:$0xff] }
 0x548   : > { %v3216_v0 = vmax.f32 %v9608_v23, 0.0  ;;  %v3182_v34 = vpop.f32.mrb[38].mxu1  ;;  %v9493_v41 = vpack.c.bf16 %v5473_v22, %v5472_v42  ;;  %v5589_v23 = vld [vmem:[#allocation13 + $0x48] sm:$0xff] }
 0x549   : > { %v9609_v18 = vadd.f32 %v3182_v34, %v12423_v33  ;;  %7690 = vrot.lane.b32.xlu0 %v3215_v61, %s10491_s23  ;;  %v3184_v17 = vpop.f32.mrb[39].mxu1  ;;  %v6630_v33 = vld [vmem:[#allocation14 + $0x88] sm:$0xff]  ;;  %v9497_v61 = vpack.c.bf16 %v5589_v23, %v5588_v1  ;;  %v5591_v34 = vld [vmem:[#allocation13 + $0x58] sm:$0xff] }
 0x54a   : > { %v9610_v26 = vadd.f32 %v3184_v17, %v12426_v6  ;;  %7692 = vrot.lane.b32.xlu1 %v3216_v0, %s10491_s23  ;;  %v9553_v6 = vpack.c.bf16 %v6632_v31, %v6630_v33  ;;  %v5590_v0 = vld [vmem:[#allocation13 + $0x50] sm:$0xff]  ;;  %v5706_v17 = vld [vmem:[#allocation13 + $0x80] sm:$0xff] }
 0x54b   : > { %v3217_v4 = vmax.f32 %v9609_v18, 0.0  ;;  %v9501_v18 = vpack.c.bf16 %v5591_v34, %v5590_v0  ;;  %v6108_v0 = vld [vmem:[#allocation14 + $0xc0] sm:$0xff]  ;;  %v6110_v34 = vld [vmem:[#allocation14 + $0xd0] sm:$0xff] }
 0x54c   : > { %v3218_v27 = vmax.f32 %v9610_v26, 0.0  ;;  %9554 = vmatprep.subr.bf16.mxu0 %v9553_v6  ;;  %v9505_v26 = vpack.c.bf16 %v5707_v59, %v5706_v17  ;;  %v5826_v6 = vld [vmem:[#allocation13 + $0xb0] sm:$0xff]  ;;  %v9531_v59 = vpack.c.bf16 %v6110_v34, %v6108_v0 }
 0x54d   : > { %7694 = vrot.lane.b32.xlu0 %v3217_v4, %s10491_s23  ;;  %9556 = vmatpush1.bf16.msra.mxu0 %v9555_v9  ;;  %v5709_v4 = vld [vmem:[#allocation13 + $0x98] sm:$0xff] }
 0x54e   : > { %7696 = vrot.lane.b32.xlu1 %v3218_v27, %s10491_s23  ;;  %v9509_v27 = vpack.c.bf16 %v5709_v4, %v5708_v21  ;;  %v6634_v4 = vld [vmem:[#allocation14 + $0xa8] sm:$0xff] }
 0x551   : > { %7799 = vrot.lane.b32.xlu0 %v7631_v63, %s10491_s23  ;;  %v5824_v63 = vld [vmem:[#allocation13 + $0xa0] sm:$0xff] }
 0x552   : > { %7801 = vrot.lane.b32.xlu1 %v7632_v24, %s10491_s23  ;;  %v5825_v24 = vld [vmem:[#allocation13 + $0xa8] sm:$0xff]  ;;  %s13081_s23 = scalar_lea.hbm %s13323_s22, %s10036_s24 }
 0x553   : > { %v9513_v33 = vpack.c.bf16 %v5825_v24, %v5824_v63  ;;  %v6633_v24 = vld [vmem:[#allocation14 + $0xa0] sm:$0xff] }
 0x561   : > { %v9091_v49 = vpop.f32.mrb[24].mxu0 }
 0x562   : > { %v9619_v32 = vadd.f32 %v9091_v49, %v8183_v10  ;;  %v5156_v46 = vpop.f32.mrb[25].mxu0  ;;  %v9517_v49 = vpack.c.bf16 %v5827_v50, %v5826_v6  ;;  %v6258_v50 = vld [vmem:[#allocation14 + $0x8] sm:$0xff] }
 0x563   : > { %v9620_v28 = vadd.f32 %v8183_v10, %v5156_v46  ;;  %v5942_v46 = vld [vmem:[#allocation13 + $0xc0] sm:$0xff] }
 0x564   : > { %v12479_v30 = vmax.f32 %v9619_v32, 0.0 }
 0x565   : > { %v12477_v55 = vmax.f32 %v9620_v28, 0.0  ;;  %v9094_v45 = vpop.f32.mrb[26].mxu0  ;;  %v5943_v28 = vld [vmem:[#allocation13 + $0xc8] sm:$0xff] }
 0x566   : > { %v9621_v58 = vadd.f32 %v9094_v45, %v8183_v10  ;;  %v5166_v39 = vpop.f32.mrb[27].mxu0 }
 0x567   : > { %v9622_v3 = vadd.f32 %v8183_v10, %v5166_v39  ;;  %9109 = vmatprep.mubr.msk.f32.mxu1 %vm1142_vm2, %v12477_v55 }
 0x568   : > { %9110 = vmatmul.mubr.msk.f32.vlgmr.msra.gmra.mrb[40].mxu1 %vm1142_vm2, %v12479_v30  ;;  %v12488_v37 = vmax.f32 %v9621_v58, 0.0 }
 0x569   : > { %v12485_v57 = vmax.f32 %v9622_v3, 0.0  ;;  %9484 = vmatpush3.bf16.msra.mxu1 %v12381_v56  ;;  %v9097_v62 = vpop.f32.mrb[28].mxu0 }
 0x56a   : > { %v9623_v13 = vadd.f32 %v9097_v62, %v8183_v10  ;;  %v5176_v54 = vpop.f32.mrb[29].mxu0  ;;  %9486 = vmatprep.subr.bf16.mxu1 %v9485_v53  ;;  %v5945_v62 = vld [vmem:[#allocation13 + $0xd8] sm:$0xff] }
 0x56b   : > { %v9624_v44 = vadd.f32 %v8183_v10, %v5176_v54  ;;  %9112 = vmatprep.mubr.msk.f32.mxu1 %vm1142_vm2, %v12485_v57 }
 0x56c   : > { %9113 = vmatmul.mubr.msk.f32.gmra.mrb[42].mxu1 %vm1142_vm2, %v12488_v37  ;;  %v12496_v52 = vmax.f32 %v9623_v13, 0.0 }
 0x56d   : > { %v12494_v8 = vmax.f32 %v9624_v44, 0.0  ;;  %v9100_v36 = vpop.f32.mrb[30].mxu0  ;;  %9488 = vmatpush3.bf16.msra.mxu1 %v9485_v53 }
 0x56e   : > { %v9625_v56 = vadd.f32 %v9100_v36, %v8183_v10  ;;  %v5186_v29 = vpop.f32.mrb[31].mxu0  ;;  %9490 = vmatprep.subr.bf16.mxu1 %v9489_v14  ;;  %v6109_v36 = vld [vmem:[#allocation14 + $0xc8] sm:$0xff] }
 0x56f   : > { %v9626_v5 = vadd.f32 %v8183_v10, %v5186_v29  ;;  %9115 = vmatprep.mubr.msk.f32.mxu1 %vm1142_vm2, %v12494_v8 }
 0x570   : > { %9116 = vmatmul.mubr.msk.f32.gmra.mrb[44].mxu1 %vm1142_vm2, %v12496_v52  ;;  %v12504_v20 = vmax.f32 %v9625_v56, 0.0  ;;  %v6111_v56 = vld [vmem:[#allocation14 + $0xd8] sm:$0xff] }
 0x571   : > { %v12502_v25 = vmax.f32 %v9626_v5, 0.0  ;;  %v9529_v5 = vpack.c.bf16 %v6111_v56, %v6109_v36 }
 0x573   : > { %9118 = vmatprep.mubr.msk.f32.mxu1 %vm1142_vm2, %v12502_v25 }
 0x574   : > { %9119 = vmatmul.mubr.msk.f32.gmra.mrb[46].mxu1 %vm1142_vm2, %v12504_v20 }
 0x575   : > { %9129 = vmatprep.mubr.f32.mxu1 %v13241_v12 }
 0x578   : > { %9130 = vmatmul.mubr.f32.vlgmr.msra.gmra.mrb[40].mxu1 %v13241_v12 }
 0x579   : > { %9492 = vmatpush3.bf16.msra.mxu1 %v9489_v14  ;;  %9132 = vmatprep.mubr.f32.mxu1 %v13241_v12  ;;  %v9525_v14 = vpack.c.bf16 %v5945_v62, %v5944_v40  ;;  %v6261_v40 = vld [vmem:[#allocation14 + $0x20] sm:$0xff]  ;;  %v6263_v62 = vld [vmem:[#allocation14 + $0x30] sm:$0xff] }
 0x57a   : > { %9494 = vmatprep.subr.bf16.mxu1 %v9493_v41 }
 0x57c   : > { %9133 = vmatmul.mubr.msk.f32.gmra.mrb[42].mxu1 %vm1142_vm2, %v12477_v55 }
 0x57d   : > { %9135 = vmatprep.mubr.msk.f32.mxu1 %vm1142_vm2, %v12479_v30  ;;  %9496 = vmatpush3.bf16.msra.mxu1 %v9493_v41 }
 0x57e   : > { %9498 = vmatprep.subr.bf16.mxu1 %v9497_v61 }
 0x580   : > { %9136 = vmatmul.mubr.msk.f32.gmra.mrb[44].mxu1 %vm1142_vm2, %v12485_v57 }
 0x581   : > { %9138 = vmatprep.mubr.msk.f32.mxu1 %vm1142_vm2, %v12488_v37 }
 0x584   : > { %9139 = vmatmul.mubr.msk.f32.gmra.mrb[46].mxu1 %vm1142_vm2, %v12494_v8 }
 0x585   : > { %9149 = vmatprep.mubr.f32.mxu1 %v13241_v12 }
 0x588   : > { %9150 = vmatmul.mubr.f32.vlgmr.msra.gmra.mrb[40].mxu1 %v13241_v12 }
 0x589   : > { %9500 = vmatpush3.bf16.msra.mxu1 %v9497_v61  ;;  %9152 = vmatprep.mubr.msk.f32.mxu1 %vm1142_vm2, %v12477_v55 }
 0x58a   : > { %9502 = vmatprep.subr.bf16.mxu1 %v9501_v18 }
 0x58c   : > { %9153 = vmatmul.mubr.msk.f32.gmra.mrb[42].mxu1 %vm1142_vm2, %v12479_v30 }
 0x58d   : > { %9155 = vmatprep.mubr.msk.f32.mxu1 %vm1142_vm2, %v12485_v57  ;;  %9504 = vmatpush3.bf16.msra.mxu1 %v9501_v18 }
 0x58e   : > { %9506 = vmatprep.subr.bf16.mxu1 %v9505_v26 }
 0x590   : > { %9156 = vmatmul.mubr.msk.f32.gmra.mrb[44].mxu1 %vm1142_vm2, %v12488_v37 }
 0x591   : > { %9158 = vmatprep.mubr.msk.f32.mxu1 %vm1142_vm2, %v12494_v8 }
 0x594   : > { %9159 = vmatmul.mubr.msk.f32.gmra.mrb[46].mxu1 %vm1142_vm2, %v12496_v52 }
 0x595   : > { %9169 = vmatprep.mubr.f32.mxu1 %v13241_v12 }
 0x598   : > { %9170 = vmatmul.mubr.msk.f32.vlgmr.msra.gmra.mrb[40].mxu1 %vm1142_vm2, %v12477_v55  ;;  %v9521_v55 = vpack.c.bf16 %v5943_v28, %v5942_v46  ;;  %v6257_v46 = vld [vmem:[#allocation14] sm:$0xff]  ;;  %v6259_v28 = vld [vmem:[#allocation14 + $0x10] sm:$0xff] }
 0x599   : > { %9508 = vmatpush3.bf16.msra.mxu1 %v9505_v26  ;;  %9172 = vmatprep.mubr.msk.f32.mxu1 %vm1142_vm2, %v12479_v30  ;;  %v6112_v26 = vld [vmem:[#allocation14 + $0xe0] sm:$0xff] }
 0x59a   : > { %9510 = vmatprep.subr.bf16.mxu1 %v9509_v27 }
 0x59c   : > { %9173 = vmatmul.mubr.msk.f32.gmra.mrb[42].mxu1 %vm1142_vm2, %v12485_v57 }
 0x59d   : > { %9175 = vmatprep.mubr.msk.f32.mxu1 %vm1142_vm2, %v12488_v37  ;;  %9512 = vmatpush3.bf16.msra.mxu1 %v9509_v27  ;;  %v6636_v27 = vld [vmem:[#allocation14 + $0xb8] sm:$0xff] }
 0x59e   : > { %9514 = vmatprep.subr.bf16.mxu1 %v9513_v33 }
 0x5a0   : > { %9176 = vmatmul.mubr.msk.f32.gmra.mrb[44].mxu1 %vm1142_vm2, %v12494_v8 }
 0x5a1   : > { %9178 = vmatprep.mubr.msk.f32.mxu1 %vm1142_vm2, %v12496_v52 }
 0x5a2   : > { %v7667_v31 = vpop.permute.xlu0 %7666 }
 0x5a3   : > { %7723 = vst.msk [vmem:[%s10997_s6 + $0x8] sm:$0xff] %vm7722_vm9, %v7667_v31  ;;  %v7669_v15 = vpop.permute.xlu1 %7668 }
 0x5a4   : > { %9179 = vmatmul.mubr.msk.f32.gmra.mrb[46].mxu1 %vm1142_vm2, %v12502_v25  ;;  %v7698_v9 = vsel %vm7634_vm1, %v7667_v31, %v7669_v15  ;;  %v6808_v31 = vld [vmem:[#allocation14 + $0x108] sm:$0xff]  ;;  %v6810_v15 = vld [vmem:[#allocation14 + $0x118] sm:$0xff] }
 0x5a5   : > { %7724 = vst [vmem:[%s10997_s6 + $0x10] sm:$0xff] %v7698_v9  ;;  %9189 = vmatprep.mubr.msk.f32.mxu1 %vm1142_vm2, %v12479_v30  ;;  %v9561_v6 = vpack.c.bf16 %v6810_v15, %v6808_v31  ;;  %v6260_v9 = vld [vmem:[#allocation14 + $0x18] sm:$0xff] }
 0x5a6   : > { %v7671_v10 = vpop.permute.xlu0 %7670 }
 0x5a7   : > { %7725 = vst.msk [vmem:[%s10997_s6 + $0x38] sm:$0xff] %vm7722_vm9, %v7671_v10  ;;  %v7673_v32 = vpop.permute.xlu1 %7672 }
 0x5a8   : > { %9190 = vmatmul.mubr.msk.f32.vlgmr.msra.gmra.mrb[40].mxu1 %vm1142_vm2, %v12485_v57  ;;  %v7699_v16 = vsel %vm7634_vm1, %v7671_v10, %v7673_v32  ;;  %v9537_v10 = vpack.c.bf16 %v6260_v9, %v6258_v50  ;;  %v6813_v50 = vld [vmem:[#allocation14 + $0x130] sm:$0xff] }
 0x5a9   : > { %9516 = vmatpush3.bf16.msra.mxu1 %v9513_v33  ;;  %7726 = vst [vmem:[%s10997_s6 + $0x40] sm:$0xff] %v7699_v16  ;;  %9192 = vmatprep.mubr.msk.f32.mxu1 %vm1142_vm2, %v12488_v37  ;;  %v6635_v33 = vld [vmem:[#allocation14 + $0xb0] sm:$0xff] }
 0x5aa   : > { %9518 = vmatprep.subr.bf16.mxu1 %v9517_v49 }
 0x5ab   : > { %v7675_v7 = vpop.permute.xlu0 %7674 }
 0x5ac   : > { %7727 = vst.msk [vmem:[%s10997_s6 + $0x68] sm:$0xff] %vm7722_vm9, %v7675_v7  ;;  %v7677_v45 = vpop.permute.xlu1 %7676  ;;  %9193 = vmatmul.mubr.msk.f32.gmra.mrb[42].mxu1 %vm1142_vm2, %v12494_v8 }
 0x5ad   : > { %v7700_v30 = vsel %vm7634_vm1, %v7675_v7, %v7677_v45  ;;  %9195 = vmatprep.mubr.msk.f32.mxu1 %vm1142_vm2, %v12496_v52  ;;  %9520 = vmatpush3.bf16.msra.mxu1 %v9517_v49  ;;  %v12635_v49 = vld [vmem:[%s13321_s0] ss:$0 sm:$0xff]  ;;  %v6264_v45 = vld [vmem:[#allocation14 + $0x38] sm:$0xff]  ;;  %s10494_s0 = smov [#allocation16]  }
 0x5ae   : > { %7728 = vst [vmem:[%s10997_s6 + $0x70] sm:$0xff] %v7700_v30  ;;  %9522 = vmatprep.subr.bf16.mxu1 %v9521_v55  ;;  %s10396_s9 = sshll.u32 %s10494_s0, 4  ;;  %s10397_s9 = int_to_ptr.vmem [resolvable:$false] %s10396_s9 }
 0x5af   : > { %v7679_v58 = vpop.permute.xlu0 %7678  ;;  %s10398_s26 = scalar_lea.vmem %s10397_s9, 12288  ;;  %p10399_p13 = scmp.lt.s32.totalorder %s13084_s20, %s10397_s9 }
 0x5b0   : > { %7729 = vst.msk [vmem:[%s10997_s6 + $0x98] sm:$0xff] %vm7722_vm9, %v7679_v58  ;;  %v7681_v39 = vpop.permute.xlu1 %7680  ;;  %9196 = vmatmul.mubr.msk.f32.gmra.mrb[44].mxu1 %vm1142_vm2, %v12502_v25  ;;  %p10400_p8 = scmp.lt.s32.totalorder %s10398_s26, %s10392_s17 }
 0x5b1   : > { %v7701_v53 = vsel %vm7634_vm1, %v7679_v58, %v7681_v39  ;;  %9198 = vmatprep.mubr.msk.f32.mxu1 %vm1142_vm2, %v12504_v20  ;;  %v9539_v39 = vpack.c.bf16 %v6259_v28, %v6257_v46  ;;  %v6986_v28 = vld [vmem:[#allocation14 + $0x148] sm:$0xff] }
 0x5b2   : > { %7730 = vst [vmem:[%s10997_s6 + $0xa0] sm:$0xff] %v7701_v53  ;;  %p10401_p6 = por %p10400_p8, %p10399_p13 }
 0x5b3   : > { %v7683_v3 = vpop.permute.xlu0 %7682 }
 0x5b4   : > { %7731 = vst.msk [vmem:[%s10997_s6 + $0xc8] sm:$0xff] %vm7722_vm9, %v7683_v3  ;;  %v7685_v51 = vpop.permute.xlu1 %7684  ;;  %9199 = vmatmul.mubr.f32.gmra.mrb[46].mxu1 %v13241_v12  ;;  %p10402_p9 = pnand %p10401_p6, %p10395_p12 }
 0x5b5   : > { %v7702_v13 = vsel %vm7634_vm1, %v7683_v3, %v7685_v51  ;;  %9209 = vmatprep.mubr.msk.f32.mxu1 %vm1142_vm2, %v12485_v57 }
 0x5b6   : > { %7732 = vst [vmem:[%s10997_s6 + $0xd0] sm:$0xff] %v7702_v13 }
 0x5b7   : > { %v7687_v54 = vpop.permute.xlu0 %7686 }
 0x5b8   : > { %7733 = vst.msk [vmem:[%s10997_s6 + $0xf8] sm:$0xff] %vm7722_vm9, %v7687_v54  ;;  %v7689_v44 = vpop.permute.xlu1 %7688  ;;  %9210 = vmatmul.mubr.msk.f32.vlgmr.msra.gmra.mrb[40].mxu1 %vm1142_vm2, %v12488_v37 }
 0x5b9   : > { %v7703_v29 = vsel %vm7634_vm1, %v7687_v54, %v7689_v44  ;;  %9524 = vmatpush3.bf16.msra.mxu1 %v9521_v55  ;;  %9212 = vmatprep.mubr.msk.f32.mxu1 %vm1142_vm2, %v12494_v8  ;;  %v6262_v55 = vld [vmem:[#allocation14 + $0x28] sm:$0xff] }
 0x5ba   : > { %7734 = vst [vmem:[%s10997_s6 + $0x100] sm:$0xff] %v7703_v29  ;;  %9526 = vmatprep.subr.bf16.mxu1 %v9525_v14  ;;  %v9541_v51 = vpack.c.bf16 %v6264_v45, %v6262_v55  ;;  %v6452_v54 = vld [vmem:[#allocation14 + $0x48] sm:$0xff] }
 0x5bb   : > { %v7691_v57 = vpop.permute.xlu0 %7690 }
 0x5bc   : > { %7735 = vst.msk [vmem:[%s10997_s6 + $0x128] sm:$0xff] %vm7722_vm9, %v7691_v57  ;;  %v7693_v42 = vpop.permute.xlu1 %7692  ;;  %9213 = vmatmul.mubr.msk.f32.gmra.mrb[42].mxu1 %vm1142_vm2, %v12496_v52 }
 0x5bd   : > { %v7704_v22 = vsel %vm7634_vm1, %v7691_v57, %v7693_v42  ;;  %9215 = vmatprep.mubr.msk.f32.mxu1 %vm1142_vm2, %v12502_v25  ;;  %9528 = vmatpush3.bf16.msra.mxu1 %v9525_v14  ;;  %v6454_v14 = vld [vmem:[#allocation14 + $0x58] sm:$0xff]  ;;  %v9543_v57 = vpack.c.bf16 %v6263_v62, %v6261_v40 }
 0x5be   : > { %7736 = vst [vmem:[%s10997_s6 + $0x130] sm:$0xff] %v7704_v22  ;;  %9530 = vmatprep.subr.bf16.mxu1 %v9529_v5  ;;  %v9545_v0 = vpack.c.bf16 %v6454_v14, %v6452_v54 }
 0x5bf   : > { %v7695_v41 = vpop.permute.xlu0 %7694 }
 0x5c0   : > { %7737 = vst.msk [vmem:[%s10997_s6 + $0x158] sm:$0xff] %vm7722_vm9, %v7695_v41  ;;  %v7697_v1 = vpop.permute.xlu1 %7696  ;;  %9216 = vmatmul.mubr.msk.f32.gmra.mrb[44].mxu1 %vm1142_vm2, %v12504_v20 }
 0x5c1   : > { %v7705_v23 = vsel %vm7634_vm1, %v7695_v41, %v7697_v1  ;;  %9218 = vmatprep.mubr.f32.mxu1 %v13241_v12  ;;  %v6807_v1 = vld [vmem:[#allocation14 + $0x100] sm:$0xff] }
 0x5c2   : > { %7738 = vst [vmem:[%s10997_s6 + $0x160] sm:$0xff] %v7705_v23  ;;  %v6809_v23 = vld [vmem:[#allocation14 + $0x110] sm:$0xff] }
 0x5c3   : > { %v12612_v61 = vpop.permute.xlu0 %7799 }
 0x5c4   : > { %v7802_v18 = vpop.permute.xlu1 %7801  ;;  %9219 = vmatmul.mubr.f32.gmra.mrb[46].mxu1 %v13241_v12 }
 0x5c5   : > { %v7810_v17 = vsel %vm7634_vm1, %v12612_v61, %v7802_v18  ;;  %9229 = vmatprep.mubr.msk.f32.mxu1 %vm1142_vm2, %v12488_v37  ;;  %v6113_v37 = vld [vmem:[#allocation14 + $0xe8] sm:$0xff] }
 0x5c6   : > { %7842 = vst [vmem:[%s10997_s6 + $0x178] sm:$0xff] %v7810_v17  ;;  %v6812_v17 = vld [vmem:[#allocation14 + $0x128] sm:$0xff] }
 0x5c8   : > { %9230 = vmatmul.mubr.msk.f32.vlgmr.msra.gmra.mrb[40].mxu1 %vm1142_vm2, %v12494_v8  ;;  %v6115_v8 = vld [vmem:[#allocation14 + $0xf8] sm:$0xff] }
 0x5c9   : > { %9232 = vmatprep.mubr.msk.f32.mxu1 %vm1142_vm2, %v12496_v52  ;;  %9532 = vmatpush1.bf16.msra.mxu1 %v9531_v59  ;;  %v9533_v21 = vpack.c.bf16 %v6115_v8, %v6113_v37  ;;  %v6114_v52 = vld [vmem:[#allocation14 + $0xf0] sm:$0xff]  ;;  %v6814_v59 = vld [vmem:[#allocation14 + $0x138] sm:$0xff] }
 0x5ca   : > { %v9535_v63 = vpack.c.bf16 %v6114_v52, %v6112_v26 }
 0x5cb   : > { %9534 = vmatprep.subr.bf16.mxu1 %v9533_v21 }
 0x5cc   : > { %9233 = vmatmul.mubr.msk.f32.gmra.mrb[42].mxu1 %vm1142_vm2, %v12502_v25  ;;  %v9557_v25 = vpack.c.bf16 %v6636_v27, %v6634_v4  ;;  %v9563_v27 = vpack.c.bf16 %v6809_v23, %v6807_v1 }
 0x5cd   : > { %9235 = vmatprep.mubr.msk.f32.mxu1 %vm1142_vm2, %v12504_v20  ;;  %v9559_v20 = vpack.c.bf16 %v6635_v33, %v6633_v24  ;;  %9536 = vmatpush1.bf16.msra.mxu1 %v9535_v63  ;;  %v9565_v24 = vpack.c.bf16 %v6814_v59, %v6812_v17  ;;  %v12719_v17 = vld [vmem:[#allocation14 + $0x150] sm:$0xff] }
 0x5ce   : > { %9558 = vmatprep.subr.bf16.mxu0 %v9557_v25  ;;  %9538 = vmatprep.subr.bf16.mxu1 %v9537_v10 }
 0x5cf   : > { %9560 = vmatpush1.bf16.msra.mxu0 %v9559_v20 }
 0x5d0   : > { %9236 = vmatmul.mubr.f32.gmra.mrb[44].mxu1 %v13241_v12  ;;  %9562 = vmatprep.subr.bf16.mxu0 %v9561_v6  ;;  %v6811_v6 = vld [vmem:[#allocation14 + $0x120] sm:$0xff] }
 0x5d1   : > { %9238 = vmatprep.mubr.f32.mxu1 %v13241_v12  ;;  %v9567_v55 = vpack.c.bf16 %v6813_v50, %v6811_v6 }
 0x5d4   : > { %9239 = vmatmul.mubr.f32.gmra.mrb[46].mxu1 %v13241_v12 }
 0x5d5   : > { %6208 = vmatprep.mubr.f32.mxu1 %v13241_v12 }
 0x69b   : > { %v9231_v32 = vpop.f32.mrb[40].mxu1 }
 0x69c   : > { %v9627_v16 = vadd.f32 %v9231_v32, %v12635_v49  ;;  %v6012_v7 = vpop.f32.mrb[41].mxu1 }
 0x69d   : > { %v9628_v30 = vadd.f32 %v12635_v49, %v6012_v7 }
 0x69e   : > { %v6060_v58 = vmax.f32 %v9627_v16, 0.0  ;;  %v6988_v16 = vld [vmem:[#allocation14 + $0x158] sm:$0xff] }
 0x69f   : > { %v6059_v53 = vmax.f32 %v9628_v30, 0.0  ;;  %v9234_v3 = vpop.f32.mrb[42].mxu1 }
 0x6a0   : > { %v6022_v13 = vpop.f32.mrb[43].mxu1  ;;  %v6076_v44 = vrot.slane %v6060_v58, 5  ;;  %v9629_v56 = vadd.f32 %v9234_v3, %v12635_v49 }
 0x6a1   : > { %v6075_v36 = vrot.slane %v6059_v53, 5  ;;  %v9630_v29 = vadd.f32 %v12635_v49, %v6022_v13  ;;  %8285 = vmatmul.mubr.msk.f32.vlgmr.msra.gmra.mrb[48].mxu1 %vm1142_vm2, %v6059_v53 }
 0x6a2   : > { %6214 = vmatprep.mubr.f32.mxu1 %v13241_v12  ;;  %9540 = vmatpush1.bf16.msra.mxu1 %v9539_v39  ;;  %v12651_v37 = vsel %vm1097_vm3, 0.0, %v6076_v44  ;;  %v12654_v8 = vsel %vm1097_vm3, %v6076_v44, 0.0  ;;  %v6062_v26 = vmax.f32 %v9629_v56, 0.0  ;;  %v9569_v39 = vpack.c.bf16 %v6988_v16, %v6986_v28  ;;  %v12747_v28 = vld [vmem:[#allocation14 + $0x60] sm:$0xff]  ;;  %v12749_v16 = vld [vmem:[#allocation14 + $0x70] sm:$0xff] }
 0x6a3   : > { %v12644_v5 = vsel %vm1097_vm3, 0.0, %v6075_v36  ;;  %v12647_v42 = vsel %vm1097_vm3, %v6075_v36, 0.0  ;;  %v6061_v22 = vmax.f32 %v9630_v29, 0.0  ;;  %v9237_v41 = vpop.f32.mrb[44].mxu1  ;;  %9542 = vmatprep.subr.bf16.mxu1 %v9541_v51  ;;  %v6607_v31 = vrot.slane %v12651_v37, 2 }
 0x6a4   : > { %v6605_v34 = vrot.slane %v12647_v42, 2  ;;  %v6032_v18 = vpop.f32.mrb[45].mxu1  ;;  %v6604_v4 = vrot.slane %v12644_v5, 2  ;;  %v9631_v63 = vadd.f32 %v9237_v41, %v12635_v49  ;;  %v6608_v15 = vrot.slane %v12654_v8, 2 }
 0x6a5   : > { %v6077_v21 = vrot.slane %v6061_v22, 5  ;;  %8286 = vmatmul.mubr.msk.f32.gmra.mrb[50].mxu1 %vm1142_vm2, %v6060_v58  ;;  %v9632_v52 = vadd.f32 %v12635_v49, %v6032_v18  ;;  %v6078_v9 = vrot.slane %v6062_v26, 5  ;;  %v12717_v18 = vld [vmem:[#allocation14 + $0x140] sm:$0xff]  ;;  %v6964_v6 = vrot.slane %v12654_v8, 5 }
 0x6a6   : > { %6220 = vmatprep.mubr.f32.mxu1 %v13241_v12  ;;  %9544 = vmatpush1.bf16.msra.mxu1 %v9543_v57  ;;  %v6606_v33 = vsel %vm1572_vm5, %v6604_v4, %v6605_v34  ;;  %v6064_v7 = vmax.f32 %v9631_v63, 0.0  ;;  %v6609_v45 = vsel %vm1572_vm5, %v6607_v31, %v6608_v15  ;;  %v6453_v4 = vld [vmem:[#allocation14 + $0x50] sm:$0xff]  ;;  %v6456_v31 = vld [vmem:[#allocation14 + $0x68] sm:$0xff] }
 0x6a7   : > { %v9240_v25 = vpop.f32.mrb[46].mxu1  ;;  %9546 = vmatprep.subr.bf16.mxu1 %v9545_v0  ;;  %v12665_v10 = vsel %vm1097_vm3, 0.0, %v6077_v21  ;;  %v12668_v32 = vsel %vm1097_vm3, %v6077_v21, 0.0  ;;  %v6063_v46 = vmax.f32 %v9632_v52, 0.0  ;;  %8309 = vmatmul.mubr.msk.f32.vlgmr.msra.gmra.mrb[32].mxu0 %vm1142_vm2, %v6606_v33  ;;  %v12678_v53 = vsel %vm1097_vm3, 0.0, %v6078_v9  ;;  %v6451_v52 = vld [vmem:[#allocation14 + $0x40] sm:$0xff] }
 0x6a8   : > { %v6042_v20 = vpop.f32.mrb[47].mxu1  ;;  %9564 = vmatpush1.bf16.msra.mxu0 %v9563_v27  ;;  %6723 = vmatprep.mubr.f32.mxu0 %v13241_v12  ;;  %v6610_v30 = vrot.slane %v12665_v10, 2  ;;  %v6611_v58 = vrot.slane %v12668_v32, 2  ;;  %v12681_v3 = vsel %vm1097_vm3, %v6078_v9, 0.0  ;;  %v12687_v62 = vadd.f32 %v9240_v25, %v12635_v49 }
 0x6a9   : > { %8287 = vmatmul.mubr.msk.f32.gmra.mrb[52].mxu1 %vm1142_vm2, %v6061_v22  ;;  %9566 = vmatprep.subr.bf16.mxu0 %v9565_v24  ;;  %v6079_v51 = vrot.slane %v6063_v46, 5  ;;  %v9634_v40 = vadd.f32 %v12635_v49, %v6042_v20  ;;  %v6080_v13 = vrot.slane %v6064_v7, 5  ;;  %v6613_v14 = vrot.slane %v12678_v53, 2 }
 0x6aa   : > { %6226 = vmatprep.mubr.f32.mxu1 %v13241_v12  ;;  %v6612_v54 = vsel %vm1572_vm5, %v6610_v30, %v6611_v58  ;;  %v6614_v44 = vrot.slane %v12681_v3, 2  ;;  %v6066_v29 = vmax.f32 %v12687_v62, 0.0  ;;  %v6961_v0 = vrot.slane %v12647_v42, 5 }
 0x6ab   : > { %8310 = vmatmul.mubr.msk.f32.gmra.mrb[34].mxu0 %vm1142_vm2, %v6609_v45  ;;  %v12695_v36 = vsel %vm1097_vm3, 0.0, %v6079_v51  ;;  %v12698_v56 = vsel %vm1097_vm3, %v6079_v51, 0.0  ;;  %v6065_v49 = vmax.f32 %v9634_v40, 0.0  ;;  %v12706_v57 = vsel %vm1097_vm3, 0.0, %v6080_v13 }
 0x6ac   : > { %6729 = vmatprep.mubr.f32.mxu0 %v13241_v12  ;;  %9568 = vmatpush1.bf16.msra.mxu0 %v9567_v55  ;;  %v12709_v22 = vsel %vm1097_vm3, %v6080_v13, 0.0  ;;  %v6615_v41 = vsel %vm1572_vm5, %v6613_v14, %v6614_v44  ;;  %v6616_v1 = vrot.slane %v12695_v36, 2  ;;  %v6617_v23 = vrot.slane %v12698_v56, 2 }
 0x6ad   : > { %8288 = vmatmul.mubr.msk.f32.gmra.mrb[54].mxu1 %vm1142_vm2, %v6062_v26  ;;  %9570 = vmatprep.subr.bf16.mxu0 %v9569_v39  ;;  %v6081_v34 = vrot.slane %v6065_v49, 5  ;;  %v6082_v59 = vrot.slane %v6066_v29, 5  ;;  %v6619_v26 = vrot.slane %v12706_v57, 2  ;;  %v6620_v21 = vrot.slane %v12709_v22, 2 }
 0x6ae   : > { %6232 = vmatprep.mubr.f32.mxu1 %v13241_v12  ;;  %v6960_v27 = vrot.slane %v12644_v5, 5  ;;  %v6618_v63 = vsel %vm1572_vm5, %v6616_v1, %v6617_v23  ;;  %v9571_v25 = vpack.c.bf16 %v12719_v17, %v12717_v18  ;;  %v6963_v24 = vrot.slane %v12651_v37, 5 }
 0x6af   : > { %8311 = vmatmul.mubr.msk.f32.gmra.mrb[36].mxu0 %vm1142_vm2, %v6612_v54  ;;  %v12731_v33 = vsel %vm1097_vm3, 0.0, %v6081_v34  ;;  %v12734_v20 = vsel %vm1097_vm3, %v6081_v34, 0.0  ;;  %v12743_v50 = vsel %vm1097_vm3, 0.0, %v6082_v59  ;;  %v9547_v9 = vpack.c.bf16 %v6453_v4, %v6451_v52 }
 0x6b0   : > { %6735 = vmatprep.mubr.f32.mxu0 %v13241_v12  ;;  %v12739_v15 = vsel %vm1097_vm3, %v6960_v27, %v6961_v0  ;;  %v6967_v55 = vrot.slane %v12668_v32, 5  ;;  %v12754_v45 = vsel %vm1097_vm3, %v6082_v59, 0.0  ;;  %v6621_v30 = vsel %vm1572_vm5, %v6619_v26, %v6620_v21 }
 0x6b1   : > { %8289 = vmatmul.mubr.msk.f32.gmra.mrb[56].mxu1 %vm1142_vm2, %v6063_v46  ;;  %v6458_v46 = vld [vmem:[#allocation14 + $0x78] sm:$0xff]  ;;  %v12758_v58 = vsel %vm1097_vm3, %v6963_v24, %v6964_v6  ;;  %v6969_v39 = vrot.slane %v12678_v53, 5  ;;  %v6622_v51 = vrot.slane %v12731_v33, 2  ;;  %v6623_v40 = vrot.slane %v12734_v20, 2 }
 0x6b2   : > { %6238 = vmatprep.mubr.f32.mxu1 %v13241_v12  ;;  %v6970_v13 = vrot.slane %v12681_v3, 5  ;;  %v9549_v54 = vpack.c.bf16 %v6458_v46, %v6456_v31  ;;  %v9551_v14 = vpack.c.bf16 %v12749_v16, %v12747_v28  ;;  %v6972_v44 = vrot.slane %v12695_v36, 5 }
 0x6b3   : > { %8312 = vmatmul.mubr.msk.f32.gmra.mrb[38].mxu0 %vm1142_vm2, %v6615_v41  ;;  %v6625_v41 = vrot.slane %v12743_v50, 2  ;;  %v6626_v1 = vrot.slane %v12754_v45, 2  ;;  %v6783_v0 = vrot.slane %v12647_v42, 4  ;;  %v7139_v34 = vrot.slane %v12647_v42, 6 }
 0x6b4   : > { %6741 = vmatprep.mubr.f32.mxu0 %v13241_v12  ;;  %v12778_v23 = vsel %vm1097_vm3, %v6969_v39, %v6970_v13  ;;  %v6976_v26 = vrot.slane %v12709_v22, 5  ;;  %v6624_v21 = vsel %vm1572_vm5, %v6622_v51, %v6623_v40  ;;  %v6782_v52 = vrot.slane %v12644_v5, 4  ;;  %v6990_v40 = vld [vmem:[#allocation14 + $0x168] sm:$0xff]  ;;  %v6992_v13 = vld [vmem:[#allocation14 + $0x178] sm:$0xff] }
 0x6b5   : > { %8290 = vmatmul.mubr.msk.f32.gmra.mrb[58].mxu1 %vm1142_vm2, %v6064_v7  ;;  %v6966_v7 = vrot.slane %v12665_v10, 5  ;;  %v6978_v4 = vrot.slane %v12731_v33, 5  ;;  %v6979_v27 = vrot.slane %v12734_v20, 5  ;;  %v6981_v24 = vrot.slane %v12743_v50, 5 }
 0x6b6   : > { %6244 = vmatprep.mubr.f32.mxu1 %v13241_v12  ;;  %v6982_v31 = vrot.slane %v12754_v45, 5  ;;  %v7138_v6 = vrot.slane %v12644_v5, 6  ;;  %v6627_v46 = vsel %vm1572_vm5, %v6625_v41, %v6626_v1  ;;  %v7141_v16 = vrot.slane %v12651_v37, 6 }
 0x6b7   : > { %8313 = vmatmul.mubr.msk.f32.gmra.mrb[40].mxu0 %vm1142_vm2, %v6618_v63  ;;  %v12764_v62 = vsel %vm1097_vm3, %v6966_v7, %v6967_v55  ;;  %v12804_v28 = vsel %vm1097_vm3, %v6978_v4, %v6979_v27  ;;  %v7142_v7 = vrot.slane %v12654_v8, 6  ;;  %v7144_v39 = vrot.slane %v12665_v10, 6 }
 0x6b8   : > { %6747 = vmatprep.mubr.f32.mxu0 %v13241_v12  ;;  %v12809_v55 = vsel %vm1097_vm3, %v6981_v24, %v6982_v31  ;;  %v7145_v51 = vrot.slane %v12668_v32, 6  ;;  %v7150_v41 = vrot.slane %v12695_v36, 6  ;;  %v7157_v4 = vrot.slane %v12734_v20, 6 }
 0x6b9   : > { %8291 = vmatmul.mubr.msk.f32.gmra.mrb[60].mxu1 %vm1142_vm2, %v6065_v49  ;;  %v6973_v49 = vrot.slane %v12698_v56, 5  ;;  %v7159_v27 = vrot.slane %v12743_v50, 6  ;;  %v9573_v24 = vpack.c.bf16 %v6992_v13, %v6990_v40  ;;  %v7166_v40 = vld [vmem:[#allocation14 + $0x198] sm:$0xff]  ;;  %v6791_v17 = vrot.slane %v12678_v53, 4 }
 0x6ba   : > { %6250 = vmatprep.mubr.f32.mxu1 %v13241_v12  ;;  %v12826_v1 = vsel %vm2048_vm6, %v7144_v39, %v7145_v51  ;;  %v6786_v39 = vrot.slane %v12654_v8, 4  ;;  %v6989_v51 = vld [vmem:[#allocation14 + $0x160] sm:$0xff] }
 0x6bb   : > { %8314 = vmatmul.mubr.msk.f32.gmra.mrb[42].mxu0 %vm1142_vm2, %v6621_v30  ;;  %v12784_v59 = vsel %vm1097_vm3, %v6972_v44, %v6973_v49  ;;  %v12812_v30 = vsel %vm2048_vm6, %v7138_v6, %v7139_v34  ;;  %v12817_v44 = vsel %vm2048_vm6, %v7141_v16, %v7142_v7  ;;  %v7147_v49 = vrot.slane %v12678_v53, 6 }
 0x6bc   : > { %6753 = vmatprep.mubr.f32.mxu0 %v13241_v12  ;;  %v7154_v34 = vrot.slane %v12709_v22, 6  ;;  %v6784_v16 = vsel %vm1731_vm7, %v6782_v52, %v6783_v0  ;;  %v6785_v7 = vrot.slane %v12651_v37, 4 }
 0x6bd   : > { %8292 = vmatmul.mubr.msk.f32.gmra.mrb[62].mxu1 %vm1142_vm2, %v6066_v29  ;;  %v6975_v29 = vrot.slane %v12706_v57, 5 }
 0x6be   : > { %6353 = vmatprep.mubr.f32.mxu1 %v13241_v12  ;;  %v6787_v52 = vsel %vm1731_vm7, %v6785_v7, %v6786_v39  ;;  %v6800_v39 = vrot.slane %v12731_v33, 4 }
 0x6bf   : > { %8315 = vmatmul.mubr.msk.f32.gmra.mrb[44].mxu0 %vm1142_vm2, %v6624_v21  ;;  %v12795_v63 = vsel %vm1097_vm3, %v6975_v29, %v6976_v26  ;;  %v7151_v29 = vrot.slane %v12698_v56, 6  ;;  %v7156_v21 = vrot.slane %v12731_v33, 6 }
 0x6c0   : > { %6759 = vmatprep.mubr.f32.mxu0 %v13241_v12 }
 0x6c1   : > { %8293 = vmatmul.mubr.msk.f32.vlgmr.msra.gmra.mrb[48].mxu1 %vm1142_vm2, %v12644_v5  ;;  %v12840_v31 = vsel %vm2048_vm6, %v7150_v41, %v7151_v29  ;;  %v6788_v41 = vrot.slane %v12665_v10, 4  ;;  %v6789_v29 = vrot.slane %v12668_v32, 4 }
 0x6c2   : > { %6359 = vmatprep.mubr.f32.mxu1 %v13241_v12  ;;  %9548 = vmatpush1.bf16.msra.mxu1 %v9547_v9  ;;  %v7148_v9 = vrot.slane %v12681_v3, 6 }
 0x6c3   : > { %9550 = vmatprep.subr.bf16.mxu1 %v9549_v54  ;;  %8316 = vmatmul.mubr.msk.f32.gmra.mrb[46].mxu0 %vm1142_vm2, %v6627_v46  ;;  %v7153_v54 = vrot.slane %v12706_v57, 6  ;;  %v7160_v46 = vrot.slane %v12754_v45, 6  ;;  %v6790_v18 = vsel %vm1731_vm7, %v6788_v41, %v6789_v29  ;;  %v7163_v41 = vld [vmem:[#allocation14 + $0x180] sm:$0xff]  ;;  %v7165_v29 = vld [vmem:[#allocation14 + $0x190] sm:$0xff] }
 0x6c4   : > { %6895 = vmatprep.mubr.f32.mxu0 %v13241_v12  ;;  %v12834_v26 = vsel %vm2048_vm6, %v7147_v49, %v7148_v9  ;;  %v6991_v49 = vld [vmem:[#allocation14 + $0x170] sm:$0xff]  ;;  %v12850_v9 = vsel %vm2048_vm6, %v7156_v21, %v7157_v4  ;;  %v6794_v21 = vrot.slane %v12695_v36, 4  ;;  %v6795_v4 = vrot.slane %v12698_v56, 4 }
 0x6c5   : > { %8294 = vmatmul.mubr.msk.f32.gmra.mrb[50].mxu1 %vm1142_vm2, %v12651_v37  ;;  %v12843_v6 = vsel %vm2048_vm6, %v7153_v54, %v7154_v34  ;;  %v12856_v13 = vsel %vm2048_vm6, %v7159_v27, %v7160_v46  ;;  %v9575_v0 = vpack.c.bf16 %v6991_v49, %v6989_v51  ;;  %v6798_v46 = vrot.slane %v12709_v22, 4 }
 0x6c6   : > { %6365 = vmatprep.mubr.f32.mxu1 %v13241_v12  ;;  %9552 = vmatpush1.bf16.msra.mxu1 %v9551_v14  ;;  %v7164_v14 = vld [vmem:[#allocation14 + $0x188] sm:$0xff]  ;;  %v6796_v27 = vsel %vm1731_vm7, %v6794_v21, %v6795_v4  ;;  %v6801_v51 = vrot.slane %v12734_v20, 4  ;;  %v6426_v49 = vrot.slane %v12644_v5, 1  ;;  %v6430_v5 = vrot.slane %v12654_v8, 1  ;;  %v7170_v8 = vld [vmem:[#allocation14 + $0x1b8] sm:$0xff] }
 0x6c7   : > { %8317 = vmatmul.mubr.msk.f32.vlgmr.msra.gmra.mrb[32].mxu0 %vm1142_vm2, %v6784_v16  ;;  %v9577_v54 = vpack.c.bf16 %v7166_v40, %v7164_v14  ;;  %v6427_v16 = vrot.slane %v12647_v42, 1  ;;  %v6803_v14 = vrot.slane %v12743_v50, 4  ;;  %v6804_v42 = vrot.slane %v12754_v45, 4 }
 0x6c8   : > { %9572 = vmatpush1.bf16.msra.mxu0 %v9571_v25  ;;  %6901 = vmatprep.mubr.f32.mxu0 %v13241_v12  ;;  %v6792_v25 = vrot.slane %v12681_v3, 4  ;;  %v6802_v40 = vsel %vm1731_vm7, %v6800_v39, %v6801_v51  ;;  %v6442_v39 = vrot.slane %v12709_v22, 1  ;;  %v6447_v22 = vrot.slane %v12743_v50, 1 }
 0x6c9   : > { %8295 = vmatmul.mubr.msk.f32.gmra.mrb[52].mxu1 %vm1142_vm2, %v12665_v10  ;;  %9574 = vmatprep.subr.bf16.mxu0 %v9573_v24  ;;  %v6797_v24 = vrot.slane %v12706_v57, 4 }
 0x6ca   : > { %6371 = vmatprep.mubr.f32.mxu1 %v13241_v12  ;;  %v6793_v34 = vsel %vm1731_vm7, %v6791_v17, %v6792_v25  ;;  %v6432_v17 = vrot.slane %v12665_v10, 1  ;;  %v7168_v25 = vld [vmem:[#allocation14 + $0x1a8] sm:$0xff]  ;;  %v6436_v10 = vrot.slane %v12681_v3, 1  ;;  %v6439_v3 = vrot.slane %v12698_v56, 1 }
 0x6cb   : > { %8318 = vmatmul.mubr.msk.f32.gmra.mrb[34].mxu0 %vm1142_vm2, %v6787_v52  ;;  %v6799_v7 = vsel %vm1731_vm7, %v6797_v24, %v6798_v46  ;;  %v6429_v52 = vrot.slane %v12651_v37, 1  ;;  %v6433_v37 = vrot.slane %v12668_v32, 1  ;;  %v9581_v21 = vpack.c.bf16 %v7170_v8, %v7168_v25  ;;  %v7167_v24 = vld [vmem:[#allocation14 + $0x1a0] sm:$0xff]  ;;  %v7169_v32 = vld [vmem:[#allocation14 + $0x1b0] sm:$0xff] }
 0x6cc   : > { %6907 = vmatprep.mubr.f32.mxu0 %v13241_v12  ;;  %9576 = vmatpush1.bf16.msra.mxu0 %v9575_v0  ;;  %v6428_v0 = vsel %vm1413_vm4, %v6426_v49, %v6427_v16  ;;  %v9583_v46 = vpack.c.bf16 %v7169_v32, %v7167_v24  ;;  %v6444_v56 = vrot.slane %v12731_v33, 1 }
 0x6cd   : > { %8296 = vmatmul.mubr.msk.f32.gmra.mrb[54].mxu1 %vm1142_vm2, %v12678_v53  ;;  %9578 = vmatprep.subr.bf16.mxu0 %v9577_v54  ;;  %v6805_v54 = vsel %vm1731_vm7, %v6803_v14, %v6804_v42  ;;  %v6434_v4 = vsel %vm1413_vm4, %v6432_v17, %v6433_v37 }
 0x6ce   : > { %6377 = vmatprep.mubr.f32.mxu1 %v13241_v12 }
 0x6cf   : > { %8319 = vmatmul.mubr.msk.f32.gmra.mrb[36].mxu0 %vm1142_vm2, %v6790_v18  ;;  %v6431_v18 = vsel %vm1413_vm4, %v6429_v52, %v6430_v5 }
 0x6d0   : > { %6913 = vmatprep.mubr.f32.mxu0 %v13241_v12 }
 0x6d1   : > { %8297 = vmatmul.mubr.msk.f32.gmra.mrb[56].mxu1 %vm1142_vm2, %v12695_v36 }
 0x6d2   : > { %6383 = vmatprep.mubr.f32.mxu1 %v13241_v12 }
 0x6d3   : > { %8320 = vmatmul.mubr.msk.f32.gmra.mrb[38].mxu0 %vm1142_vm2, %v6793_v34  ;;  %v9579_v34 = vpack.c.bf16 %v7165_v29, %v7163_v41 }
 0x6d4   : > { %6919 = vmatprep.mubr.f32.mxu0 %v13241_v12 }
 0x6d5   : > { %8298 = vmatmul.mubr.msk.f32.gmra.mrb[58].mxu1 %vm1142_vm2, %v12706_v57 }
 0x6d6   : > { %6389 = vmatprep.mubr.f32.mxu1 %v13241_v12 }
 0x6d7   : > { %8321 = vmatmul.mubr.msk.f32.gmra.mrb[40].mxu0 %vm1142_vm2, %v6796_v27  ;;  %v6435_v27 = vrot.slane %v12678_v53, 1  ;;  %v6438_v53 = vrot.slane %v12695_v36, 1 }
 0x6d8   : > { %6925 = vmatprep.mubr.f32.mxu0 %v13241_v12 }
 0x6d9   : > { %8299 = vmatmul.mubr.msk.f32.gmra.mrb[60].mxu1 %vm1142_vm2, %v12731_v33  ;;  %v6437_v16 = vsel %vm1413_vm4, %v6435_v27, %v6436_v10 }
 0x6da   : > { %6395 = vmatprep.mubr.f32.mxu1 %v13241_v12 }
 0x6db   : > { %8322 = vmatmul.mubr.msk.f32.gmra.mrb[42].mxu0 %vm1142_vm2, %v6799_v7  ;;  %v6441_v7 = vrot.slane %v12706_v57, 1 }
 0x6dc   : > { %6931 = vmatprep.mubr.f32.mxu0 %v13241_v12 }
 0x6dd   : > { %8300 = vmatmul.mubr.msk.f32.gmra.mrb[62].mxu1 %vm1142_vm2, %v12743_v50  ;;  %v6443_v36 = vsel %vm1413_vm4, %v6441_v7, %v6442_v39 }
 0x6de   : > { %6539 = vmatprep.mubr.f32.mxu1 %v13241_v12 }
 0x6df   : > { %8323 = vmatmul.mubr.msk.f32.gmra.mrb[44].mxu0 %vm1142_vm2, %v6802_v40 }
 0x6e0   : > { %6937 = vmatprep.mubr.f32.mxu0 %v13241_v12 }
 0x6e1   : > { %8301 = vmatmul.mubr.msk.f32.vlgmr.msra.gmra.mrb[48].mxu1 %vm1142_vm2, %v6428_v0 }
 0x6e2   : > { %6545 = vmatprep.mubr.f32.mxu1 %v13241_v12 }
 0x6e3   : > { %8324 = vmatmul.mubr.msk.f32.gmra.mrb[46].mxu0 %vm1142_vm2, %v6805_v54 }
 0x6e4   : > { %7073 = vmatprep.mubr.f32.mxu0 %v13241_v12 }
 0x6e5   : > { %8302 = vmatmul.mubr.msk.f32.gmra.mrb[50].mxu1 %vm1142_vm2, %v6431_v18 }
 0x6e6   : > { %6551 = vmatprep.mubr.f32.mxu1 %v13241_v12 }
 0x6e7   : > { %8325 = vmatmul.mubr.msk.f32.vlgmr.msra.gmra.mrb[32].mxu0 %vm1142_vm2, %v12739_v15  ;;  %v6440_v15 = vsel %vm1413_vm4, %v6438_v53, %v6439_v3 }
 0x6e8   : > { %9580 = vmatpush1.bf16.msra.mxu0 %v9579_v34  ;;  %7079 = vmatprep.mubr.f32.mxu0 %v13241_v12 }
 0x6e9   : > { %8303 = vmatmul.mubr.msk.f32.gmra.mrb[52].mxu1 %vm1142_vm2, %v6434_v4  ;;  %9582 = vmatprep.subr.bf16.mxu0 %v9581_v21 }
 0x6ea   : > { %6557 = vmatprep.mubr.f32.mxu1 %v13241_v12 }
 0x6eb   : > { %8326 = vmatmul.mubr.msk.f32.gmra.mrb[34].mxu0 %vm1142_vm2, %v12758_v58  ;;  %v6445_v58 = vrot.slane %v12734_v20, 1 }
 0x6ec   : > { %7085 = vmatprep.mubr.f32.mxu0 %v13241_v12  ;;  %9584 = vmatpush1.bf16.msra.mxu0 %v9583_v46 }
 0x6ed   : > { %8304 = vmatmul.mubr.msk.f32.gmra.mrb[54].mxu1 %vm1142_vm2, %v6437_v16  ;;  %v6446_v57 = vsel %vm1413_vm4, %v6444_v56, %v6445_v58 }
 0x6ee   : > { %6563 = vmatprep.mubr.f32.mxu1 %v13241_v12 }
 0x6ef   : > { %8327 = vmatmul.mubr.msk.f32.gmra.mrb[36].mxu0 %vm1142_vm2, %v12764_v62  ;;  %v6448_v62 = vrot.slane %v12754_v45, 1 }
 0x6f0   : > { %7091 = vmatprep.mubr.f32.mxu0 %v13241_v12 }
 0x6f1   : > { %8305 = vmatmul.mubr.msk.f32.gmra.mrb[56].mxu1 %vm1142_vm2, %v6440_v15  ;;  %v6449_v33 = vsel %vm1413_vm4, %v6447_v22, %v6448_v62 }
 0x6f2   : > { %6569 = vmatprep.mubr.f32.mxu1 %v13241_v12 }
 0x6f3   : > { %8328 = vmatmul.mubr.msk.f32.gmra.mrb[38].mxu0 %vm1142_vm2, %v12778_v23 }
 0x6f4   : > { %7097 = vmatprep.mubr.f32.mxu0 %v13241_v12 }
 0x6f5   : > { %8306 = vmatmul.mubr.msk.f32.gmra.mrb[58].mxu1 %vm1142_vm2, %v6443_v36 }
 0x6f6   : > { %6575 = vmatprep.mubr.f32.mxu1 %v13241_v12 }
 0x6f7   : > { %8329 = vmatmul.mubr.msk.f32.gmra.mrb[40].mxu0 %vm1142_vm2, %v12784_v59 }
 0x6f8   : > { %7103 = vmatprep.mubr.f32.mxu0 %v13241_v12 }
 0x6f9   : > { %8307 = vmatmul.mubr.msk.f32.gmra.mrb[60].mxu1 %vm1142_vm2, %v6446_v57 }
 0x6fa   : > { %6581 = vmatprep.mubr.f32.mxu1 %v13241_v12 }
 0x6fb   : > { %8330 = vmatmul.mubr.msk.f32.gmra.mrb[42].mxu0 %vm1142_vm2, %v12795_v63 }
 0x6fc   : > { %7109 = vmatprep.mubr.f32.mxu0 %v13241_v12 }
 0x6fd   : > { %8308 = vmatmul.mubr.msk.f32.gmra.mrb[62].mxu1 %vm1142_vm2, %v6449_v33 }
 0x6ff   : > { %8331 = vmatmul.mubr.msk.f32.gmra.mrb[44].mxu0 %vm1142_vm2, %v12804_v28 }
 0x700   : > { %7115 = vmatprep.mubr.f32.mxu0 %v13241_v12 }
 0x703   : > { %8332 = vmatmul.mubr.msk.f32.gmra.mrb[46].mxu0 %vm1142_vm2, %v12809_v55 }
 0x704   : > { %7251 = vmatprep.mubr.f32.mxu0 %v13241_v12 }
 0x707   : > { %8333 = vmatmul.mubr.msk.f32.vlgmr.msra.gmra.mrb[32].mxu0 %vm1142_vm2, %v12812_v30 }
 0x708   : > { %7257 = vmatprep.mubr.f32.mxu0 %v13241_v12 }
 0x70b   : > { %8334 = vmatmul.mubr.msk.f32.gmra.mrb[34].mxu0 %vm1142_vm2, %v12817_v44 }
 0x70c   : > { %7263 = vmatprep.mubr.f32.mxu0 %v13241_v12 }
 0x70f   : > { %8335 = vmatmul.mubr.msk.f32.gmra.mrb[36].mxu0 %vm1142_vm2, %v12826_v1 }
 0x710   : > { %7269 = vmatprep.mubr.f32.mxu0 %v13241_v12 }
 0x713   : > { %8336 = vmatmul.mubr.msk.f32.gmra.mrb[38].mxu0 %vm1142_vm2, %v12834_v26 }
 0x714   : > { %7275 = vmatprep.mubr.f32.mxu0 %v13241_v12 }
 0x717   : > { %8337 = vmatmul.mubr.msk.f32.gmra.mrb[40].mxu0 %vm1142_vm2, %v12840_v31 }
 0x718   : > { %7281 = vmatprep.mubr.f32.mxu0 %v13241_v12 }
 0x71b   : > { %8338 = vmatmul.mubr.msk.f32.gmra.mrb[42].mxu0 %vm1142_vm2, %v12843_v6 }
 0x71c   : > { %7287 = vmatprep.mubr.f32.mxu0 %v13241_v12 }
 0x71f   : > { %8339 = vmatmul.mubr.msk.f32.gmra.mrb[44].mxu0 %vm1142_vm2, %v12850_v9 }
 0x720   : > { %7293 = vmatprep.mubr.f32.mxu0 %v13241_v12 }
 0x723   : > { %8340 = vmatmul.mubr.msk.f32.gmra.mrb[46].mxu0 %vm1142_vm2, %v12856_v13  ;;  %v6116_v13 = vld [vmem:[%s13322_s19] sm:$0x3] }
 0x724   : > { %v13009_v51 = vrot.slane %v6116_v13, %v13318_v43  ;;  %v13012_v49 = vrot.slane %v6116_v13, %v13319_v11 }
 0x7b4   : > { %v6541_v20 = vpop.f32.mrb[48].mxu1 }
 0x7b5   : > { %v6543_v50 = vpop.f32.mrb[49].mxu1  ;;  %v9635_v14 = vadd.f32 %v6541_v20, %v13009_v51 }
 0x7b6   : > { %v9637_v42 = vadd.f32 %v6543_v50, %v13012_v49 }
 0x7b8   : > { %v6547_v45 = vpop.f32.mrb[50].mxu1 }
 0x7b9   : > { %v6549_v23 = vpop.f32.mrb[51].mxu1  ;;  %v9639_v41 = vadd.f32 %v6547_v45, %v13009_v51 }
 0x7ba   : > { %v9641_v43 = vadd.f32 %v6549_v23, %v13012_v49 }
 0x7bc   : > { %v6553_v59 = vpop.f32.mrb[52].mxu1 }
 0x7bd   : > { %v6555_v63 = vpop.f32.mrb[53].mxu1  ;;  %v9643_v25 = vadd.f32 %v6553_v59, %v13009_v51 }
 0x7be   : > { %v9645_v34 = vadd.f32 %v6555_v63, %v13012_v49 }
 0x7c0   : > { %v6559_v28 = vpop.f32.mrb[54].mxu1 }
 0x7c1   : > { %v6561_v55 = vpop.f32.mrb[55].mxu1  ;;  %v9647_v32 = vadd.f32 %v6559_v28, %v13009_v51 }
 0x7c2   : > { %v9649_v46 = vadd.f32 %v6561_v55, %v13012_v49 }
 0x7c4   : > { %v6565_v30 = vpop.f32.mrb[56].mxu1 }
 0x7c5   : > { %v6567_v44 = vpop.f32.mrb[57].mxu1  ;;  %v9651_v39 = vadd.f32 %v6565_v30, %v13009_v51 }
 0x7c6   : > { %v9653_v36 = vadd.f32 %v6567_v44, %v13012_v49 }
 0x7c8   : > { %v6571_v1 = vpop.f32.mrb[58].mxu1 }
 0x7c9   : > { %v6573_v26 = vpop.f32.mrb[59].mxu1  ;;  %v9655_v33 = vadd.f32 %v6571_v1, %v13009_v51 }
 0x7ca   : > { %v9657_v20 = vadd.f32 %v6573_v26, %v13012_v49 }
 0x7cc   : > { %v12997_v31 = vpop.f32.mrb[60].mxu1 }
 0x7cd   : > { %v12999_v6 = vpop.f32.mrb[61].mxu1  ;;  %v9659_v28 = vadd.f32 %v12997_v31, %v13009_v51 }
 0x7ce   : > { %v9661_v55 = vadd.f32 %v12999_v6, %v13012_v49 }
 0x7d0   : > { %v13001_v12 = vpop.f32.mrb[62].mxu1 }
 0x7d1   : > { %v13003_v9 = vpop.f32.mrb[63].mxu1 }
 0x7d2   : > { %v9665_v6 = vadd.f32 %v13003_v9, %v13012_v49 }
 0x7da   : > { %v7253_v40 = vpop.f32.mrb[32].mxu0 }
 0x7db   : > { %v9636_v0 = vadd.f32 %v9635_v14, %v7253_v40  ;;  %v7255_v52 = vpop.f32.mrb[33].mxu0 }
 0x7dc   : > { %v9638_v5 = vadd.f32 %v9637_v42, %v7255_v52 }
 0x7dd   : > { %v7316_v29 = vmax.f32 %v9636_v0, 0.0 }
 0x7de   : > { %v7317_v54 = vmax.f32 %v9638_v5, 0.0  ;;  %v7259_v18 = vpop.f32.mrb[34].mxu0 }
 0x7df   : > { %7739 = vst [vmem:[%s10997_s6 + $0x18] sm:$0xff] %v7316_v29  ;;  %v9640_v11 = vadd.f32 %v9639_v41, %v7259_v18  ;;  %v7261_v17 = vpop.f32.mrb[35].mxu0 }
 0x7e0   : > { %7740 = vst.msk [vmem:[%s10997_s6 + $0x20] sm:$0xff] %vm7634_vm1, %v7317_v54  ;;  %v9642_v37 = vadd.f32 %v9641_v43, %v7261_v17 }
 0x7e1   : > { %7827 = vst.msk [vmem:[%s10997_s6 + $0x20] sm:$0xff] %vm7722_vm9, %v12384_v47  ;;  %v7318_v8 = vmax.f32 %v9640_v11, 0.0 }
 0x7e2   : > { %v7319_v21 = vmax.f32 %v9642_v37, 0.0  ;;  %v7265_v4 = vpop.f32.mrb[36].mxu0 }
 0x7e3   : > { %7741 = vst [vmem:[%s10997_s6 + $0x48] sm:$0xff] %v7318_v8  ;;  %v9644_v27 = vadd.f32 %v9643_v25, %v7265_v4  ;;  %v7267_v10 = vpop.f32.mrb[37].mxu0 }
 0x7e4   : > { %7742 = vst.msk [vmem:[%s10997_s6 + $0x50] sm:$0xff] %vm7634_vm1, %v7319_v21  ;;  %v9646_v24 = vadd.f32 %v9645_v34, %v7267_v10 }
 0x7e5   : > { %7829 = vst.msk [vmem:[%s10997_s6 + $0x50] sm:$0xff] %vm7722_vm9, %v12389_v35  ;;  %v7320_v47 = vmax.f32 %v9644_v27, 0.0 }
 0x7e6   : > { %v7321_v16 = vmax.f32 %v9646_v24, 0.0  ;;  %v7271_v53 = vpop.f32.mrb[38].mxu0 }
 0x7e7   : > { %7743 = vst [vmem:[%s10997_s6 + $0x78] sm:$0xff] %v7320_v47  ;;  %v9648_v3 = vadd.f32 %v9647_v32, %v7271_v53  ;;  %v7273_v15 = vpop.f32.mrb[39].mxu0 }
 0x7e8   : > { %7744 = vst.msk [vmem:[%s10997_s6 + $0x80] sm:$0xff] %vm7634_vm1, %v7321_v16  ;;  %v9650_v7 = vadd.f32 %v9649_v46, %v7273_v15 }
 0x7e9   : > { %7831 = vst.msk [vmem:[%s10997_s6 + $0x80] sm:$0xff] %vm7722_vm9, %v12394_v19  ;;  %v7322_v35 = vmax.f32 %v9648_v3, 0.0 }
 0x7ea   : > { %v7323_v56 = vmax.f32 %v9650_v7, 0.0  ;;  %v7277_v58 = vpop.f32.mrb[40].mxu0 }
 0x7eb   : > { %7745 = vst [vmem:[%s10997_s6 + $0xa8] sm:$0xff] %v7322_v35  ;;  %v9652_v57 = vadd.f32 %v9651_v39, %v7277_v58  ;;  %v7279_v22 = vpop.f32.mrb[41].mxu0 }
 0x7ec   : > { %7746 = vst.msk [vmem:[%s10997_s6 + $0xb0] sm:$0xff] %vm7634_vm1, %v7323_v56  ;;  %v9654_v62 = vadd.f32 %v9653_v36, %v7279_v22 }
 0x7ed   : > { %7833 = vst.msk [vmem:[%s10997_s6 + $0xb0] sm:$0xff] %vm7722_vm9, %v12399_v38  ;;  %v7324_v19 = vmax.f32 %v9652_v57, 0.0 }
 0x7ee   : > { %v7325_v50 = vmax.f32 %v9654_v62, 0.0  ;;  %v7283_v45 = vpop.f32.mrb[42].mxu0 }
 0x7ef   : > { %7747 = vst [vmem:[%s10997_s6 + $0xd8] sm:$0xff] %v7324_v19  ;;  %v9656_v23 = vadd.f32 %v9655_v33, %v7283_v45  ;;  %v7285_v59 = vpop.f32.mrb[43].mxu0 }
 0x7f0   : > { %7748 = vst.msk [vmem:[%s10997_s6 + $0xe0] sm:$0xff] %vm7634_vm1, %v7325_v50  ;;  %v9658_v63 = vadd.f32 %v9657_v20, %v7285_v59 }
 0x7f1   : > { %7835 = vst.msk [vmem:[%s10997_s6 + $0xe0] sm:$0xff] %vm7722_vm9, %v12404_v2  ;;  %v7326_v38 = vmax.f32 %v9656_v23, 0.0  ;;  %v9663_v2 = vadd.f32 %v13001_v12, %v13009_v51 }
 0x7f2   : > { %v7327_v30 = vmax.f32 %v9658_v63, 0.0  ;;  %v7289_v44 = vpop.f32.mrb[44].mxu0 }
 0x7f3   : > { %7749 = vst [vmem:[%s10997_s6 + $0x108] sm:$0xff] %v7326_v38  ;;  %v9660_v1 = vadd.f32 %v9659_v28, %v7289_v44  ;;  %v7291_v26 = vpop.f32.mrb[45].mxu0 }
 0x7f4   : > { %7750 = vst.msk [vmem:[%s10997_s6 + $0x110] sm:$0xff] %vm7634_vm1, %v7327_v30  ;;  %v9662_v31 = vadd.f32 %v9661_v55, %v7291_v26 }
 0x7f5   : > { %7837 = vst.msk [vmem:[%s10997_s6 + $0x110] sm:$0xff] %vm7722_vm9, %v12409_v48  ;;  %v7328_v13 = vmax.f32 %v9660_v1, 0.0 }
 0x7f6   : > { %v7329_v14 = vmax.f32 %v9662_v31, 0.0  ;;  %v7295_v42 = vpop.f32.mrb[46].mxu0 }
 0x7f7   : > { %7751 = vst [vmem:[%s10997_s6 + $0x138] sm:$0xff] %v7328_v13  ;;  %v9664_v40 = vadd.f32 %v9663_v2, %v7295_v42  ;;  %v7297_v0 = vpop.f32.mrb[47].mxu0 }
 0x7f8   : > { %7752 = vst.msk [vmem:[%s10997_s6 + $0x140] sm:$0xff] %vm7634_vm1, %v7329_v14  ;;  %v9666_v12 = vadd.f32 %v9665_v6, %v7297_v0 }
 0x7f9   : > { %7839 = vst.msk [vmem:[%s10997_s6 + $0x140] sm:$0xff] %vm7722_vm9, %v12417_v60  ;;  %v7330_v48 = vmax.f32 %v9664_v40, 0.0 }
 0x7fa   : > { %v7331_v51 = vmax.f32 %v9666_v12, 0.0 }
 0x7fb   : > { %7753 = vst [vmem:[%s10997_s6 + $0x168] sm:$0xff] %v7330_v48 }
 0x7fc   : > { %7754 = vst.msk [vmem:[%s10997_s6 + $0x170] sm:$0xff] %vm7634_vm1, %v7331_v51 }
 0x7fd   : > { %7841 = vst.msk [vmem:[%s10997_s6 + $0x170] sm:$0xff] %vm7722_vm9, %v12612_v61 }
 0x7fe   : > { %10405 = shalt.err (!%p10402_p9)
}
 0x7ff   : > { %s10406_s6 = scalar_lea.hbm %s13081_s23, 6144  ;;  %s10410_s25 = scalar_lea.hbm %s13323_s22, 12288 }
 0x800   : > { %p10407_p4 = scmp.ne.s32.totalorder %s13081_s23, %s10406_s6  ;;  %p10411_p5 = scmp.lt.u32.totalorder %s13081_s23, %s13323_s22 }
 0x801   : > { %p10412_p2 = scmp.lt.u32.totalorder %s10410_s25, %s10406_s6  ;;  %p10414_p10 = scmp.lt.u32.totalorder %s10406_s6, %s13081_s23 }
 0x802   : > { %p10408_p3 = pnand %p10407_p4, %p13324_p1 }
 0x803   : > { %p10413_p7 = por %p10412_p2, %p10411_p5 }
 0x804   : > { %p10409_p0 = pneg %p10408_p3 }
 0x805   : > { %p10415_p11 = por %p10414_p10, %p10413_p7 }
 0x807   : > { %p10416_p12 = pnand %p10415_p11, %p10409_p0 }
 0x809   : > { %10419 = shalt.err (!%p10416_p12)
}
 0x80a   : > { %s10495_s17 = smov 768   ;;  %s10496_s9 = smov 48  }
 0x80b   : > { %10067 = dma.vmem_to_hbm [thread:$0]  (%p13324_p1), %s13084_s20, 6144, %s13081_s23, %s7844_s1, %s10495_s17, %s10495_s17, %s10496_s9  }
 0x80c PF: > { %s7872_s26 = sand.u32 1, %s10462_s27   ;;  %p13325_p13 = scmp.ne.s32.totalorder %s13216_s21, 0 }
 0x80d   : > { %p13326_p8 = scmp.ge.s32.totalorder %s10474_s30, 2  ;;  %s7873_s6 = scalar_lea.sflag [#allocation4], %s7872_s26 }
 0x80f   : > { %p10096_p6 = pnand %p13326_p8, %p13325_p13 }
 0x811   : > { %10457 = dma.done.wait (!%p10096_p6), %s7873_s6, 6144  }
 0x812   : > { %10459 = vsyncadd (!%p10096_p6), %s7873_s6, 4294961152  ;;  %p35_p9 = scmp.ge.s32.totalorder %s10811_s2, 4   ;;  %s13327_s27 = smov %s10466_s28 }
 0x813   : > { %s13328_s28 = smov %s10470_s29  ;;  %s13329_s29 = smov %s10823_s15 }
 0x814   : > { %s13330_s30 = smov %s10811_s2  ;;  %37 = sbr.rel (!%p35_p9) target bundleno = 21 (0x15), region = 201 }
 0x81b   :  { %7878 = vsyncpa [#allocation3], 1 }
 0x81c   :  { %7880 = vsyncpa [#allocation3 + $0x1], 1 }
 0x81d   :  { %7881 = vsyncpa [#allocation6], 1 }
 0x81e   :  { %7882 = vsyncpa [#allocation9], 1 }
 0x81f   :  { %7883 = vsyncpa [#allocation12], 1 }
 0x820   :  { %7884 = vsyncpa [#allocation15], 1 }
 0x821   :  { %7885 = vsyncpa [#allocation4], 1 }
 0x822   :  { %7887 = vsyncpa [#allocation4 + $0x1], 1 }

</bundles_post_ra>
